<compile_context>
chip_gen: v5e
topology: v5e:2x2
jax: 0.10.0
libtpu: 0.0.40
codegen_flags: <defaults>
</compile_context>

<pallas_src>
import jax
import jax.numpy as jnp
from jax.experimental import pallas as pl
from jax.experimental.pallas import tpu as pltpu

N_CLASSES = 46          # nn.Conv1d(out_channels, 46, ...)
OUT_CH = 3              # Inception out_channels
N_LSTM_LAYERS = 3
N_RESBLOCKS = 2         # Inception.forward only uses layer2 and layer3
BN_EPS = 1e-5


def _cdiv(a, b):
    return -(-a // b)


# ----------------------------------------------------------------------------
# Flat SMEM scalar-parameter layout for the CNN head
# ----------------------------------------------------------------------------
def _scal_offsets(seq_len):
    off, o = {}, 0
    off["w1"] = o; o += OUT_CH * seq_len * 7        # layer1 conv weight (co, ci=t, k)
    off["b1"] = o; o += OUT_CH                      # layer1 conv bias
    off["s1"] = o; o += OUT_CH                      # layer1 BN scale (eval affine)
    off["h1"] = o; o += OUT_CH                      # layer1 BN shift
    off["res"] = []
    for _ in range(N_RESBLOCKS):
        convs = []
        for _ in range(2):
            convs.append({"w": o, "sh": o + 27})    # 27 BN-folded weights + 3 shifts
            o += 30
        off["res"].append(convs)
    off["n"] = o
    return off


def _shift_lanes(x, s):
    """result[..., l] = x[..., l + s], zero fill out of range (static s, lane axis)."""
    if s == 0:
        return x
    L = x.shape[-1]
    if abs(s) >= L:
        return jnp.zeros_like(x)
    if s > 0:
        pad = jnp.zeros(x.shape[:-1] + (s,), x.dtype)
        return jnp.concatenate([x[..., s:], pad], axis=-1)
    pad = jnp.zeros(x.shape[:-1] + (-s,), x.dtype)
    return jnp.concatenate([pad, x[..., :L + s]], axis=-1)


def _tree_sum(vals):
    """Balanced-tree sum (breaks long serial accumulation chains)."""
    vals = list(vals)
    while len(vals) > 1:
        nxt = [vals[i] + vals[i + 1] for i in range(0, len(vals) - 1, 2)]
        if len(vals) % 2:
            nxt.append(vals[-1])
        vals = nxt
    return vals[0]


# ----------------------------------------------------------------------------
# Fused kernel (one grid step = one batch shard: LSTM stack + CNN head)
# ----------------------------------------------------------------------------
def _build_kernel(T, H, Bs):
    OFF = _scal_offsets(T)
    f32 = jnp.float32
    H4 = 4 * H
    # Full unroll only for short sequences (code size / vreg live-range control).
    lstm_unroll = True if T <= 16 else 8

    def kernel(xp_ref, whh_ref, wih_ref, b_ref, wl_ref, bl_ref, sc,
               out_ref, y_scr):
        # ------------------------- stacked LSTMs -------------------------
        whh0, whh1, whh2 = whh_ref[0], whh_ref[1], whh_ref[2]   # (H, 4H)
        wih1, wih2 = wih_ref[0], wih_ref[1]                     # (H, 4H)
        bias1, bias2 = b_ref[0], b_ref[1]                       # (1, 4H)

        # One tanh per cell over the fused (Bs, 4H) pre-activations:
        #   i, f, o columns: sigmoid(z) = 0.5 * tanh(0.5 * z) + 0.5
        #   g columns      : tanh(z)
        col = jax.lax.broadcasted_iota(jnp.int32, (1, H4), 1)
        is_g = jnp.logical_and(col >= 2 * H, col < 3 * H)
        pre = jnp.where(is_g, 1.0, 0.5).astype(f32)             # (1, 4H)
        post_a = pre
        post_b = jnp.where(is_g, 0.0, 0.5).astype(f32)

        def cell(z, c):
            gates = jnp.tanh(z * pre) * post_a + post_b         # PyTorch order i, f, g, o
            i = gates[:, 0:H]
            f = gates[:, H:2 * H]
            g = gates[:, 2 * H:3 * H]
            o = gates[:, 3 * H:4 * H]
            c_new = f * c + i * g
            return o * jnp.tanh(c_new), c_new

        z0s = jnp.zeros((Bs, H), f32)

        def step(t, carry):
            h0, c0, h1, c1, h2, c2 = carry
            # Recurrent contributions depend only on the carry -> issue all three first
            # (independent MXU pushes overlap; the dependent chain is 3 pushes / step).
            r0 = jnp.dot(h0, whh0, preferred_element_type=f32)
            r1 = jnp.dot(h1, whh1, preferred_element_type=f32)
            r2 = jnp.dot(h2, whh2, preferred_element_type=f32)
            h0, c0 = cell(xp_ref[t] + r0, c0)
            h1, c1 = cell(jnp.dot(h0, wih1, preferred_element_type=f32) + r1 + bias1, c1)
            h2, c2 = cell(jnp.dot(h1, wih2, preferred_element_type=f32) + r2 + bias2, c2)
            y_scr[t] = h2                                       # Dropouts = identity (eval)
            return h0, c0, h1, c1, h2, c2

        jax.lax.fori_loop(0, T, step, (z0s,) * 6, unroll=lstm_unroll)

        # --------------------------- CNN head -----------------------------
        # Channels live as (Bs, H) lane vectors (spatial axis on lanes).
        X0 = y_scr[...]                                         # (T, Bs, H): channel t

        # Inception.layer1: Conv1d(T -> 3, k=7, pad=3) + bias, ReLU (VPU FMAs).
        # 21 independent per-(co,k) partial chains + tree reduce over k.
        parts = [[] for _ in range(OUT_CH)]
        for k in range(7):
            xs = _shift_lanes(X0, k - 3)                        # (T, Bs, H)
            for co in range(OUT_CH):
                base = OFF["w1"] + co * T * 7 + k
                a = sc[base] * xs[0]
                for t in range(1, T):
                    a = a + sc[base + t * 7] * xs[t]
                parts[co].append(a)
        ys = [jnp.maximum(_tree_sum(parts[co]) + sc[OFF["b1"] + co], 0.0)
              for co in range(OUT_CH)]

        # MaxPool1d(k=3, s=2, p=1), kept lane-dilated: even lane 2j holds pooled[j],
        # odd lanes are don't-care.  Zero border fill == MaxPool's -inf padding here
        # because inputs are post-ReLU (>= 0).  Then eval-mode BN affine.
        ystk = jnp.stack(ys, axis=0)                            # (3, Bs, H)
        m2 = jnp.maximum(jnp.maximum(_shift_lanes(ystk, -1), ystk),
                         _shift_lanes(ystk, 1))
        chans = [m2[co] * sc[OFF["s1"] + co] + sc[OFF["h1"] + co]
                 for co in range(OUT_CH)]

        # Resblocks (Inception.layer2/layer3): Conv3-BN-ReLU-(Dropout)-Conv3-BN + skip, ReLU.
        # Convs act on the pooled sequence => stride-2 lane shifts in the dilated layout;
        # eval-mode BN is pre-folded into the conv weights / shift.
        def conv_bn(cin, ow, osh):
            xst = jnp.stack(cin, axis=0)                        # (3, Bs, H)
            sh = [_shift_lanes(xst, 2 * (k - 1)) for k in range(3)]
            outs = []
            for co in range(OUT_CH):
                terms = [sc[ow + (co * 3 + ci) * 3 + k] * sh[k][ci]
                         for ci in range(OUT_CH) for k in range(3)]
                outs.append(_tree_sum(terms) + sc[osh + co])
            return outs

        for r in range(N_RESBLOCKS):
            p0, p1 = OFF["res"][r]
            y1 = [jnp.maximum(v, 0.0) for v in conv_bn(chans, p0["w"], p0["sh"])]
            y2 = conv_bn(y1, p1["w"], p1["sh"])
            chans = [jnp.maximum(y2[co] + chans[co], 0.0) for co in range(OUT_CH)]

        # last_conv(3 -> 46, k=3, pad=1) fused with the global average pool:
        #   mean_j conv(x)[n, j] = bl[n] + (1/Lp) * sum_{ci,k} wl[n, ci, k] * S[ci, k]
        # so only 3 window sums per channel are needed, then one (Bs, 9) x (9, 46) matmul.
        Lp = H // 2
        lane = jax.lax.broadcasted_iota(jnp.int32, (1, H), 1)
        even = (lane % 2) == 0
        cols = []
        for ci in range(OUT_CH):
            xe = jnp.where(even, chans[ci], 0.0)
            tot = jnp.sum(xe, axis=-1, keepdims=True)           # (Bs, 1)
            first = xe[:, 0:1]                                  # pooled[0]
            last = xe[:, H - 2:H - 1]                           # pooled[Lp - 1]
            cols += [tot - last, tot, tot - first]              # k = 0, 1, 2
        svec = jnp.concatenate(cols, axis=-1) * (1.0 / Lp)      # (Bs, 9)
        logits = (jnp.dot(svec, wl_ref[...], preferred_element_type=f32)
                  + bl_ref[...])                                # (Bs, 46)
        mx = jnp.max(logits, axis=-1, keepdims=True)
        e = jnp.exp(logits - mx)
        out_ref[:, 0, :] = e / jnp.sum(e, axis=-1, keepdims=True)

    return kernel


# ----------------------------------------------------------------------------
# Helpers for the wrapper
# ----------------------------------------------------------------------------
def _tensorcores_per_chip():
    """Best-effort query; defaults to 1 (safe: no batch split on single-TC chips)."""
    try:
        info = pltpu.get_tpu_info()
        for attr in ("tensorcore_count", "num_tensorcores", "num_cores", "core_count"):
            v = getattr(info, attr, None)
            if v:
                return int(v)
    except Exception:
        pass
    try:
        return max(1, int(getattr(jax.devices()[0], "num_cores", 1) or 1))
    except Exception:
        return 1


def _padded_bytes(shape, itemsize=4):
    shape = tuple(int(d) for d in shape)
    if len(shape) == 0:
        return itemsize
    if len(shape) == 1:
        return _cdiv(shape[0], 128) * 128 * itemsize
    lead = 1
    for d in shape[:-2]:
        lead *= d
    return lead * _cdiv(shape[-2], 8) * 8 * _cdiv(shape[-1], 128) * 128 * itemsize


# ----------------------------------------------------------------------------
# Forward pass
# ----------------------------------------------------------------------------
def inception_lstm_forward(x, params):
    """x: (B, T, I) float32 as in the PyTorch module (batch, seq_len, input_size)."""
    wih4, whh4, b4, scal, wl9, blast = params
    B, T, I = x.shape
    H = whh4.shape[1]
    H4 = 4 * H
    assert I == H, "model uses nn.LSTM(input_size, input_size)"
    assert H % 2 == 0, "lane-dilated MaxPool path requires an even spatial length"
    assert scal.shape[0] == _scal_offsets(T)["n"]

    x = x.astype(jnp.float32)
    # Hoisted layer-0 input projection, emitted TIME-MAJOR (T, B, 4H) so the kernel reads
    # xp_ref[t] directly (no in-kernel staging scratch / row copies).
    xp = jnp.einsum("bti,ig->tbg", x, wih4[0]) + b4[0]          # (T, B, 4H)

    # Chip-aware batch sharding: only split across TensorCores when the chip has more
    # than one (v7x) and the per-shard batch keeps the sublane tiling (multiple of 8).
    cores = _tensorcores_per_chip()
    num_shards = 2 if (cores >= 2 and B % 2 == 0 and (B // 2) % 8 == 0) else 1
    Bs = B // num_shards
    kernel = _build_kernel(T, H, Bs)

    wih12 = wih4[1:]                                            # (2, H, 4H)
    b12 = b4[1:]                                                # (2, 1, 4H)

    # VMEM footprint (double-buffered pipelined operands + scratch) with margin.
    est = (2 * (_padded_bytes((T, Bs, H4)) + _padded_bytes(whh4.shape)
                + _padded_bytes(wih12.shape) + _padded_bytes(b12.shape)
                + _padded_bytes(wl9.shape) + _padded_bytes(blast.shape)
                + _padded_bytes((Bs, 1, N_CLASSES)))
           + _padded_bytes((T, Bs, H)))
    vmem_limit = int(min(max(2 * est + (2 << 20), 32 << 20), 128 << 20))

    out = pl.pallas_call(
        kernel,
        out_shape=jax.ShapeDtypeStruct((B, 1, N_CLASSES), jnp.float32),
        grid=(num_shards,),
        in_specs=[
            pl.BlockSpec((T, Bs, H4), lambda s: (0, s, 0)),                   # layer-0 proj (time-major)
            pl.BlockSpec((N_LSTM_LAYERS, H, H4), lambda s: (0, 0, 0)),        # W_hh (all layers)
            pl.BlockSpec((N_LSTM_LAYERS - 1, H, H4), lambda s: (0, 0, 0)),    # W_ih (layers 1,2)
            pl.BlockSpec((N_LSTM_LAYERS - 1, 1, H4), lambda s: (0, 0, 0)),    # b (layers 1,2)
            pl.BlockSpec((OUT_CH * 3, N_CLASSES), lambda s: (0, 0)),          # last_conv (9,46)
            pl.BlockSpec((1, N_CLASSES), lambda s: (0, 0)),                   # last_conv bias
            pl.BlockSpec(memory_space=pltpu.MemorySpace.SMEM),                # flat CNN scalars
        ],
        out_specs=pl.BlockSpec((Bs, 1, N_CLASSES), lambda s: (s, 0, 0)),
        scratch_shapes=[
            pltpu.VMEM((T, Bs, H), jnp.float32),    # final-layer LSTM outputs (CNN input)
        ],
        compiler_params=pltpu.CompilerParams(
            dimension_semantics=("parallel",),
            vmem_limit_bytes=vmem_limit,
        ),
    )(xp, whh4, wih12, b12, wl9, blast, scal)
    return out.reshape(B, N_CLASSES)


# ----------------------------------------------------------------------------
# Deterministic synthetic parameters (eval-mode, kernel-ready packing)
# ----------------------------------------------------------------------------
def init_params(key, seq_len, input_size):
    H = input_size
    H4 = 4 * H
    ks = iter(jax.random.split(key, 64))

    def nrm(shape, scale=0.1):
        return scale * jax.random.normal(next(ks), shape, dtype=jnp.float32)

    def bn_affine(c):
        gamma = 1.0 + 0.1 * jax.random.normal(next(ks), (c,), dtype=jnp.float32)
        beta = 0.1 * jax.random.normal(next(ks), (c,), dtype=jnp.float32)
        mean = 0.1 * jax.random.normal(next(ks), (c,), dtype=jnp.float32)
        var = jax.random.uniform(next(ks), (c,), minval=0.5, maxval=1.5, dtype=jnp.float32)
        scale = gamma / jnp.sqrt(var + BN_EPS)
        return scale, beta - mean * scale                       # eval-mode affine

    # LSTM: fused-gate layout (in_dim, 4H), PyTorch gate order (i, f, g, o) along the
    # last axis (i.e. torch W_ih/W_hh transposed); b = b_ih + b_hh.
    wih4 = nrm((N_LSTM_LAYERS, H, H4))
    whh4 = nrm((N_LSTM_LAYERS, H, H4))
    b4 = nrm((N_LSTM_LAYERS, 1, H4))

    # Inception.layer1: Conv1d(seq_len -> 3, k=7, p=3); eval BN applied after ReLU+pool.
    w1 = nrm((OUT_CH, seq_len, 7))
    b1 = nrm((OUT_CH,), 0.01)
    s1, h1 = bn_affine(OUT_CH)
    pieces = [w1.reshape(-1), b1, s1, h1]

    # Resblocks: two Conv1d(3->3, k=3, p=1)+BN each; fold eval BN into conv weight/shift.
    for _ in range(N_RESBLOCKS):
        for _ in range(2):
            w = nrm((OUT_CH, OUT_CH, 3))
            b = nrm((OUT_CH,), 0.01)
            s, h = bn_affine(OUT_CH)
            pieces.append((w * s[:, None, None]).reshape(-1))
            pieces.append(b * s + h)
    scal = jnp.concatenate(pieces).astype(jnp.float32)

    # last_conv: Conv1d(3 -> 46, k=3, p=1), repacked as (ci*3+k, n) for the fused
    # conv + global-average-pool matmul in the kernel.
    wl = nrm((N_CLASSES, OUT_CH, 3))
    blast = nrm((1, N_CLASSES), 0.01)
    wl9 = jnp.transpose(wl, (1, 2, 0)).reshape(OUT_CH * 3, N_CLASSES)
    return wih4, whh4, b4, scal, wl9, blast


if __name__ == "__main__":
    # small shapes: batch=2, seq (= Conv1d in_channels) = 4, input_size (= LSTM hidden) = 16
    B, T, I = 2, 4, 16
    key = jax.random.PRNGKey(0)
    kx, kp = jax.random.split(key)
    x = jax.random.normal(kx, (B, T, I), dtype=jnp.float32)
    params = init_params(kp, seq_len=T, input_size=I)

    fwd = jax.jit(inception_lstm_forward)
    out = fwd(x, params)
    jax.block_until_ready(out)

    assert out.shape == (B, N_CLASSES)
    assert bool(jnp.all(jnp.isfinite(out)))
    assert bool(jnp.allclose(jnp.sum(out, axis=1), 1.0, atol=1e-5))
    print("KERNEL_OK")
</pallas_src>

<mosaic_0001>
module attributes {stable_mosaic.version = 11 : i64} {
  func.func @kernel(%arg0: i32, %arg1: memref<4x2x64xf32, #tpu.memory_space<vmem>>, %arg2: memref<3x16x64xf32, #tpu.memory_space<vmem>>, %arg3: memref<2x16x64xf32, #tpu.memory_space<vmem>>, %arg4: memref<2x1x64xf32, #tpu.memory_space<vmem>>, %arg5: memref<9x46xf32, #tpu.memory_space<vmem>>, %arg6: memref<1x46xf32, #tpu.memory_space<vmem>>, %arg7: memref<213xf32, #tpu.memory_space<smem>>, %arg8: memref<2x1x46xf32, #tpu.memory_space<vmem>>, %arg9: memref<4x2x16xf32, #tpu.memory_space<vmem>>) attributes {dimension_semantics = [#tpu.dimension_semantics<parallel>], iteration_bounds = array<i64: 1>, scalar_prefetch = 0 : i64, scratch_operands = 1 : i64, tpu.core_type = #tpu.core_type<tc>, window_params = [{transform_indices = @transform_0, window_bounds = array<i64: 4, 2, 64>}, {pipeline_mode = #tpu.pipeline_mode<synchronous>, transform_indices = @transform_1, window_bounds = array<i64: 3, 16, 64>}, {pipeline_mode = #tpu.pipeline_mode<synchronous>, transform_indices = @transform_2, window_bounds = array<i64: 2, 16, 64>}, {pipeline_mode = #tpu.pipeline_mode<synchronous>, transform_indices = @transform_3, window_bounds = array<i64: 2, 1, 64>}, {pipeline_mode = #tpu.pipeline_mode<synchronous>, transform_indices = @transform_4, window_bounds = array<i64: 9, 46>}, {pipeline_mode = #tpu.pipeline_mode<synchronous>, transform_indices = @transform_5, window_bounds = array<i64: 1, 46>}, {transform_indices = @transform_6, window_bounds = array<i64: 213>}, {transform_indices = @transform_7, window_bounds = array<i64: 2, 1, 46>}]} {
    %c0 = arith.constant 0 : index
    %c0_0 = arith.constant 0 : index
    %c0_1 = arith.constant 0 : index
    %0 = vector.load %arg2[%c0, %c0_0, %c0_1] : memref<3x16x64xf32, #tpu.memory_space<vmem>>, vector<1x16x64xf32>
    %1 = vector.shape_cast %0 : vector<1x16x64xf32> to vector<16x64xf32>
    %c1 = arith.constant 1 : index
    %c0_2 = arith.constant 0 : index
    %c0_3 = arith.constant 0 : index
    %2 = vector.load %arg2[%c1, %c0_2, %c0_3] : memref<3x16x64xf32, #tpu.memory_space<vmem>>, vector<1x16x64xf32>
    %3 = vector.shape_cast %2 : vector<1x16x64xf32> to vector<16x64xf32>
    %c2 = arith.constant 2 : index
    %c0_4 = arith.constant 0 : index
    %c0_5 = arith.constant 0 : index
    %4 = vector.load %arg2[%c2, %c0_4, %c0_5] : memref<3x16x64xf32, #tpu.memory_space<vmem>>, vector<1x16x64xf32>
    %5 = vector.shape_cast %4 : vector<1x16x64xf32> to vector<16x64xf32>
    %c0_6 = arith.constant 0 : index
    %c0_7 = arith.constant 0 : index
    %c0_8 = arith.constant 0 : index
    %6 = vector.load %arg3[%c0_6, %c0_7, %c0_8] : memref<2x16x64xf32, #tpu.memory_space<vmem>>, vector<1x16x64xf32>
    %7 = vector.shape_cast %6 : vector<1x16x64xf32> to vector<16x64xf32>
    %c1_9 = arith.constant 1 : index
    %c0_10 = arith.constant 0 : index
    %c0_11 = arith.constant 0 : index
    %8 = vector.load %arg3[%c1_9, %c0_10, %c0_11] : memref<2x16x64xf32, #tpu.memory_space<vmem>>, vector<1x16x64xf32>
    %9 = vector.shape_cast %8 : vector<1x16x64xf32> to vector<16x64xf32>
    %c0_12 = arith.constant 0 : index
    %c0_13 = arith.constant 0 : index
    %c0_14 = arith.constant 0 : index
    %10 = vector.load %arg4[%c0_12, %c0_13, %c0_14] : memref<2x1x64xf32, #tpu.memory_space<vmem>>, vector<1x1x64xf32>
    %11 = vector.shape_cast %10 : vector<1x1x64xf32> to vector<1x64xf32>
    %c1_15 = arith.constant 1 : index
    %c0_16 = arith.constant 0 : index
    %c0_17 = arith.constant 0 : index
    %12 = vector.load %arg4[%c1_15, %c0_16, %c0_17] : memref<2x1x64xf32, #tpu.memory_space<vmem>>, vector<1x1x64xf32>
    %13 = vector.shape_cast %12 : vector<1x1x64xf32> to vector<1x64xf32>
    %14 = tpu.iota {dimensions = array<i32: 1>} : vector<1x64xi32>
    %c32_i32 = arith.constant 32 : i32
    %15 = vector.broadcast %c32_i32 : i32 to vector<1x64xi32>
    %16 = arith.cmpi sge, %14, %15 : vector<1x64xi32>
    %c48_i32 = arith.constant 48 : i32
    %17 = vector.broadcast %c48_i32 : i32 to vector<1x64xi32>
    %18 = arith.cmpi slt, %14, %17 : vector<1x64xi32>
    %19 = arith.andi %16, %18 : vector<1x64xi1>
    %cst = arith.constant 1.000000e+00 : f32
    %cst_18 = arith.constant 5.000000e-01 : f32
    %20 = vector.broadcast %cst : f32 to vector<1x64xf32>
    %21 = vector.broadcast %cst_18 : f32 to vector<1x64xf32>
    %22 = arith.select %19, %20, %21 : vector<1x64xi1>, vector<1x64xf32>
    %cst_19 = arith.constant 0.000000e+00 : f32
    %cst_20 = arith.constant 5.000000e-01 : f32
    %23 = vector.broadcast %cst_19 : f32 to vector<1x64xf32>
    %24 = vector.broadcast %cst_20 : f32 to vector<1x64xf32>
    %25 = arith.select %19, %23, %24 : vector<1x64xi1>, vector<1x64xf32>
    %cst_21 = arith.constant 0.000000e+00 : f32
    %26 = vector.broadcast %cst_21 : f32 to vector<2x16xf32>
    %c0_i32 = arith.constant 0 : i32
    %cst_22 = arith.constant dense<0.000000e+00> : vector<2x64xf32>
    %27 = tpu.matmul %26, %1, %cst_22 {dimension_numbers = #tpu.dot_dimension_numbers<[1], [0], [0], [1], [0, 0, 1, 1], [], []>} : vector<2x16xf32>, vector<16x64xf32>, vector<2x64xf32> -> vector<2x64xf32>
    %cst_23 = arith.constant dense<0.000000e+00> : vector<2x64xf32>
    %28 = tpu.matmul %26, %3, %cst_23 {dimension_numbers = #tpu.dot_dimension_numbers<[1], [0], [0], [1], [0, 0, 1, 1], [], []>} : vector<2x16xf32>, vector<16x64xf32>, vector<2x64xf32> -> vector<2x64xf32>
    %cst_24 = arith.constant dense<0.000000e+00> : vector<2x64xf32>
    %29 = tpu.matmul %26, %5, %cst_24 {dimension_numbers = #tpu.dot_dimension_numbers<[1], [0], [0], [1], [0, 0, 1, 1], [], []>} : vector<2x16xf32>, vector<16x64xf32>, vector<2x64xf32> -> vector<2x64xf32>
    %30 = arith.index_cast %c0_i32 : i32 to index
    %c0_25 = arith.constant 0 : index
    %c0_26 = arith.constant 0 : index
    %31 = vector.load %arg1[%30, %c0_25, %c0_26] : memref<4x2x64xf32, #tpu.memory_space<vmem>>, vector<1x2x64xf32>
    %32 = vector.shape_cast %31 : vector<1x2x64xf32> to vector<2x64xf32>
    %33 = arith.addf %32, %27 : vector<2x64xf32>
    %34 = vector.broadcast %22 : vector<1x64xf32> to vector<2x64xf32>
    %35 = arith.mulf %33, %34 : vector<2x64xf32>
    %36 = math.tanh %35 : vector<2x64xf32>
    %37 = vector.broadcast %22 : vector<1x64xf32> to vector<2x64xf32>
    %38 = arith.mulf %36, %37 : vector<2x64xf32>
    %39 = vector.broadcast %25 : vector<1x64xf32> to vector<2x64xf32>
    %40 = arith.addf %38, %39 : vector<2x64xf32>
    %41 = vector.extract_strided_slice %40 {offsets = [0, 0], sizes = [2, 16], strides = [1, 1]} : vector<2x64xf32> to vector<2x16xf32>
    %42 = vector.extract_strided_slice %40 {offsets = [0, 16], sizes = [2, 16], strides = [1, 1]} : vector<2x64xf32> to vector<2x16xf32>
    %43 = vector.extract_strided_slice %40 {offsets = [0, 32], sizes = [2, 16], strides = [1, 1]} : vector<2x64xf32> to vector<2x16xf32>
    %44 = vector.extract_strided_slice %40 {offsets = [0, 48], sizes = [2, 16], strides = [1, 1]} : vector<2x64xf32> to vector<2x16xf32>
    %45 = arith.mulf %42, %26 : vector<2x16xf32>
    %46 = arith.mulf %41, %43 : vector<2x16xf32>
    %47 = arith.addf %45, %46 : vector<2x16xf32>
    %48 = math.tanh %47 : vector<2x16xf32>
    %49 = arith.mulf %44, %48 : vector<2x16xf32>
    %cst_27 = arith.constant dense<0.000000e+00> : vector<2x64xf32>
    %50 = tpu.matmul %49, %7, %cst_27 {dimension_numbers = #tpu.dot_dimension_numbers<[1], [0], [0], [1], [0, 0, 1, 1], [], []>} : vector<2x16xf32>, vector<16x64xf32>, vector<2x64xf32> -> vector<2x64xf32>
    %51 = arith.addf %50, %28 : vector<2x64xf32>
    %52 = vector.broadcast %11 : vector<1x64xf32> to vector<2x64xf32>
    %53 = arith.addf %51, %52 : vector<2x64xf32>
    %54 = vector.broadcast %22 : vector<1x64xf32> to vector<2x64xf32>
    %55 = arith.mulf %53, %54 : vector<2x64xf32>
    %56 = math.tanh %55 : vector<2x64xf32>
    %57 = vector.broadcast %22 : vector<1x64xf32> to vector<2x64xf32>
    %58 = arith.mulf %56, %57 : vector<2x64xf32>
    %59 = vector.broadcast %25 : vector<1x64xf32> to vector<2x64xf32>
    %60 = arith.addf %58, %59 : vector<2x64xf32>
    %61 = vector.extract_strided_slice %60 {offsets = [0, 0], sizes = [2, 16], strides = [1, 1]} : vector<2x64xf32> to vector<2x16xf32>
    %62 = vector.extract_strided_slice %60 {offsets = [0, 16], sizes = [2, 16], strides = [1, 1]} : vector<2x64xf32> to vector<2x16xf32>
    %63 = vector.extract_strided_slice %60 {offsets = [0, 32], sizes = [2, 16], strides = [1, 1]} : vector<2x64xf32> to vector<2x16xf32>
    %64 = vector.extract_strided_slice %60 {offsets = [0, 48], sizes = [2, 16], strides = [1, 1]} : vector<2x64xf32> to vector<2x16xf32>
    %65 = arith.mulf %62, %26 : vector<2x16xf32>
    %66 = arith.mulf %61, %63 : vector<2x16xf32>
    %67 = arith.addf %65, %66 : vector<2x16xf32>
    %68 = math.tanh %67 : vector<2x16xf32>
    %69 = arith.mulf %64, %68 : vector<2x16xf32>
    %cst_28 = arith.constant dense<0.000000e+00> : vector<2x64xf32>
    %70 = tpu.matmul %69, %9, %cst_28 {dimension_numbers = #tpu.dot_dimension_numbers<[1], [0], [0], [1], [0, 0, 1, 1], [], []>} : vector<2x16xf32>, vector<16x64xf32>, vector<2x64xf32> -> vector<2x64xf32>
    %71 = arith.addf %70, %29 : vector<2x64xf32>
    %72 = vector.broadcast %13 : vector<1x64xf32> to vector<2x64xf32>
    %73 = arith.addf %71, %72 : vector<2x64xf32>
    %74 = vector.broadcast %22 : vector<1x64xf32> to vector<2x64xf32>
    %75 = arith.mulf %73, %74 : vector<2x64xf32>
    %76 = math.tanh %75 : vector<2x64xf32>
    %77 = vector.broadcast %22 : vector<1x64xf32> to vector<2x64xf32>
    %78 = arith.mulf %76, %77 : vector<2x64xf32>
    %79 = vector.broadcast %25 : vector<1x64xf32> to vector<2x64xf32>
    %80 = arith.addf %78, %79 : vector<2x64xf32>
    %81 = vector.extract_strided_slice %80 {offsets = [0, 0], sizes = [2, 16], strides = [1, 1]} : vector<2x64xf32> to vector<2x16xf32>
    %82 = vector.extract_strided_slice %80 {offsets = [0, 16], sizes = [2, 16], strides = [1, 1]} : vector<2x64xf32> to vector<2x16xf32>
    %83 = vector.extract_strided_slice %80 {offsets = [0, 32], sizes = [2, 16], strides = [1, 1]} : vector<2x64xf32> to vector<2x16xf32>
    %84 = vector.extract_strided_slice %80 {offsets = [0, 48], sizes = [2, 16], strides = [1, 1]} : vector<2x64xf32> to vector<2x16xf32>
    %85 = arith.mulf %82, %26 : vector<2x16xf32>
    %86 = arith.mulf %81, %83 : vector<2x16xf32>
    %87 = arith.addf %85, %86 : vector<2x16xf32>
    %88 = math.tanh %87 : vector<2x16xf32>
    %89 = arith.mulf %84, %88 : vector<2x16xf32>
    %90 = arith.index_cast %c0_i32 : i32 to index
    %c0_29 = arith.constant 0 : index
    %c0_30 = arith.constant 0 : index
    %91 = vector.load %arg9[%90, %c0_29, %c0_30] : memref<4x2x16xf32, #tpu.memory_space<vmem>>, vector<1x2x16xf32>
    %92 = vector.shape_cast %91 : vector<1x2x16xf32> to vector<2x16xf32>
    %93 = vector.shape_cast %89 : vector<2x16xf32> to vector<1x2x16xf32>
    tpu.vector_store %arg9[%90, %c0_29, %c0_30], %93 {strides = array<i32>} : memref<4x2x16xf32, #tpu.memory_space<vmem>>, vector<1x2x16xf32>,
    %c1_i32 = arith.constant 1 : i32
    %cst_31 = arith.constant dense<0.000000e+00> : vector<2x64xf32>
    %94 = tpu.matmul %49, %1, %cst_31 {dimension_numbers = #tpu.dot_dimension_numbers<[1], [0], [0], [1], [0, 0, 1, 1], [], []>} : vector<2x16xf32>, vector<16x64xf32>, vector<2x64xf32> -> vector<2x64xf32>
    %cst_32 = arith.constant dense<0.000000e+00> : vector<2x64xf32>
    %95 = tpu.matmul %69, %3, %cst_32 {dimension_numbers = #tpu.dot_dimension_numbers<[1], [0], [0], [1], [0, 0, 1, 1], [], []>} : vector<2x16xf32>, vector<16x64xf32>, vector<2x64xf32> -> vector<2x64xf32>
    %cst_33 = arith.constant dense<0.000000e+00> : vector<2x64xf32>
    %96 = tpu.matmul %89, %5, %cst_33 {dimension_numbers = #tpu.dot_dimension_numbers<[1], [0], [0], [1], [0, 0, 1, 1], [], []>} : vector<2x16xf32>, vector<16x64xf32>, vector<2x64xf32> -> vector<2x64xf32>
    %97 = arith.index_cast %c1_i32 : i32 to index
    %c0_34 = arith.constant 0 : index
    %c0_35 = arith.constant 0 : index
    %98 = vector.load %arg1[%97, %c0_34, %c0_35] : memref<4x2x64xf32, #tpu.memory_space<vmem>>, vector<1x2x64xf32>
    %99 = vector.shape_cast %98 : vector<1x2x64xf32> to vector<2x64xf32>
    %100 = arith.addf %99, %94 : vector<2x64xf32>
    %101 = vector.broadcast %22 : vector<1x64xf32> to vector<2x64xf32>
    %102 = arith.mulf %100, %101 : vector<2x64xf32>
    %103 = math.tanh %102 : vector<2x64xf32>
    %104 = vector.broadcast %22 : vector<1x64xf32> to vector<2x64xf32>
    %105 = arith.mulf %103, %104 : vector<2x64xf32>
    %106 = vector.broadcast %25 : vector<1x64xf32> to vector<2x64xf32>
    %107 = arith.addf %105, %106 : vector<2x64xf32>
    %108 = vector.extract_strided_slice %107 {offsets = [0, 0], sizes = [2, 16], strides = [1, 1]} : vector<2x64xf32> to vector<2x16xf32>
    %109 = vector.extract_strided_slice %107 {offsets = [0, 16], sizes = [2, 16], strides = [1, 1]} : vector<2x64xf32> to vector<2x16xf32>
    %110 = vector.extract_strided_slice %107 {offsets = [0, 32], sizes = [2, 16], strides = [1, 1]} : vector<2x64xf32> to vector<2x16xf32>
    %111 = vector.extract_strided_slice %107 {offsets = [0, 48], sizes = [2, 16], strides = [1, 1]} : vector<2x64xf32> to vector<2x16xf32>
    %112 = arith.mulf %109, %47 : vector<2x16xf32>
    %113 = arith.mulf %108, %110 : vector<2x16xf32>
    %114 = arith.addf %112, %113 : vector<2x16xf32>
    %115 = math.tanh %114 : vector<2x16xf32>
    %116 = arith.mulf %111, %115 : vector<2x16xf32>
    %cst_36 = arith.constant dense<0.000000e+00> : vector<2x64xf32>
    %117 = tpu.matmul %116, %7, %cst_36 {dimension_numbers = #tpu.dot_dimension_numbers<[1], [0], [0], [1], [0, 0, 1, 1], [], []>} : vector<2x16xf32>, vector<16x64xf32>, vector<2x64xf32> -> vector<2x64xf32>
    %118 = arith.addf %117, %95 : vector<2x64xf32>
    %119 = vector.broadcast %11 : vector<1x64xf32> to vector<2x64xf32>
    %120 = arith.addf %118, %119 : vector<2x64xf32>
    %121 = vector.broadcast %22 : vector<1x64xf32> to vector<2x64xf32>
    %122 = arith.mulf %120, %121 : vector<2x64xf32>
    %123 = math.tanh %122 : vector<2x64xf32>
    %124 = vector.broadcast %22 : vector<1x64xf32> to vector<2x64xf32>
    %125 = arith.mulf %123, %124 : vector<2x64xf32>
    %126 = vector.broadcast %25 : vector<1x64xf32> to vector<2x64xf32>
    %127 = arith.addf %125, %126 : vector<2x64xf32>
    %128 = vector.extract_strided_slice %127 {offsets = [0, 0], sizes = [2, 16], strides = [1, 1]} : vector<2x64xf32> to vector<2x16xf32>
    %129 = vector.extract_strided_slice %127 {offsets = [0, 16], sizes = [2, 16], strides = [1, 1]} : vector<2x64xf32> to vector<2x16xf32>
    %130 = vector.extract_strided_slice %127 {offsets = [0, 32], sizes = [2, 16], strides = [1, 1]} : vector<2x64xf32> to vector<2x16xf32>
    %131 = vector.extract_strided_slice %127 {offsets = [0, 48], sizes = [2, 16], strides = [1, 1]} : vector<2x64xf32> to vector<2x16xf32>
    %132 = arith.mulf %129, %67 : vector<2x16xf32>
    %133 = arith.mulf %128, %130 : vector<2x16xf32>
    %134 = arith.addf %132, %133 : vector<2x16xf32>
    %135 = math.tanh %134 : vector<2x16xf32>
    %136 = arith.mulf %131, %135 : vector<2x16xf32>
    %cst_37 = arith.constant dense<0.000000e+00> : vector<2x64xf32>
    %137 = tpu.matmul %136, %9, %cst_37 {dimension_numbers = #tpu.dot_dimension_numbers<[1], [0], [0], [1], [0, 0, 1, 1], [], []>} : vector<2x16xf32>, vector<16x64xf32>, vector<2x64xf32> -> vector<2x64xf32>
    %138 = arith.addf %137, %96 : vector<2x64xf32>
    %139 = vector.broadcast %13 : vector<1x64xf32> to vector<2x64xf32>
    %140 = arith.addf %138, %139 : vector<2x64xf32>
    %141 = vector.broadcast %22 : vector<1x64xf32> to vector<2x64xf32>
    %142 = arith.mulf %140, %141 : vector<2x64xf32>
    %143 = math.tanh %142 : vector<2x64xf32>
    %144 = vector.broadcast %22 : vector<1x64xf32> to vector<2x64xf32>
    %145 = arith.mulf %143, %144 : vector<2x64xf32>
    %146 = vector.broadcast %25 : vector<1x64xf32> to vector<2x64xf32>
    %147 = arith.addf %145, %146 : vector<2x64xf32>
    %148 = vector.extract_strided_slice %147 {offsets = [0, 0], sizes = [2, 16], strides = [1, 1]} : vector<2x64xf32> to vector<2x16xf32>
    %149 = vector.extract_strided_slice %147 {offsets = [0, 16], sizes = [2, 16], strides = [1, 1]} : vector<2x64xf32> to vector<2x16xf32>
    %150 = vector.extract_strided_slice %147 {offsets = [0, 32], sizes = [2, 16], strides = [1, 1]} : vector<2x64xf32> to vector<2x16xf32>
    %151 = vector.extract_strided_slice %147 {offsets = [0, 48], sizes = [2, 16], strides = [1, 1]} : vector<2x64xf32> to vector<2x16xf32>
    %152 = arith.mulf %149, %87 : vector<2x16xf32>
    %153 = arith.mulf %148, %150 : vector<2x16xf32>
    %154 = arith.addf %152, %153 : vector<2x16xf32>
    %155 = math.tanh %154 : vector<2x16xf32>
    %156 = arith.mulf %151, %155 : vector<2x16xf32>
    %157 = arith.index_cast %c1_i32 : i32 to index
    %c0_38 = arith.constant 0 : index
    %c0_39 = arith.constant 0 : index
    %158 = vector.load %arg9[%157, %c0_38, %c0_39] : memref<4x2x16xf32, #tpu.memory_space<vmem>>, vector<1x2x16xf32>
    %159 = vector.shape_cast %158 : vector<1x2x16xf32> to vector<2x16xf32>
    %160 = vector.shape_cast %156 : vector<2x16xf32> to vector<1x2x16xf32>
    tpu.vector_store %arg9[%157, %c0_38, %c0_39], %160 {strides = array<i32>} : memref<4x2x16xf32, #tpu.memory_space<vmem>>, vector<1x2x16xf32>,
    %c2_i32 = arith.constant 2 : i32
    %cst_40 = arith.constant dense<0.000000e+00> : vector<2x64xf32>
    %161 = tpu.matmul %116, %1, %cst_40 {dimension_numbers = #tpu.dot_dimension_numbers<[1], [0], [0], [1], [0, 0, 1, 1], [], []>} : vector<2x16xf32>, vector<16x64xf32>, vector<2x64xf32> -> vector<2x64xf32>
    %cst_41 = arith.constant dense<0.000000e+00> : vector<2x64xf32>
    %162 = tpu.matmul %136, %3, %cst_41 {dimension_numbers = #tpu.dot_dimension_numbers<[1], [0], [0], [1], [0, 0, 1, 1], [], []>} : vector<2x16xf32>, vector<16x64xf32>, vector<2x64xf32> -> vector<2x64xf32>
    %cst_42 = arith.constant dense<0.000000e+00> : vector<2x64xf32>
    %163 = tpu.matmul %156, %5, %cst_42 {dimension_numbers = #tpu.dot_dimension_numbers<[1], [0], [0], [1], [0, 0, 1, 1], [], []>} : vector<2x16xf32>, vector<16x64xf32>, vector<2x64xf32> -> vector<2x64xf32>
    %164 = arith.index_cast %c2_i32 : i32 to index
    %c0_43 = arith.constant 0 : index
    %c0_44 = arith.constant 0 : index
    %165 = vector.load %arg1[%164, %c0_43, %c0_44] : memref<4x2x64xf32, #tpu.memory_space<vmem>>, vector<1x2x64xf32>
    %166 = vector.shape_cast %165 : vector<1x2x64xf32> to vector<2x64xf32>
    %167 = arith.addf %166, %161 : vector<2x64xf32>
    %168 = vector.broadcast %22 : vector<1x64xf32> to vector<2x64xf32>
    %169 = arith.mulf %167, %168 : vector<2x64xf32>
    %170 = math.tanh %169 : vector<2x64xf32>
    %171 = vector.broadcast %22 : vector<1x64xf32> to vector<2x64xf32>
    %172 = arith.mulf %170, %171 : vector<2x64xf32>
    %173 = vector.broadcast %25 : vector<1x64xf32> to vector<2x64xf32>
    %174 = arith.addf %172, %173 : vector<2x64xf32>
    %175 = vector.extract_strided_slice %174 {offsets = [0, 0], sizes = [2, 16], strides = [1, 1]} : vector<2x64xf32> to vector<2x16xf32>
    %176 = vector.extract_strided_slice %174 {offsets = [0, 16], sizes = [2, 16], strides = [1, 1]} : vector<2x64xf32> to vector<2x16xf32>
    %177 = vector.extract_strided_slice %174 {offsets = [0, 32], sizes = [2, 16], strides = [1, 1]} : vector<2x64xf32> to vector<2x16xf32>
    %178 = vector.extract_strided_slice %174 {offsets = [0, 48], sizes = [2, 16], strides = [1, 1]} : vector<2x64xf32> to vector<2x16xf32>
    %179 = arith.mulf %176, %114 : vector<2x16xf32>
    %180 = arith.mulf %175, %177 : vector<2x16xf32>
    %181 = arith.addf %179, %180 : vector<2x16xf32>
    %182 = math.tanh %181 : vector<2x16xf32>
    %183 = arith.mulf %178, %182 : vector<2x16xf32>
    %cst_45 = arith.constant dense<0.000000e+00> : vector<2x64xf32>
    %184 = tpu.matmul %183, %7, %cst_45 {dimension_numbers = #tpu.dot_dimension_numbers<[1], [0], [0], [1], [0, 0, 1, 1], [], []>} : vector<2x16xf32>, vector<16x64xf32>, vector<2x64xf32> -> vector<2x64xf32>
    %185 = arith.addf %184, %162 : vector<2x64xf32>
    %186 = vector.broadcast %11 : vector<1x64xf32> to vector<2x64xf32>
    %187 = arith.addf %185, %186 : vector<2x64xf32>
    %188 = vector.broadcast %22 : vector<1x64xf32> to vector<2x64xf32>
    %189 = arith.mulf %187, %188 : vector<2x64xf32>
    %190 = math.tanh %189 : vector<2x64xf32>
    %191 = vector.broadcast %22 : vector<1x64xf32> to vector<2x64xf32>
    %192 = arith.mulf %190, %191 : vector<2x64xf32>
    %193 = vector.broadcast %25 : vector<1x64xf32> to vector<2x64xf32>
    %194 = arith.addf %192, %193 : vector<2x64xf32>
    %195 = vector.extract_strided_slice %194 {offsets = [0, 0], sizes = [2, 16], strides = [1, 1]} : vector<2x64xf32> to vector<2x16xf32>
    %196 = vector.extract_strided_slice %194 {offsets = [0, 16], sizes = [2, 16], strides = [1, 1]} : vector<2x64xf32> to vector<2x16xf32>
    %197 = vector.extract_strided_slice %194 {offsets = [0, 32], sizes = [2, 16], strides = [1, 1]} : vector<2x64xf32> to vector<2x16xf32>
    %198 = vector.extract_strided_slice %194 {offsets = [0, 48], sizes = [2, 16], strides = [1, 1]} : vector<2x64xf32> to vector<2x16xf32>
    %199 = arith.mulf %196, %134 : vector<2x16xf32>
    %200 = arith.mulf %195, %197 : vector<2x16xf32>
    %201 = arith.addf %199, %200 : vector<2x16xf32>
    %202 = math.tanh %201 : vector<2x16xf32>
    %203 = arith.mulf %198, %202 : vector<2x16xf32>
    %cst_46 = arith.constant dense<0.000000e+00> : vector<2x64xf32>
    %204 = tpu.matmul %203, %9, %cst_46 {dimension_numbers = #tpu.dot_dimension_numbers<[1], [0], [0], [1], [0, 0, 1, 1], [], []>} : vector<2x16xf32>, vector<16x64xf32>, vector<2x64xf32> -> vector<2x64xf32>
    %205 = arith.addf %204, %163 : vector<2x64xf32>
    %206 = vector.broadcast %13 : vector<1x64xf32> to vector<2x64xf32>
    %207 = arith.addf %205, %206 : vector<2x64xf32>
    %208 = vector.broadcast %22 : vector<1x64xf32> to vector<2x64xf32>
    %209 = arith.mulf %207, %208 : vector<2x64xf32>
    %210 = math.tanh %209 : vector<2x64xf32>
    %211 = vector.broadcast %22 : vector<1x64xf32> to vector<2x64xf32>
    %212 = arith.mulf %210, %211 : vector<2x64xf32>
    %213 = vector.broadcast %25 : vector<1x64xf32> to vector<2x64xf32>
    %214 = arith.addf %212, %213 : vector<2x64xf32>
    %215 = vector.extract_strided_slice %214 {offsets = [0, 0], sizes = [2, 16], strides = [1, 1]} : vector<2x64xf32> to vector<2x16xf32>
    %216 = vector.extract_strided_slice %214 {offsets = [0, 16], sizes = [2, 16], strides = [1, 1]} : vector<2x64xf32> to vector<2x16xf32>
    %217 = vector.extract_strided_slice %214 {offsets = [0, 32], sizes = [2, 16], strides = [1, 1]} : vector<2x64xf32> to vector<2x16xf32>
    %218 = vector.extract_strided_slice %214 {offsets = [0, 48], sizes = [2, 16], strides = [1, 1]} : vector<2x64xf32> to vector<2x16xf32>
    %219 = arith.mulf %216, %154 : vector<2x16xf32>
    %220 = arith.mulf %215, %217 : vector<2x16xf32>
    %221 = arith.addf %219, %220 : vector<2x16xf32>
    %222 = math.tanh %221 : vector<2x16xf32>
    %223 = arith.mulf %218, %222 : vector<2x16xf32>
    %224 = arith.index_cast %c2_i32 : i32 to index
    %c0_47 = arith.constant 0 : index
    %c0_48 = arith.constant 0 : index
    %225 = vector.load %arg9[%224, %c0_47, %c0_48] : memref<4x2x16xf32, #tpu.memory_space<vmem>>, vector<1x2x16xf32>
    %226 = vector.shape_cast %225 : vector<1x2x16xf32> to vector<2x16xf32>
    %227 = vector.shape_cast %223 : vector<2x16xf32> to vector<1x2x16xf32>
    tpu.vector_store %arg9[%224, %c0_47, %c0_48], %227 {strides = array<i32>} : memref<4x2x16xf32, #tpu.memory_space<vmem>>, vector<1x2x16xf32>,
    %c3_i32 = arith.constant 3 : i32
    %cst_49 = arith.constant dense<0.000000e+00> : vector<2x64xf32>
    %228 = tpu.matmul %183, %1, %cst_49 {dimension_numbers = #tpu.dot_dimension_numbers<[1], [0], [0], [1], [0, 0, 1, 1], [], []>} : vector<2x16xf32>, vector<16x64xf32>, vector<2x64xf32> -> vector<2x64xf32>
    %cst_50 = arith.constant dense<0.000000e+00> : vector<2x64xf32>
    %229 = tpu.matmul %203, %3, %cst_50 {dimension_numbers = #tpu.dot_dimension_numbers<[1], [0], [0], [1], [0, 0, 1, 1], [], []>} : vector<2x16xf32>, vector<16x64xf32>, vector<2x64xf32> -> vector<2x64xf32>
    %cst_51 = arith.constant dense<0.000000e+00> : vector<2x64xf32>
    %230 = tpu.matmul %223, %5, %cst_51 {dimension_numbers = #tpu.dot_dimension_numbers<[1], [0], [0], [1], [0, 0, 1, 1], [], []>} : vector<2x16xf32>, vector<16x64xf32>, vector<2x64xf32> -> vector<2x64xf32>
    %231 = arith.index_cast %c3_i32 : i32 to index
    %c0_52 = arith.constant 0 : index
    %c0_53 = arith.constant 0 : index
    %232 = vector.load %arg1[%231, %c0_52, %c0_53] : memref<4x2x64xf32, #tpu.memory_space<vmem>>, vector<1x2x64xf32>
    %233 = vector.shape_cast %232 : vector<1x2x64xf32> to vector<2x64xf32>
    %234 = arith.addf %233, %228 : vector<2x64xf32>
    %235 = vector.broadcast %22 : vector<1x64xf32> to vector<2x64xf32>
    %236 = arith.mulf %234, %235 : vector<2x64xf32>
    %237 = math.tanh %236 : vector<2x64xf32>
    %238 = vector.broadcast %22 : vector<1x64xf32> to vector<2x64xf32>
    %239 = arith.mulf %237, %238 : vector<2x64xf32>
    %240 = vector.broadcast %25 : vector<1x64xf32> to vector<2x64xf32>
    %241 = arith.addf %239, %240 : vector<2x64xf32>
    %242 = vector.extract_strided_slice %241 {offsets = [0, 0], sizes = [2, 16], strides = [1, 1]} : vector<2x64xf32> to vector<2x16xf32>
    %243 = vector.extract_strided_slice %241 {offsets = [0, 16], sizes = [2, 16], strides = [1, 1]} : vector<2x64xf32> to vector<2x16xf32>
    %244 = vector.extract_strided_slice %241 {offsets = [0, 32], sizes = [2, 16], strides = [1, 1]} : vector<2x64xf32> to vector<2x16xf32>
    %245 = vector.extract_strided_slice %241 {offsets = [0, 48], sizes = [2, 16], strides = [1, 1]} : vector<2x64xf32> to vector<2x16xf32>
    %246 = arith.mulf %243, %181 : vector<2x16xf32>
    %247 = arith.mulf %242, %244 : vector<2x16xf32>
    %248 = arith.addf %246, %247 : vector<2x16xf32>
    %249 = math.tanh %248 : vector<2x16xf32>
    %250 = arith.mulf %245, %249 : vector<2x16xf32>
    %cst_54 = arith.constant dense<0.000000e+00> : vector<2x64xf32>
    %251 = tpu.matmul %250, %7, %cst_54 {dimension_numbers = #tpu.dot_dimension_numbers<[1], [0], [0], [1], [0, 0, 1, 1], [], []>} : vector<2x16xf32>, vector<16x64xf32>, vector<2x64xf32> -> vector<2x64xf32>
    %252 = arith.addf %251, %229 : vector<2x64xf32>
    %253 = vector.broadcast %11 : vector<1x64xf32> to vector<2x64xf32>
    %254 = arith.addf %252, %253 : vector<2x64xf32>
    %255 = vector.broadcast %22 : vector<1x64xf32> to vector<2x64xf32>
    %256 = arith.mulf %254, %255 : vector<2x64xf32>
    %257 = math.tanh %256 : vector<2x64xf32>
    %258 = vector.broadcast %22 : vector<1x64xf32> to vector<2x64xf32>
    %259 = arith.mulf %257, %258 : vector<2x64xf32>
    %260 = vector.broadcast %25 : vector<1x64xf32> to vector<2x64xf32>
    %261 = arith.addf %259, %260 : vector<2x64xf32>
    %262 = vector.extract_strided_slice %261 {offsets = [0, 0], sizes = [2, 16], strides = [1, 1]} : vector<2x64xf32> to vector<2x16xf32>
    %263 = vector.extract_strided_slice %261 {offsets = [0, 16], sizes = [2, 16], strides = [1, 1]} : vector<2x64xf32> to vector<2x16xf32>
    %264 = vector.extract_strided_slice %261 {offsets = [0, 32], sizes = [2, 16], strides = [1, 1]} : vector<2x64xf32> to vector<2x16xf32>
    %265 = vector.extract_strided_slice %261 {offsets = [0, 48], sizes = [2, 16], strides = [1, 1]} : vector<2x64xf32> to vector<2x16xf32>
    %266 = arith.mulf %263, %201 : vector<2x16xf32>
    %267 = arith.mulf %262, %264 : vector<2x16xf32>
    %268 = arith.addf %266, %267 : vector<2x16xf32>
    %269 = math.tanh %268 : vector<2x16xf32>
    %270 = arith.mulf %265, %269 : vector<2x16xf32>
    %cst_55 = arith.constant dense<0.000000e+00> : vector<2x64xf32>
    %271 = tpu.matmul %270, %9, %cst_55 {dimension_numbers = #tpu.dot_dimension_numbers<[1], [0], [0], [1], [0, 0, 1, 1], [], []>} : vector<2x16xf32>, vector<16x64xf32>, vector<2x64xf32> -> vector<2x64xf32>
    %272 = arith.addf %271, %230 : vector<2x64xf32>
    %273 = vector.broadcast %13 : vector<1x64xf32> to vector<2x64xf32>
    %274 = arith.addf %272, %273 : vector<2x64xf32>
    %275 = vector.broadcast %22 : vector<1x64xf32> to vector<2x64xf32>
    %276 = arith.mulf %274, %275 : vector<2x64xf32>
    %277 = math.tanh %276 : vector<2x64xf32>
    %278 = vector.broadcast %22 : vector<1x64xf32> to vector<2x64xf32>
    %279 = arith.mulf %277, %278 : vector<2x64xf32>
    %280 = vector.broadcast %25 : vector<1x64xf32> to vector<2x64xf32>
    %281 = arith.addf %279, %280 : vector<2x64xf32>
    %282 = vector.extract_strided_slice %281 {offsets = [0, 0], sizes = [2, 16], strides = [1, 1]} : vector<2x64xf32> to vector<2x16xf32>
    %283 = vector.extract_strided_slice %281 {offsets = [0, 16], sizes = [2, 16], strides = [1, 1]} : vector<2x64xf32> to vector<2x16xf32>
    %284 = vector.extract_strided_slice %281 {offsets = [0, 32], sizes = [2, 16], strides = [1, 1]} : vector<2x64xf32> to vector<2x16xf32>
    %285 = vector.extract_strided_slice %281 {offsets = [0, 48], sizes = [2, 16], strides = [1, 1]} : vector<2x64xf32> to vector<2x16xf32>
    %286 = arith.mulf %283, %221 : vector<2x16xf32>
    %287 = arith.mulf %282, %284 : vector<2x16xf32>
    %288 = arith.addf %286, %287 : vector<2x16xf32>
    %289 = math.tanh %288 : vector<2x16xf32>
    %290 = arith.mulf %285, %289 : vector<2x16xf32>
    %291 = arith.index_cast %c3_i32 : i32 to index
    %c0_56 = arith.constant 0 : index
    %c0_57 = arith.constant 0 : index
    %292 = vector.load %arg9[%291, %c0_56, %c0_57] : memref<4x2x16xf32, #tpu.memory_space<vmem>>, vector<1x2x16xf32>
    %293 = vector.shape_cast %292 : vector<1x2x16xf32> to vector<2x16xf32>
    %294 = vector.shape_cast %290 : vector<2x16xf32> to vector<1x2x16xf32>
    tpu.vector_store %arg9[%291, %c0_56, %c0_57], %294 {strides = array<i32>} : memref<4x2x16xf32, #tpu.memory_space<vmem>>, vector<1x2x16xf32>,
    %c4_i32 = arith.constant 4 : i32
    %c0_58 = arith.constant 0 : index
    %c0_59 = arith.constant 0 : index
    %c0_60 = arith.constant 0 : index
    %295 = vector.load %arg9[%c0_58, %c0_59, %c0_60] : memref<4x2x16xf32, #tpu.memory_space<vmem>>, vector<4x2x16xf32>
    %cst_61 = arith.constant 0.000000e+00 : f32
    %296 = vector.broadcast %cst_61 : f32 to vector<4x2x3xf32>
    %297 = vector.extract_strided_slice %295 {offsets = [0, 0, 0], sizes = [4, 2, 13], strides = [1, 1, 1]} : vector<4x2x16xf32> to vector<4x2x13xf32>
    %298 = tpu.concatenate %296, %297 in 2 : vector<4x2x3xf32>, vector<4x2x13xf32> -> vector<4x2x16xf32>
    %c0_62 = arith.constant 0 : index
    %299 = memref.load %arg7[%c0_62] : memref<213xf32, #tpu.memory_space<smem>>
    %300 = vector.extract_strided_slice %298 {offsets = [0, 0, 0], sizes = [1, 2, 16], strides = [1, 1, 1]} : vector<4x2x16xf32> to vector<1x2x16xf32>
    %301 = vector.shape_cast %300 : vector<1x2x16xf32> to vector<2x16xf32>
    %302 = vector.broadcast %299 : f32 to vector<2x16xf32>
    %303 = arith.mulf %302, %301 : vector<2x16xf32>
    %c7 = arith.constant 7 : index
    %304 = memref.load %arg7[%c7] : memref<213xf32, #tpu.memory_space<smem>>
    %305 = vector.extract_strided_slice %298 {offsets = [1, 0, 0], sizes = [1, 2, 16], strides = [1, 1, 1]} : vector<4x2x16xf32> to vector<1x2x16xf32>
    %306 = vector.shape_cast %305 : vector<1x2x16xf32> to vector<2x16xf32>
    %307 = vector.broadcast %304 : f32 to vector<2x16xf32>
    %308 = arith.mulf %307, %306 : vector<2x16xf32>
    %309 = arith.addf %303, %308 : vector<2x16xf32>
    %c14 = arith.constant 14 : index
    %310 = memref.load %arg7[%c14] : memref<213xf32, #tpu.memory_space<smem>>
    %311 = vector.extract_strided_slice %298 {offsets = [2, 0, 0], sizes = [1, 2, 16], strides = [1, 1, 1]} : vector<4x2x16xf32> to vector<1x2x16xf32>
    %312 = vector.shape_cast %311 : vector<1x2x16xf32> to vector<2x16xf32>
    %313 = vector.broadcast %310 : f32 to vector<2x16xf32>
    %314 = arith.mulf %313, %312 : vector<2x16xf32>
    %315 = arith.addf %309, %314 : vector<2x16xf32>
    %c21 = arith.constant 21 : index
    %316 = memref.load %arg7[%c21] : memref<213xf32, #tpu.memory_space<smem>>
    %317 = vector.extract_strided_slice %298 {offsets = [3, 0, 0], sizes = [1, 2, 16], strides = [1, 1, 1]} : vector<4x2x16xf32> to vector<1x2x16xf32>
    %318 = vector.shape_cast %317 : vector<1x2x16xf32> to vector<2x16xf32>
    %319 = vector.broadcast %316 : f32 to vector<2x16xf32>
    %320 = arith.mulf %319, %318 : vector<2x16xf32>
    %321 = arith.addf %315, %320 : vector<2x16xf32>
    %c28 = arith.constant 28 : index
    %322 = memref.load %arg7[%c28] : memref<213xf32, #tpu.memory_space<smem>>
    %323 = vector.extract_strided_slice %298 {offsets = [0, 0, 0], sizes = [1, 2, 16], strides = [1, 1, 1]} : vector<4x2x16xf32> to vector<1x2x16xf32>
    %324 = vector.shape_cast %323 : vector<1x2x16xf32> to vector<2x16xf32>
    %325 = vector.broadcast %322 : f32 to vector<2x16xf32>
    %326 = arith.mulf %325, %324 : vector<2x16xf32>
    %c35 = arith.constant 35 : index
    %327 = memref.load %arg7[%c35] : memref<213xf32, #tpu.memory_space<smem>>
    %328 = vector.extract_strided_slice %298 {offsets = [1, 0, 0], sizes = [1, 2, 16], strides = [1, 1, 1]} : vector<4x2x16xf32> to vector<1x2x16xf32>
    %329 = vector.shape_cast %328 : vector<1x2x16xf32> to vector<2x16xf32>
    %330 = vector.broadcast %327 : f32 to vector<2x16xf32>
    %331 = arith.mulf %330, %329 : vector<2x16xf32>
    %332 = arith.addf %326, %331 : vector<2x16xf32>
    %c42 = arith.constant 42 : index
    %333 = memref.load %arg7[%c42] : memref<213xf32, #tpu.memory_space<smem>>
    %334 = vector.extract_strided_slice %298 {offsets = [2, 0, 0], sizes = [1, 2, 16], strides = [1, 1, 1]} : vector<4x2x16xf32> to vector<1x2x16xf32>
    %335 = vector.shape_cast %334 : vector<1x2x16xf32> to vector<2x16xf32>
    %336 = vector.broadcast %333 : f32 to vector<2x16xf32>
    %337 = arith.mulf %336, %335 : vector<2x16xf32>
    %338 = arith.addf %332, %337 : vector<2x16xf32>
    %c49 = arith.constant 49 : index
    %339 = memref.load %arg7[%c49] : memref<213xf32, #tpu.memory_space<smem>>
    %340 = vector.extract_strided_slice %298 {offsets = [3, 0, 0], sizes = [1, 2, 16], strides = [1, 1, 1]} : vector<4x2x16xf32> to vector<1x2x16xf32>
    %341 = vector.shape_cast %340 : vector<1x2x16xf32> to vector<2x16xf32>
    %342 = vector.broadcast %339 : f32 to vector<2x16xf32>
    %343 = arith.mulf %342, %341 : vector<2x16xf32>
    %344 = arith.addf %338, %343 : vector<2x16xf32>
    %c56 = arith.constant 56 : index
    %345 = memref.load %arg7[%c56] : memref<213xf32, #tpu.memory_space<smem>>
    %346 = vector.extract_strided_slice %298 {offsets = [0, 0, 0], sizes = [1, 2, 16], strides = [1, 1, 1]} : vector<4x2x16xf32> to vector<1x2x16xf32>
    %347 = vector.shape_cast %346 : vector<1x2x16xf32> to vector<2x16xf32>
    %348 = vector.broadcast %345 : f32 to vector<2x16xf32>
    %349 = arith.mulf %348, %347 : vector<2x16xf32>
    %c63 = arith.constant 63 : index
    %350 = memref.load %arg7[%c63] : memref<213xf32, #tpu.memory_space<smem>>
    %351 = vector.extract_strided_slice %298 {offsets = [1, 0, 0], sizes = [1, 2, 16], strides = [1, 1, 1]} : vector<4x2x16xf32> to vector<1x2x16xf32>
    %352 = vector.shape_cast %351 : vector<1x2x16xf32> to vector<2x16xf32>
    %353 = vector.broadcast %350 : f32 to vector<2x16xf32>
    %354 = arith.mulf %353, %352 : vector<2x16xf32>
    %355 = arith.addf %349, %354 : vector<2x16xf32>
    %c70 = arith.constant 70 : index
    %356 = memref.load %arg7[%c70] : memref<213xf32, #tpu.memory_space<smem>>
    %357 = vector.extract_strided_slice %298 {offsets = [2, 0, 0], sizes = [1, 2, 16], strides = [1, 1, 1]} : vector<4x2x16xf32> to vector<1x2x16xf32>
    %358 = vector.shape_cast %357 : vector<1x2x16xf32> to vector<2x16xf32>
    %359 = vector.broadcast %356 : f32 to vector<2x16xf32>
    %360 = arith.mulf %359, %358 : vector<2x16xf32>
    %361 = arith.addf %355, %360 : vector<2x16xf32>
    %c77 = arith.constant 77 : index
    %362 = memref.load %arg7[%c77] : memref<213xf32, #tpu.memory_space<smem>>
    %363 = vector.extract_strided_slice %298 {offsets = [3, 0, 0], sizes = [1, 2, 16], strides = [1, 1, 1]} : vector<4x2x16xf32> to vector<1x2x16xf32>
    %364 = vector.shape_cast %363 : vector<1x2x16xf32> to vector<2x16xf32>
    %365 = vector.broadcast %362 : f32 to vector<2x16xf32>
    %366 = arith.mulf %365, %364 : vector<2x16xf32>
    %367 = arith.addf %361, %366 : vector<2x16xf32>
    %cst_63 = arith.constant 0.000000e+00 : f32
    %368 = vector.broadcast %cst_63 : f32 to vector<4x2x2xf32>
    %369 = vector.extract_strided_slice %295 {offsets = [0, 0, 0], sizes = [4, 2, 14], strides = [1, 1, 1]} : vector<4x2x16xf32> to vector<4x2x14xf32>
    %370 = tpu.concatenate %368, %369 in 2 : vector<4x2x2xf32>, vector<4x2x14xf32> -> vector<4x2x16xf32>
    %c1_64 = arith.constant 1 : index
    %371 = memref.load %arg7[%c1_64] : memref<213xf32, #tpu.memory_space<smem>>
    %372 = vector.extract_strided_slice %370 {offsets = [0, 0, 0], sizes = [1, 2, 16], strides = [1, 1, 1]} : vector<4x2x16xf32> to vector<1x2x16xf32>
    %373 = vector.shape_cast %372 : vector<1x2x16xf32> to vector<2x16xf32>
    %374 = vector.broadcast %371 : f32 to vector<2x16xf32>
    %375 = arith.mulf %374, %373 : vector<2x16xf32>
    %c8 = arith.constant 8 : index
    %376 = memref.load %arg7[%c8] : memref<213xf32, #tpu.memory_space<smem>>
    %377 = vector.extract_strided_slice %370 {offsets = [1, 0, 0], sizes = [1, 2, 16], strides = [1, 1, 1]} : vector<4x2x16xf32> to vector<1x2x16xf32>
    %378 = vector.shape_cast %377 : vector<1x2x16xf32> to vector<2x16xf32>
    %379 = vector.broadcast %376 : f32 to vector<2x16xf32>
    %380 = arith.mulf %379, %378 : vector<2x16xf32>
    %381 = arith.addf %375, %380 : vector<2x16xf32>
    %c15 = arith.constant 15 : index
    %382 = memref.load %arg7[%c15] : memref<213xf32, #tpu.memory_space<smem>>
    %383 = vector.extract_strided_slice %370 {offsets = [2, 0, 0], sizes = [1, 2, 16], strides = [1, 1, 1]} : vector<4x2x16xf32> to vector<1x2x16xf32>
    %384 = vector.shape_cast %383 : vector<1x2x16xf32> to vector<2x16xf32>
    %385 = vector.broadcast %382 : f32 to vector<2x16xf32>
    %386 = arith.mulf %385, %384 : vector<2x16xf32>
    %387 = arith.addf %381, %386 : vector<2x16xf32>
    %c22 = arith.constant 22 : index
    %388 = memref.load %arg7[%c22] : memref<213xf32, #tpu.memory_space<smem>>
    %389 = vector.extract_strided_slice %370 {offsets = [3, 0, 0], sizes = [1, 2, 16], strides = [1, 1, 1]} : vector<4x2x16xf32> to vector<1x2x16xf32>
    %390 = vector.shape_cast %389 : vector<1x2x16xf32> to vector<2x16xf32>
    %391 = vector.broadcast %388 : f32 to vector<2x16xf32>
    %392 = arith.mulf %391, %390 : vector<2x16xf32>
    %393 = arith.addf %387, %392 : vector<2x16xf32>
    %c29 = arith.constant 29 : index
    %394 = memref.load %arg7[%c29] : memref<213xf32, #tpu.memory_space<smem>>
    %395 = vector.extract_strided_slice %370 {offsets = [0, 0, 0], sizes = [1, 2, 16], strides = [1, 1, 1]} : vector<4x2x16xf32> to vector<1x2x16xf32>
    %396 = vector.shape_cast %395 : vector<1x2x16xf32> to vector<2x16xf32>
    %397 = vector.broadcast %394 : f32 to vector<2x16xf32>
    %398 = arith.mulf %397, %396 : vector<2x16xf32>
    %c36 = arith.constant 36 : index
    %399 = memref.load %arg7[%c36] : memref<213xf32, #tpu.memory_space<smem>>
    %400 = vector.extract_strided_slice %370 {offsets = [1, 0, 0], sizes = [1, 2, 16], strides = [1, 1, 1]} : vector<4x2x16xf32> to vector<1x2x16xf32>
    %401 = vector.shape_cast %400 : vector<1x2x16xf32> to vector<2x16xf32>
    %402 = vector.broadcast %399 : f32 to vector<2x16xf32>
    %403 = arith.mulf %402, %401 : vector<2x16xf32>
    %404 = arith.addf %398, %403 : vector<2x16xf32>
    %c43 = arith.constant 43 : index
    %405 = memref.load %arg7[%c43] : memref<213xf32, #tpu.memory_space<smem>>
    %406 = vector.extract_strided_slice %370 {offsets = [2, 0, 0], sizes = [1, 2, 16], strides = [1, 1, 1]} : vector<4x2x16xf32> to vector<1x2x16xf32>
    %407 = vector.shape_cast %406 : vector<1x2x16xf32> to vector<2x16xf32>
    %408 = vector.broadcast %405 : f32 to vector<2x16xf32>
    %409 = arith.mulf %408, %407 : vector<2x16xf32>
    %410 = arith.addf %404, %409 : vector<2x16xf32>
    %c50 = arith.constant 50 : index
    %411 = memref.load %arg7[%c50] : memref<213xf32, #tpu.memory_space<smem>>
    %412 = vector.extract_strided_slice %370 {offsets = [3, 0, 0], sizes = [1, 2, 16], strides = [1, 1, 1]} : vector<4x2x16xf32> to vector<1x2x16xf32>
    %413 = vector.shape_cast %412 : vector<1x2x16xf32> to vector<2x16xf32>
    %414 = vector.broadcast %411 : f32 to vector<2x16xf32>
    %415 = arith.mulf %414, %413 : vector<2x16xf32>
    %416 = arith.addf %410, %415 : vector<2x16xf32>
    %c57 = arith.constant 57 : index
    %417 = memref.load %arg7[%c57] : memref<213xf32, #tpu.memory_space<smem>>
    %418 = vector.extract_strided_slice %370 {offsets = [0, 0, 0], sizes = [1, 2, 16], strides = [1, 1, 1]} : vector<4x2x16xf32> to vector<1x2x16xf32>
    %419 = vector.shape_cast %418 : vector<1x2x16xf32> to vector<2x16xf32>
    %420 = vector.broadcast %417 : f32 to vector<2x16xf32>
    %421 = arith.mulf %420, %419 : vector<2x16xf32>
    %c64 = arith.constant 64 : index
    %422 = memref.load %arg7[%c64] : memref<213xf32, #tpu.memory_space<smem>>
    %423 = vector.extract_strided_slice %370 {offsets = [1, 0, 0], sizes = [1, 2, 16], strides = [1, 1, 1]} : vector<4x2x16xf32> to vector<1x2x16xf32>
    %424 = vector.shape_cast %423 : vector<1x2x16xf32> to vector<2x16xf32>
    %425 = vector.broadcast %422 : f32 to vector<2x16xf32>
    %426 = arith.mulf %425, %424 : vector<2x16xf32>
    %427 = arith.addf %421, %426 : vector<2x16xf32>
    %c71 = arith.constant 71 : index
    %428 = memref.load %arg7[%c71] : memref<213xf32, #tpu.memory_space<smem>>
    %429 = vector.extract_strided_slice %370 {offsets = [2, 0, 0], sizes = [1, 2, 16], strides = [1, 1, 1]} : vector<4x2x16xf32> to vector<1x2x16xf32>
    %430 = vector.shape_cast %429 : vector<1x2x16xf32> to vector<2x16xf32>
    %431 = vector.broadcast %428 : f32 to vector<2x16xf32>
    %432 = arith.mulf %431, %430 : vector<2x16xf32>
    %433 = arith.addf %427, %432 : vector<2x16xf32>
    %c78 = arith.constant 78 : index
    %434 = memref.load %arg7[%c78] : memref<213xf32, #tpu.memory_space<smem>>
    %435 = vector.extract_strided_slice %370 {offsets = [3, 0, 0], sizes = [1, 2, 16], strides = [1, 1, 1]} : vector<4x2x16xf32> to vector<1x2x16xf32>
    %436 = vector.shape_cast %435 : vector<1x2x16xf32> to vector<2x16xf32>
    %437 = vector.broadcast %434 : f32 to vector<2x16xf32>
    %438 = arith.mulf %437, %436 : vector<2x16xf32>
    %439 = arith.addf %433, %438 : vector<2x16xf32>
    %cst_65 = arith.constant 0.000000e+00 : f32
    %440 = vector.broadcast %cst_65 : f32 to vector<4x2x1xf32>
    %441 = vector.extract_strided_slice %295 {offsets = [0, 0, 0], sizes = [4, 2, 15], strides = [1, 1, 1]} : vector<4x2x16xf32> to vector<4x2x15xf32>
    %442 = tpu.concatenate %440, %441 in 2 : vector<4x2x1xf32>, vector<4x2x15xf32> -> vector<4x2x16xf32>
    %c2_66 = arith.constant 2 : index
    %443 = memref.load %arg7[%c2_66] : memref<213xf32, #tpu.memory_space<smem>>
    %444 = vector.extract_strided_slice %442 {offsets = [0, 0, 0], sizes = [1, 2, 16], strides = [1, 1, 1]} : vector<4x2x16xf32> to vector<1x2x16xf32>
    %445 = vector.shape_cast %444 : vector<1x2x16xf32> to vector<2x16xf32>
    %446 = vector.broadcast %443 : f32 to vector<2x16xf32>
    %447 = arith.mulf %446, %445 : vector<2x16xf32>
    %c9 = arith.constant 9 : index
    %448 = memref.load %arg7[%c9] : memref<213xf32, #tpu.memory_space<smem>>
    %449 = vector.extract_strided_slice %442 {offsets = [1, 0, 0], sizes = [1, 2, 16], strides = [1, 1, 1]} : vector<4x2x16xf32> to vector<1x2x16xf32>
    %450 = vector.shape_cast %449 : vector<1x2x16xf32> to vector<2x16xf32>
    %451 = vector.broadcast %448 : f32 to vector<2x16xf32>
    %452 = arith.mulf %451, %450 : vector<2x16xf32>
    %453 = arith.addf %447, %452 : vector<2x16xf32>
    %c16 = arith.constant 16 : index
    %454 = memref.load %arg7[%c16] : memref<213xf32, #tpu.memory_space<smem>>
    %455 = vector.extract_strided_slice %442 {offsets = [2, 0, 0], sizes = [1, 2, 16], strides = [1, 1, 1]} : vector<4x2x16xf32> to vector<1x2x16xf32>
    %456 = vector.shape_cast %455 : vector<1x2x16xf32> to vector<2x16xf32>
    %457 = vector.broadcast %454 : f32 to vector<2x16xf32>
    %458 = arith.mulf %457, %456 : vector<2x16xf32>
    %459 = arith.addf %453, %458 : vector<2x16xf32>
    %c23 = arith.constant 23 : index
    %460 = memref.load %arg7[%c23] : memref<213xf32, #tpu.memory_space<smem>>
    %461 = vector.extract_strided_slice %442 {offsets = [3, 0, 0], sizes = [1, 2, 16], strides = [1, 1, 1]} : vector<4x2x16xf32> to vector<1x2x16xf32>
    %462 = vector.shape_cast %461 : vector<1x2x16xf32> to vector<2x16xf32>
    %463 = vector.broadcast %460 : f32 to vector<2x16xf32>
    %464 = arith.mulf %463, %462 : vector<2x16xf32>
    %465 = arith.addf %459, %464 : vector<2x16xf32>
    %c30 = arith.constant 30 : index
    %466 = memref.load %arg7[%c30] : memref<213xf32, #tpu.memory_space<smem>>
    %467 = vector.extract_strided_slice %442 {offsets = [0, 0, 0], sizes = [1, 2, 16], strides = [1, 1, 1]} : vector<4x2x16xf32> to vector<1x2x16xf32>
    %468 = vector.shape_cast %467 : vector<1x2x16xf32> to vector<2x16xf32>
    %469 = vector.broadcast %466 : f32 to vector<2x16xf32>
    %470 = arith.mulf %469, %468 : vector<2x16xf32>
    %c37 = arith.constant 37 : index
    %471 = memref.load %arg7[%c37] : memref<213xf32, #tpu.memory_space<smem>>
    %472 = vector.extract_strided_slice %442 {offsets = [1, 0, 0], sizes = [1, 2, 16], strides = [1, 1, 1]} : vector<4x2x16xf32> to vector<1x2x16xf32>
    %473 = vector.shape_cast %472 : vector<1x2x16xf32> to vector<2x16xf32>
    %474 = vector.broadcast %471 : f32 to vector<2x16xf32>
    %475 = arith.mulf %474, %473 : vector<2x16xf32>
    %476 = arith.addf %470, %475 : vector<2x16xf32>
    %c44 = arith.constant 44 : index
    %477 = memref.load %arg7[%c44] : memref<213xf32, #tpu.memory_space<smem>>
    %478 = vector.extract_strided_slice %442 {offsets = [2, 0, 0], sizes = [1, 2, 16], strides = [1, 1, 1]} : vector<4x2x16xf32> to vector<1x2x16xf32>
    %479 = vector.shape_cast %478 : vector<1x2x16xf32> to vector<2x16xf32>
    %480 = vector.broadcast %477 : f32 to vector<2x16xf32>
    %481 = arith.mulf %480, %479 : vector<2x16xf32>
    %482 = arith.addf %476, %481 : vector<2x16xf32>
    %c51 = arith.constant 51 : index
    %483 = memref.load %arg7[%c51] : memref<213xf32, #tpu.memory_space<smem>>
    %484 = vector.extract_strided_slice %442 {offsets = [3, 0, 0], sizes = [1, 2, 16], strides = [1, 1, 1]} : vector<4x2x16xf32> to vector<1x2x16xf32>
    %485 = vector.shape_cast %484 : vector<1x2x16xf32> to vector<2x16xf32>
    %486 = vector.broadcast %483 : f32 to vector<2x16xf32>
    %487 = arith.mulf %486, %485 : vector<2x16xf32>
    %488 = arith.addf %482, %487 : vector<2x16xf32>
    %c58 = arith.constant 58 : index
    %489 = memref.load %arg7[%c58] : memref<213xf32, #tpu.memory_space<smem>>
    %490 = vector.extract_strided_slice %442 {offsets = [0, 0, 0], sizes = [1, 2, 16], strides = [1, 1, 1]} : vector<4x2x16xf32> to vector<1x2x16xf32>
    %491 = vector.shape_cast %490 : vector<1x2x16xf32> to vector<2x16xf32>
    %492 = vector.broadcast %489 : f32 to vector<2x16xf32>
    %493 = arith.mulf %492, %491 : vector<2x16xf32>
    %c65 = arith.constant 65 : index
    %494 = memref.load %arg7[%c65] : memref<213xf32, #tpu.memory_space<smem>>
    %495 = vector.extract_strided_slice %442 {offsets = [1, 0, 0], sizes = [1, 2, 16], strides = [1, 1, 1]} : vector<4x2x16xf32> to vector<1x2x16xf32>
    %496 = vector.shape_cast %495 : vector<1x2x16xf32> to vector<2x16xf32>
    %497 = vector.broadcast %494 : f32 to vector<2x16xf32>
    %498 = arith.mulf %497, %496 : vector<2x16xf32>
    %499 = arith.addf %493, %498 : vector<2x16xf32>
    %c72 = arith.constant 72 : index
    %500 = memref.load %arg7[%c72] : memref<213xf32, #tpu.memory_space<smem>>
    %501 = vector.extract_strided_slice %442 {offsets = [2, 0, 0], sizes = [1, 2, 16], strides = [1, 1, 1]} : vector<4x2x16xf32> to vector<1x2x16xf32>
    %502 = vector.shape_cast %501 : vector<1x2x16xf32> to vector<2x16xf32>
    %503 = vector.broadcast %500 : f32 to vector<2x16xf32>
    %504 = arith.mulf %503, %502 : vector<2x16xf32>
    %505 = arith.addf %499, %504 : vector<2x16xf32>
    %c79 = arith.constant 79 : index
    %506 = memref.load %arg7[%c79] : memref<213xf32, #tpu.memory_space<smem>>
    %507 = vector.extract_strided_slice %442 {offsets = [3, 0, 0], sizes = [1, 2, 16], strides = [1, 1, 1]} : vector<4x2x16xf32> to vector<1x2x16xf32>
    %508 = vector.shape_cast %507 : vector<1x2x16xf32> to vector<2x16xf32>
    %509 = vector.broadcast %506 : f32 to vector<2x16xf32>
    %510 = arith.mulf %509, %508 : vector<2x16xf32>
    %511 = arith.addf %505, %510 : vector<2x16xf32>
    %c3 = arith.constant 3 : index
    %512 = memref.load %arg7[%c3] : memref<213xf32, #tpu.memory_space<smem>>
    %513 = vector.extract_strided_slice %295 {offsets = [0, 0, 0], sizes = [1, 2, 16], strides = [1, 1, 1]} : vector<4x2x16xf32> to vector<1x2x16xf32>
    %514 = vector.shape_cast %513 : vector<1x2x16xf32> to vector<2x16xf32>
    %515 = vector.broadcast %512 : f32 to vector<2x16xf32>
    %516 = arith.mulf %515, %514 : vector<2x16xf32>
    %c10 = arith.constant 10 : index
    %517 = memref.load %arg7[%c10] : memref<213xf32, #tpu.memory_space<smem>>
    %518 = vector.extract_strided_slice %295 {offsets = [1, 0, 0], sizes = [1, 2, 16], strides = [1, 1, 1]} : vector<4x2x16xf32> to vector<1x2x16xf32>
    %519 = vector.shape_cast %518 : vector<1x2x16xf32> to vector<2x16xf32>
    %520 = vector.broadcast %517 : f32 to vector<2x16xf32>
    %521 = arith.mulf %520, %519 : vector<2x16xf32>
    %522 = arith.addf %516, %521 : vector<2x16xf32>
    %c17 = arith.constant 17 : index
    %523 = memref.load %arg7[%c17] : memref<213xf32, #tpu.memory_space<smem>>
    %524 = vector.extract_strided_slice %295 {offsets = [2, 0, 0], sizes = [1, 2, 16], strides = [1, 1, 1]} : vector<4x2x16xf32> to vector<1x2x16xf32>
    %525 = vector.shape_cast %524 : vector<1x2x16xf32> to vector<2x16xf32>
    %526 = vector.broadcast %523 : f32 to vector<2x16xf32>
    %527 = arith.mulf %526, %525 : vector<2x16xf32>
    %528 = arith.addf %522, %527 : vector<2x16xf32>
    %c24 = arith.constant 24 : index
    %529 = memref.load %arg7[%c24] : memref<213xf32, #tpu.memory_space<smem>>
    %530 = vector.extract_strided_slice %295 {offsets = [3, 0, 0], sizes = [1, 2, 16], strides = [1, 1, 1]} : vector<4x2x16xf32> to vector<1x2x16xf32>
    %531 = vector.shape_cast %530 : vector<1x2x16xf32> to vector<2x16xf32>
    %532 = vector.broadcast %529 : f32 to vector<2x16xf32>
    %533 = arith.mulf %532, %531 : vector<2x16xf32>
    %534 = arith.addf %528, %533 : vector<2x16xf32>
    %c31 = arith.constant 31 : index
    %535 = memref.load %arg7[%c31] : memref<213xf32, #tpu.memory_space<smem>>
    %536 = vector.extract_strided_slice %295 {offsets = [0, 0, 0], sizes = [1, 2, 16], strides = [1, 1, 1]} : vector<4x2x16xf32> to vector<1x2x16xf32>
    %537 = vector.shape_cast %536 : vector<1x2x16xf32> to vector<2x16xf32>
    %538 = vector.broadcast %535 : f32 to vector<2x16xf32>
    %539 = arith.mulf %538, %537 : vector<2x16xf32>
    %c38 = arith.constant 38 : index
    %540 = memref.load %arg7[%c38] : memref<213xf32, #tpu.memory_space<smem>>
    %541 = vector.extract_strided_slice %295 {offsets = [1, 0, 0], sizes = [1, 2, 16], strides = [1, 1, 1]} : vector<4x2x16xf32> to vector<1x2x16xf32>
    %542 = vector.shape_cast %541 : vector<1x2x16xf32> to vector<2x16xf32>
    %543 = vector.broadcast %540 : f32 to vector<2x16xf32>
    %544 = arith.mulf %543, %542 : vector<2x16xf32>
    %545 = arith.addf %539, %544 : vector<2x16xf32>
    %c45 = arith.constant 45 : index
    %546 = memref.load %arg7[%c45] : memref<213xf32, #tpu.memory_space<smem>>
    %547 = vector.extract_strided_slice %295 {offsets = [2, 0, 0], sizes = [1, 2, 16], strides = [1, 1, 1]} : vector<4x2x16xf32> to vector<1x2x16xf32>
    %548 = vector.shape_cast %547 : vector<1x2x16xf32> to vector<2x16xf32>
    %549 = vector.broadcast %546 : f32 to vector<2x16xf32>
    %550 = arith.mulf %549, %548 : vector<2x16xf32>
    %551 = arith.addf %545, %550 : vector<2x16xf32>
    %c52 = arith.constant 52 : index
    %552 = memref.load %arg7[%c52] : memref<213xf32, #tpu.memory_space<smem>>
    %553 = vector.extract_strided_slice %295 {offsets = [3, 0, 0], sizes = [1, 2, 16], strides = [1, 1, 1]} : vector<4x2x16xf32> to vector<1x2x16xf32>
    %554 = vector.shape_cast %553 : vector<1x2x16xf32> to vector<2x16xf32>
    %555 = vector.broadcast %552 : f32 to vector<2x16xf32>
    %556 = arith.mulf %555, %554 : vector<2x16xf32>
    %557 = arith.addf %551, %556 : vector<2x16xf32>
    %c59 = arith.constant 59 : index
    %558 = memref.load %arg7[%c59] : memref<213xf32, #tpu.memory_space<smem>>
    %559 = vector.extract_strided_slice %295 {offsets = [0, 0, 0], sizes = [1, 2, 16], strides = [1, 1, 1]} : vector<4x2x16xf32> to vector<1x2x16xf32>
    %560 = vector.shape_cast %559 : vector<1x2x16xf32> to vector<2x16xf32>
    %561 = vector.broadcast %558 : f32 to vector<2x16xf32>
    %562 = arith.mulf %561, %560 : vector<2x16xf32>
    %c66 = arith.constant 66 : index
    %563 = memref.load %arg7[%c66] : memref<213xf32, #tpu.memory_space<smem>>
    %564 = vector.extract_strided_slice %295 {offsets = [1, 0, 0], sizes = [1, 2, 16], strides = [1, 1, 1]} : vector<4x2x16xf32> to vector<1x2x16xf32>
    %565 = vector.shape_cast %564 : vector<1x2x16xf32> to vector<2x16xf32>
    %566 = vector.broadcast %563 : f32 to vector<2x16xf32>
    %567 = arith.mulf %566, %565 : vector<2x16xf32>
    %568 = arith.addf %562, %567 : vector<2x16xf32>
    %c73 = arith.constant 73 : index
    %569 = memref.load %arg7[%c73] : memref<213xf32, #tpu.memory_space<smem>>
    %570 = vector.extract_strided_slice %295 {offsets = [2, 0, 0], sizes = [1, 2, 16], strides = [1, 1, 1]} : vector<4x2x16xf32> to vector<1x2x16xf32>
    %571 = vector.shape_cast %570 : vector<1x2x16xf32> to vector<2x16xf32>
    %572 = vector.broadcast %569 : f32 to vector<2x16xf32>
    %573 = arith.mulf %572, %571 : vector<2x16xf32>
    %574 = arith.addf %568, %573 : vector<2x16xf32>
    %c80 = arith.constant 80 : index
    %575 = memref.load %arg7[%c80] : memref<213xf32, #tpu.memory_space<smem>>
    %576 = vector.extract_strided_slice %295 {offsets = [3, 0, 0], sizes = [1, 2, 16], strides = [1, 1, 1]} : vector<4x2x16xf32> to vector<1x2x16xf32>
    %577 = vector.shape_cast %576 : vector<1x2x16xf32> to vector<2x16xf32>
    %578 = vector.broadcast %575 : f32 to vector<2x16xf32>
    %579 = arith.mulf %578, %577 : vector<2x16xf32>
    %580 = arith.addf %574, %579 : vector<2x16xf32>
    %cst_67 = arith.constant 0.000000e+00 : f32
    %581 = vector.broadcast %cst_67 : f32 to vector<4x2x1xf32>
    %582 = vector.extract_strided_slice %295 {offsets = [0, 0, 1], sizes = [4, 2, 15], strides = [1, 1, 1]} : vector<4x2x16xf32> to vector<4x2x15xf32>
    %583 = tpu.concatenate %582, %581 in 2 : vector<4x2x15xf32>, vector<4x2x1xf32> -> vector<4x2x16xf32>
    %c4 = arith.constant 4 : index
    %584 = memref.load %arg7[%c4] : memref<213xf32, #tpu.memory_space<smem>>
    %585 = vector.extract_strided_slice %583 {offsets = [0, 0, 0], sizes = [1, 2, 16], strides = [1, 1, 1]} : vector<4x2x16xf32> to vector<1x2x16xf32>
    %586 = vector.shape_cast %585 : vector<1x2x16xf32> to vector<2x16xf32>
    %587 = vector.broadcast %584 : f32 to vector<2x16xf32>
    %588 = arith.mulf %587, %586 : vector<2x16xf32>
    %c11 = arith.constant 11 : index
    %589 = memref.load %arg7[%c11] : memref<213xf32, #tpu.memory_space<smem>>
    %590 = vector.extract_strided_slice %583 {offsets = [1, 0, 0], sizes = [1, 2, 16], strides = [1, 1, 1]} : vector<4x2x16xf32> to vector<1x2x16xf32>
    %591 = vector.shape_cast %590 : vector<1x2x16xf32> to vector<2x16xf32>
    %592 = vector.broadcast %589 : f32 to vector<2x16xf32>
    %593 = arith.mulf %592, %591 : vector<2x16xf32>
    %594 = arith.addf %588, %593 : vector<2x16xf32>
    %c18 = arith.constant 18 : index
    %595 = memref.load %arg7[%c18] : memref<213xf32, #tpu.memory_space<smem>>
    %596 = vector.extract_strided_slice %583 {offsets = [2, 0, 0], sizes = [1, 2, 16], strides = [1, 1, 1]} : vector<4x2x16xf32> to vector<1x2x16xf32>
    %597 = vector.shape_cast %596 : vector<1x2x16xf32> to vector<2x16xf32>
    %598 = vector.broadcast %595 : f32 to vector<2x16xf32>
    %599 = arith.mulf %598, %597 : vector<2x16xf32>
    %600 = arith.addf %594, %599 : vector<2x16xf32>
    %c25 = arith.constant 25 : index
    %601 = memref.load %arg7[%c25] : memref<213xf32, #tpu.memory_space<smem>>
    %602 = vector.extract_strided_slice %583 {offsets = [3, 0, 0], sizes = [1, 2, 16], strides = [1, 1, 1]} : vector<4x2x16xf32> to vector<1x2x16xf32>
    %603 = vector.shape_cast %602 : vector<1x2x16xf32> to vector<2x16xf32>
    %604 = vector.broadcast %601 : f32 to vector<2x16xf32>
    %605 = arith.mulf %604, %603 : vector<2x16xf32>
    %606 = arith.addf %600, %605 : vector<2x16xf32>
    %c32 = arith.constant 32 : index
    %607 = memref.load %arg7[%c32] : memref<213xf32, #tpu.memory_space<smem>>
    %608 = vector.extract_strided_slice %583 {offsets = [0, 0, 0], sizes = [1, 2, 16], strides = [1, 1, 1]} : vector<4x2x16xf32> to vector<1x2x16xf32>
    %609 = vector.shape_cast %608 : vector<1x2x16xf32> to vector<2x16xf32>
    %610 = vector.broadcast %607 : f32 to vector<2x16xf32>
    %611 = arith.mulf %610, %609 : vector<2x16xf32>
    %c39 = arith.constant 39 : index
    %612 = memref.load %arg7[%c39] : memref<213xf32, #tpu.memory_space<smem>>
    %613 = vector.extract_strided_slice %583 {offsets = [1, 0, 0], sizes = [1, 2, 16], strides = [1, 1, 1]} : vector<4x2x16xf32> to vector<1x2x16xf32>
    %614 = vector.shape_cast %613 : vector<1x2x16xf32> to vector<2x16xf32>
    %615 = vector.broadcast %612 : f32 to vector<2x16xf32>
    %616 = arith.mulf %615, %614 : vector<2x16xf32>
    %617 = arith.addf %611, %616 : vector<2x16xf32>
    %c46 = arith.constant 46 : index
    %618 = memref.load %arg7[%c46] : memref<213xf32, #tpu.memory_space<smem>>
    %619 = vector.extract_strided_slice %583 {offsets = [2, 0, 0], sizes = [1, 2, 16], strides = [1, 1, 1]} : vector<4x2x16xf32> to vector<1x2x16xf32>
    %620 = vector.shape_cast %619 : vector<1x2x16xf32> to vector<2x16xf32>
    %621 = vector.broadcast %618 : f32 to vector<2x16xf32>
    %622 = arith.mulf %621, %620 : vector<2x16xf32>
    %623 = arith.addf %617, %622 : vector<2x16xf32>
    %c53 = arith.constant 53 : index
    %624 = memref.load %arg7[%c53] : memref<213xf32, #tpu.memory_space<smem>>
    %625 = vector.extract_strided_slice %583 {offsets = [3, 0, 0], sizes = [1, 2, 16], strides = [1, 1, 1]} : vector<4x2x16xf32> to vector<1x2x16xf32>
    %626 = vector.shape_cast %625 : vector<1x2x16xf32> to vector<2x16xf32>
    %627 = vector.broadcast %624 : f32 to vector<2x16xf32>
    %628 = arith.mulf %627, %626 : vector<2x16xf32>
    %629 = arith.addf %623, %628 : vector<2x16xf32>
    %c60 = arith.constant 60 : index
    %630 = memref.load %arg7[%c60] : memref<213xf32, #tpu.memory_space<smem>>
    %631 = vector.extract_strided_slice %583 {offsets = [0, 0, 0], sizes = [1, 2, 16], strides = [1, 1, 1]} : vector<4x2x16xf32> to vector<1x2x16xf32>
    %632 = vector.shape_cast %631 : vector<1x2x16xf32> to vector<2x16xf32>
    %633 = vector.broadcast %630 : f32 to vector<2x16xf32>
    %634 = arith.mulf %633, %632 : vector<2x16xf32>
    %c67 = arith.constant 67 : index
    %635 = memref.load %arg7[%c67] : memref<213xf32, #tpu.memory_space<smem>>
    %636 = vector.extract_strided_slice %583 {offsets = [1, 0, 0], sizes = [1, 2, 16], strides = [1, 1, 1]} : vector<4x2x16xf32> to vector<1x2x16xf32>
    %637 = vector.shape_cast %636 : vector<1x2x16xf32> to vector<2x16xf32>
    %638 = vector.broadcast %635 : f32 to vector<2x16xf32>
    %639 = arith.mulf %638, %637 : vector<2x16xf32>
    %640 = arith.addf %634, %639 : vector<2x16xf32>
    %c74 = arith.constant 74 : index
    %641 = memref.load %arg7[%c74] : memref<213xf32, #tpu.memory_space<smem>>
    %642 = vector.extract_strided_slice %583 {offsets = [2, 0, 0], sizes = [1, 2, 16], strides = [1, 1, 1]} : vector<4x2x16xf32> to vector<1x2x16xf32>
    %643 = vector.shape_cast %642 : vector<1x2x16xf32> to vector<2x16xf32>
    %644 = vector.broadcast %641 : f32 to vector<2x16xf32>
    %645 = arith.mulf %644, %643 : vector<2x16xf32>
    %646 = arith.addf %640, %645 : vector<2x16xf32>
    %c81 = arith.constant 81 : index
    %647 = memref.load %arg7[%c81] : memref<213xf32, #tpu.memory_space<smem>>
    %648 = vector.extract_strided_slice %583 {offsets = [3, 0, 0], sizes = [1, 2, 16], strides = [1, 1, 1]} : vector<4x2x16xf32> to vector<1x2x16xf32>
    %649 = vector.shape_cast %648 : vector<1x2x16xf32> to vector<2x16xf32>
    %650 = vector.broadcast %647 : f32 to vector<2x16xf32>
    %651 = arith.mulf %650, %649 : vector<2x16xf32>
    %652 = arith.addf %646, %651 : vector<2x16xf32>
    %cst_68 = arith.constant 0.000000e+00 : f32
    %653 = vector.broadcast %cst_68 : f32 to vector<4x2x2xf32>
    %654 = vector.extract_strided_slice %295 {offsets = [0, 0, 2], sizes = [4, 2, 14], strides = [1, 1, 1]} : vector<4x2x16xf32> to vector<4x2x14xf32>
    %655 = tpu.concatenate %654, %653 in 2 : vector<4x2x14xf32>, vector<4x2x2xf32> -> vector<4x2x16xf32>
    %c5 = arith.constant 5 : index
    %656 = memref.load %arg7[%c5] : memref<213xf32, #tpu.memory_space<smem>>
    %657 = vector.extract_strided_slice %655 {offsets = [0, 0, 0], sizes = [1, 2, 16], strides = [1, 1, 1]} : vector<4x2x16xf32> to vector<1x2x16xf32>
    %658 = vector.shape_cast %657 : vector<1x2x16xf32> to vector<2x16xf32>
    %659 = vector.broadcast %656 : f32 to vector<2x16xf32>
    %660 = arith.mulf %659, %658 : vector<2x16xf32>
    %c12 = arith.constant 12 : index
    %661 = memref.load %arg7[%c12] : memref<213xf32, #tpu.memory_space<smem>>
    %662 = vector.extract_strided_slice %655 {offsets = [1, 0, 0], sizes = [1, 2, 16], strides = [1, 1, 1]} : vector<4x2x16xf32> to vector<1x2x16xf32>
    %663 = vector.shape_cast %662 : vector<1x2x16xf32> to vector<2x16xf32>
    %664 = vector.broadcast %661 : f32 to vector<2x16xf32>
    %665 = arith.mulf %664, %663 : vector<2x16xf32>
    %666 = arith.addf %660, %665 : vector<2x16xf32>
    %c19 = arith.constant 19 : index
    %667 = memref.load %arg7[%c19] : memref<213xf32, #tpu.memory_space<smem>>
    %668 = vector.extract_strided_slice %655 {offsets = [2, 0, 0], sizes = [1, 2, 16], strides = [1, 1, 1]} : vector<4x2x16xf32> to vector<1x2x16xf32>
    %669 = vector.shape_cast %668 : vector<1x2x16xf32> to vector<2x16xf32>
    %670 = vector.broadcast %667 : f32 to vector<2x16xf32>
    %671 = arith.mulf %670, %669 : vector<2x16xf32>
    %672 = arith.addf %666, %671 : vector<2x16xf32>
    %c26 = arith.constant 26 : index
    %673 = memref.load %arg7[%c26] : memref<213xf32, #tpu.memory_space<smem>>
    %674 = vector.extract_strided_slice %655 {offsets = [3, 0, 0], sizes = [1, 2, 16], strides = [1, 1, 1]} : vector<4x2x16xf32> to vector<1x2x16xf32>
    %675 = vector.shape_cast %674 : vector<1x2x16xf32> to vector<2x16xf32>
    %676 = vector.broadcast %673 : f32 to vector<2x16xf32>
    %677 = arith.mulf %676, %675 : vector<2x16xf32>
    %678 = arith.addf %672, %677 : vector<2x16xf32>
    %c33 = arith.constant 33 : index
    %679 = memref.load %arg7[%c33] : memref<213xf32, #tpu.memory_space<smem>>
    %680 = vector.extract_strided_slice %655 {offsets = [0, 0, 0], sizes = [1, 2, 16], strides = [1, 1, 1]} : vector<4x2x16xf32> to vector<1x2x16xf32>
    %681 = vector.shape_cast %680 : vector<1x2x16xf32> to vector<2x16xf32>
    %682 = vector.broadcast %679 : f32 to vector<2x16xf32>
    %683 = arith.mulf %682, %681 : vector<2x16xf32>
    %c40 = arith.constant 40 : index
    %684 = memref.load %arg7[%c40] : memref<213xf32, #tpu.memory_space<smem>>
    %685 = vector.extract_strided_slice %655 {offsets = [1, 0, 0], sizes = [1, 2, 16], strides = [1, 1, 1]} : vector<4x2x16xf32> to vector<1x2x16xf32>
    %686 = vector.shape_cast %685 : vector<1x2x16xf32> to vector<2x16xf32>
    %687 = vector.broadcast %684 : f32 to vector<2x16xf32>
    %688 = arith.mulf %687, %686 : vector<2x16xf32>
    %689 = arith.addf %683, %688 : vector<2x16xf32>
    %c47 = arith.constant 47 : index
    %690 = memref.load %arg7[%c47] : memref<213xf32, #tpu.memory_space<smem>>
    %691 = vector.extract_strided_slice %655 {offsets = [2, 0, 0], sizes = [1, 2, 16], strides = [1, 1, 1]} : vector<4x2x16xf32> to vector<1x2x16xf32>
    %692 = vector.shape_cast %691 : vector<1x2x16xf32> to vector<2x16xf32>
    %693 = vector.broadcast %690 : f32 to vector<2x16xf32>
    %694 = arith.mulf %693, %692 : vector<2x16xf32>
    %695 = arith.addf %689, %694 : vector<2x16xf32>
    %c54 = arith.constant 54 : index
    %696 = memref.load %arg7[%c54] : memref<213xf32, #tpu.memory_space<smem>>
    %697 = vector.extract_strided_slice %655 {offsets = [3, 0, 0], sizes = [1, 2, 16], strides = [1, 1, 1]} : vector<4x2x16xf32> to vector<1x2x16xf32>
    %698 = vector.shape_cast %697 : vector<1x2x16xf32> to vector<2x16xf32>
    %699 = vector.broadcast %696 : f32 to vector<2x16xf32>
    %700 = arith.mulf %699, %698 : vector<2x16xf32>
    %701 = arith.addf %695, %700 : vector<2x16xf32>
    %c61 = arith.constant 61 : index
    %702 = memref.load %arg7[%c61] : memref<213xf32, #tpu.memory_space<smem>>
    %703 = vector.extract_strided_slice %655 {offsets = [0, 0, 0], sizes = [1, 2, 16], strides = [1, 1, 1]} : vector<4x2x16xf32> to vector<1x2x16xf32>
    %704 = vector.shape_cast %703 : vector<1x2x16xf32> to vector<2x16xf32>
    %705 = vector.broadcast %702 : f32 to vector<2x16xf32>
    %706 = arith.mulf %705, %704 : vector<2x16xf32>
    %c68 = arith.constant 68 : index
    %707 = memref.load %arg7[%c68] : memref<213xf32, #tpu.memory_space<smem>>
    %708 = vector.extract_strided_slice %655 {offsets = [1, 0, 0], sizes = [1, 2, 16], strides = [1, 1, 1]} : vector<4x2x16xf32> to vector<1x2x16xf32>
    %709 = vector.shape_cast %708 : vector<1x2x16xf32> to vector<2x16xf32>
    %710 = vector.broadcast %707 : f32 to vector<2x16xf32>
    %711 = arith.mulf %710, %709 : vector<2x16xf32>
    %712 = arith.addf %706, %711 : vector<2x16xf32>
    %c75 = arith.constant 75 : index
    %713 = memref.load %arg7[%c75] : memref<213xf32, #tpu.memory_space<smem>>
    %714 = vector.extract_strided_slice %655 {offsets = [2, 0, 0], sizes = [1, 2, 16], strides = [1, 1, 1]} : vector<4x2x16xf32> to vector<1x2x16xf32>
    %715 = vector.shape_cast %714 : vector<1x2x16xf32> to vector<2x16xf32>
    %716 = vector.broadcast %713 : f32 to vector<2x16xf32>
    %717 = arith.mulf %716, %715 : vector<2x16xf32>
    %718 = arith.addf %712, %717 : vector<2x16xf32>
    %c82 = arith.constant 82 : index
    %719 = memref.load %arg7[%c82] : memref<213xf32, #tpu.memory_space<smem>>
    %720 = vector.extract_strided_slice %655 {offsets = [3, 0, 0], sizes = [1, 2, 16], strides = [1, 1, 1]} : vector<4x2x16xf32> to vector<1x2x16xf32>
    %721 = vector.shape_cast %720 : vector<1x2x16xf32> to vector<2x16xf32>
    %722 = vector.broadcast %719 : f32 to vector<2x16xf32>
    %723 = arith.mulf %722, %721 : vector<2x16xf32>
    %724 = arith.addf %718, %723 : vector<2x16xf32>
    %cst_69 = arith.constant 0.000000e+00 : f32
    %725 = vector.broadcast %cst_69 : f32 to vector<4x2x3xf32>
    %726 = vector.extract_strided_slice %295 {offsets = [0, 0, 3], sizes = [4, 2, 13], strides = [1, 1, 1]} : vector<4x2x16xf32> to vector<4x2x13xf32>
    %727 = tpu.concatenate %726, %725 in 2 : vector<4x2x13xf32>, vector<4x2x3xf32> -> vector<4x2x16xf32>
    %c6 = arith.constant 6 : index
    %728 = memref.load %arg7[%c6] : memref<213xf32, #tpu.memory_space<smem>>
    %729 = vector.extract_strided_slice %727 {offsets = [0, 0, 0], sizes = [1, 2, 16], strides = [1, 1, 1]} : vector<4x2x16xf32> to vector<1x2x16xf32>
    %730 = vector.shape_cast %729 : vector<1x2x16xf32> to vector<2x16xf32>
    %731 = vector.broadcast %728 : f32 to vector<2x16xf32>
    %732 = arith.mulf %731, %730 : vector<2x16xf32>
    %c13 = arith.constant 13 : index
    %733 = memref.load %arg7[%c13] : memref<213xf32, #tpu.memory_space<smem>>
    %734 = vector.extract_strided_slice %727 {offsets = [1, 0, 0], sizes = [1, 2, 16], strides = [1, 1, 1]} : vector<4x2x16xf32> to vector<1x2x16xf32>
    %735 = vector.shape_cast %734 : vector<1x2x16xf32> to vector<2x16xf32>
    %736 = vector.broadcast %733 : f32 to vector<2x16xf32>
    %737 = arith.mulf %736, %735 : vector<2x16xf32>
    %738 = arith.addf %732, %737 : vector<2x16xf32>
    %c20 = arith.constant 20 : index
    %739 = memref.load %arg7[%c20] : memref<213xf32, #tpu.memory_space<smem>>
    %740 = vector.extract_strided_slice %727 {offsets = [2, 0, 0], sizes = [1, 2, 16], strides = [1, 1, 1]} : vector<4x2x16xf32> to vector<1x2x16xf32>
    %741 = vector.shape_cast %740 : vector<1x2x16xf32> to vector<2x16xf32>
    %742 = vector.broadcast %739 : f32 to vector<2x16xf32>
    %743 = arith.mulf %742, %741 : vector<2x16xf32>
    %744 = arith.addf %738, %743 : vector<2x16xf32>
    %c27 = arith.constant 27 : index
    %745 = memref.load %arg7[%c27] : memref<213xf32, #tpu.memory_space<smem>>
    %746 = vector.extract_strided_slice %727 {offsets = [3, 0, 0], sizes = [1, 2, 16], strides = [1, 1, 1]} : vector<4x2x16xf32> to vector<1x2x16xf32>
    %747 = vector.shape_cast %746 : vector<1x2x16xf32> to vector<2x16xf32>
    %748 = vector.broadcast %745 : f32 to vector<2x16xf32>
    %749 = arith.mulf %748, %747 : vector<2x16xf32>
    %750 = arith.addf %744, %749 : vector<2x16xf32>
    %c34 = arith.constant 34 : index
    %751 = memref.load %arg7[%c34] : memref<213xf32, #tpu.memory_space<smem>>
    %752 = vector.extract_strided_slice %727 {offsets = [0, 0, 0], sizes = [1, 2, 16], strides = [1, 1, 1]} : vector<4x2x16xf32> to vector<1x2x16xf32>
    %753 = vector.shape_cast %752 : vector<1x2x16xf32> to vector<2x16xf32>
    %754 = vector.broadcast %751 : f32 to vector<2x16xf32>
    %755 = arith.mulf %754, %753 : vector<2x16xf32>
    %c41 = arith.constant 41 : index
    %756 = memref.load %arg7[%c41] : memref<213xf32, #tpu.memory_space<smem>>
    %757 = vector.extract_strided_slice %727 {offsets = [1, 0, 0], sizes = [1, 2, 16], strides = [1, 1, 1]} : vector<4x2x16xf32> to vector<1x2x16xf32>
    %758 = vector.shape_cast %757 : vector<1x2x16xf32> to vector<2x16xf32>
    %759 = vector.broadcast %756 : f32 to vector<2x16xf32>
    %760 = arith.mulf %759, %758 : vector<2x16xf32>
    %761 = arith.addf %755, %760 : vector<2x16xf32>
    %c48 = arith.constant 48 : index
    %762 = memref.load %arg7[%c48] : memref<213xf32, #tpu.memory_space<smem>>
    %763 = vector.extract_strided_slice %727 {offsets = [2, 0, 0], sizes = [1, 2, 16], strides = [1, 1, 1]} : vector<4x2x16xf32> to vector<1x2x16xf32>
    %764 = vector.shape_cast %763 : vector<1x2x16xf32> to vector<2x16xf32>
    %765 = vector.broadcast %762 : f32 to vector<2x16xf32>
    %766 = arith.mulf %765, %764 : vector<2x16xf32>
    %767 = arith.addf %761, %766 : vector<2x16xf32>
    %c55 = arith.constant 55 : index
    %768 = memref.load %arg7[%c55] : memref<213xf32, #tpu.memory_space<smem>>
    %769 = vector.extract_strided_slice %727 {offsets = [3, 0, 0], sizes = [1, 2, 16], strides = [1, 1, 1]} : vector<4x2x16xf32> to vector<1x2x16xf32>
    %770 = vector.shape_cast %769 : vector<1x2x16xf32> to vector<2x16xf32>
    %771 = vector.broadcast %768 : f32 to vector<2x16xf32>
    %772 = arith.mulf %771, %770 : vector<2x16xf32>
    %773 = arith.addf %767, %772 : vector<2x16xf32>
    %c62 = arith.constant 62 : index
    %774 = memref.load %arg7[%c62] : memref<213xf32, #tpu.memory_space<smem>>
    %775 = vector.extract_strided_slice %727 {offsets = [0, 0, 0], sizes = [1, 2, 16], strides = [1, 1, 1]} : vector<4x2x16xf32> to vector<1x2x16xf32>
    %776 = vector.shape_cast %775 : vector<1x2x16xf32> to vector<2x16xf32>
    %777 = vector.broadcast %774 : f32 to vector<2x16xf32>
    %778 = arith.mulf %777, %776 : vector<2x16xf32>
    %c69 = arith.constant 69 : index
    %779 = memref.load %arg7[%c69] : memref<213xf32, #tpu.memory_space<smem>>
    %780 = vector.extract_strided_slice %727 {offsets = [1, 0, 0], sizes = [1, 2, 16], strides = [1, 1, 1]} : vector<4x2x16xf32> to vector<1x2x16xf32>
    %781 = vector.shape_cast %780 : vector<1x2x16xf32> to vector<2x16xf32>
    %782 = vector.broadcast %779 : f32 to vector<2x16xf32>
    %783 = arith.mulf %782, %781 : vector<2x16xf32>
    %784 = arith.addf %778, %783 : vector<2x16xf32>
    %c76 = arith.constant 76 : index
    %785 = memref.load %arg7[%c76] : memref<213xf32, #tpu.memory_space<smem>>
    %786 = vector.extract_strided_slice %727 {offsets = [2, 0, 0], sizes = [1, 2, 16], strides = [1, 1, 1]} : vector<4x2x16xf32> to vector<1x2x16xf32>
    %787 = vector.shape_cast %786 : vector<1x2x16xf32> to vector<2x16xf32>
    %788 = vector.broadcast %785 : f32 to vector<2x16xf32>
    %789 = arith.mulf %788, %787 : vector<2x16xf32>
    %790 = arith.addf %784, %789 : vector<2x16xf32>
    %c83 = arith.constant 83 : index
    %791 = memref.load %arg7[%c83] : memref<213xf32, #tpu.memory_space<smem>>
    %792 = vector.extract_strided_slice %727 {offsets = [3, 0, 0], sizes = [1, 2, 16], strides = [1, 1, 1]} : vector<4x2x16xf32> to vector<1x2x16xf32>
    %793 = vector.shape_cast %792 : vector<1x2x16xf32> to vector<2x16xf32>
    %794 = vector.broadcast %791 : f32 to vector<2x16xf32>
    %795 = arith.mulf %794, %793 : vector<2x16xf32>
    %796 = arith.addf %790, %795 : vector<2x16xf32>
    %797 = arith.addf %321, %393 : vector<2x16xf32>
    %798 = arith.addf %465, %534 : vector<2x16xf32>
    %799 = arith.addf %606, %678 : vector<2x16xf32>
    %800 = arith.addf %797, %798 : vector<2x16xf32>
    %801 = arith.addf %799, %750 : vector<2x16xf32>
    %802 = arith.addf %800, %801 : vector<2x16xf32>
    %c84 = arith.constant 84 : index
    %803 = memref.load %arg7[%c84] : memref<213xf32, #tpu.memory_space<smem>>
    %804 = vector.broadcast %803 : f32 to vector<2x16xf32>
    %805 = arith.addf %802, %804 : vector<2x16xf32>
    %cst_70 = arith.constant 0.000000e+00 : f32
    %806 = vector.broadcast %cst_70 : f32 to vector<2x16xf32>
    %807 = arith.maximumf %805, %806 : vector<2x16xf32>
    %808 = arith.addf %344, %416 : vector<2x16xf32>
    %809 = arith.addf %488, %557 : vector<2x16xf32>
    %810 = arith.addf %629, %701 : vector<2x16xf32>
    %811 = arith.addf %808, %809 : vector<2x16xf32>
    %812 = arith.addf %810, %773 : vector<2x16xf32>
    %813 = arith.addf %811, %812 : vector<2x16xf32>
    %c85 = arith.constant 85 : index
    %814 = memref.load %arg7[%c85] : memref<213xf32, #tpu.memory_space<smem>>
    %815 = vector.broadcast %814 : f32 to vector<2x16xf32>
    %816 = arith.addf %813, %815 : vector<2x16xf32>
    %cst_71 = arith.constant 0.000000e+00 : f32
    %817 = vector.broadcast %cst_71 : f32 to vector<2x16xf32>
    %818 = arith.maximumf %816, %817 : vector<2x16xf32>
    %819 = arith.addf %367, %439 : vector<2x16xf32>
    %820 = arith.addf %511, %580 : vector<2x16xf32>
    %821 = arith.addf %652, %724 : vector<2x16xf32>
    %822 = arith.addf %819, %820 : vector<2x16xf32>
    %823 = arith.addf %821, %796 : vector<2x16xf32>
    %824 = arith.addf %822, %823 : vector<2x16xf32>
    %c86 = arith.constant 86 : index
    %825 = memref.load %arg7[%c86] : memref<213xf32, #tpu.memory_space<smem>>
    %826 = vector.broadcast %825 : f32 to vector<2x16xf32>
    %827 = arith.addf %824, %826 : vector<2x16xf32>
    %cst_72 = arith.constant 0.000000e+00 : f32
    %828 = vector.broadcast %cst_72 : f32 to vector<2x16xf32>
    %829 = arith.maximumf %827, %828 : vector<2x16xf32>
    %830 = vector.shape_cast %807 : vector<2x16xf32> to vector<1x2x16xf32>
    %831 = vector.shape_cast %818 : vector<2x16xf32> to vector<1x2x16xf32>
    %832 = vector.shape_cast %829 : vector<2x16xf32> to vector<1x2x16xf32>
    %833 = tpu.concatenate %830, %831, %832 in 0 : vector<1x2x16xf32>, vector<1x2x16xf32>, vector<1x2x16xf32> -> vector<3x2x16xf32>
    %cst_73 = arith.constant 0.000000e+00 : f32
    %834 = vector.broadcast %cst_73 : f32 to vector<3x2x1xf32>
    %835 = vector.extract_strided_slice %833 {offsets = [0, 0, 0], sizes = [3, 2, 15], strides = [1, 1, 1]} : vector<3x2x16xf32> to vector<3x2x15xf32>
    %836 = tpu.concatenate %834, %835 in 2 : vector<3x2x1xf32>, vector<3x2x15xf32> -> vector<3x2x16xf32>
    %837 = arith.maximumf %836, %833 : vector<3x2x16xf32>
    %cst_74 = arith.constant 0.000000e+00 : f32
    %838 = vector.broadcast %cst_74 : f32 to vector<3x2x1xf32>
    %839 = vector.extract_strided_slice %833 {offsets = [0, 0, 1], sizes = [3, 2, 15], strides = [1, 1, 1]} : vector<3x2x16xf32> to vector<3x2x15xf32>
    %840 = tpu.concatenate %839, %838 in 2 : vector<3x2x15xf32>, vector<3x2x1xf32> -> vector<3x2x16xf32>
    %841 = arith.maximumf %837, %840 : vector<3x2x16xf32>
    %842 = vector.extract_strided_slice %841 {offsets = [0, 0, 0], sizes = [1, 2, 16], strides = [1, 1, 1]} : vector<3x2x16xf32> to vector<1x2x16xf32>
    %843 = vector.shape_cast %842 : vector<1x2x16xf32> to vector<2x16xf32>
    %c87 = arith.constant 87 : index
    %844 = memref.load %arg7[%c87] : memref<213xf32, #tpu.memory_space<smem>>
    %845 = vector.broadcast %844 : f32 to vector<2x16xf32>
    %846 = arith.mulf %843, %845 : vector<2x16xf32>
    %c90 = arith.constant 90 : index
    %847 = memref.load %arg7[%c90] : memref<213xf32, #tpu.memory_space<smem>>
    %848 = vector.broadcast %847 : f32 to vector<2x16xf32>
    %849 = arith.addf %846, %848 : vector<2x16xf32>
    %850 = vector.extract_strided_slice %841 {offsets = [1, 0, 0], sizes = [1, 2, 16], strides = [1, 1, 1]} : vector<3x2x16xf32> to vector<1x2x16xf32>
    %851 = vector.shape_cast %850 : vector<1x2x16xf32> to vector<2x16xf32>
    %c88 = arith.constant 88 : index
    %852 = memref.load %arg7[%c88] : memref<213xf32, #tpu.memory_space<smem>>
    %853 = vector.broadcast %852 : f32 to vector<2x16xf32>
    %854 = arith.mulf %851, %853 : vector<2x16xf32>
    %c91 = arith.constant 91 : index
    %855 = memref.load %arg7[%c91] : memref<213xf32, #tpu.memory_space<smem>>
    %856 = vector.broadcast %855 : f32 to vector<2x16xf32>
    %857 = arith.addf %854, %856 : vector<2x16xf32>
    %858 = vector.extract_strided_slice %841 {offsets = [2, 0, 0], sizes = [1, 2, 16], strides = [1, 1, 1]} : vector<3x2x16xf32> to vector<1x2x16xf32>
    %859 = vector.shape_cast %858 : vector<1x2x16xf32> to vector<2x16xf32>
    %c89 = arith.constant 89 : index
    %860 = memref.load %arg7[%c89] : memref<213xf32, #tpu.memory_space<smem>>
    %861 = vector.broadcast %860 : f32 to vector<2x16xf32>
    %862 = arith.mulf %859, %861 : vector<2x16xf32>
    %c92 = arith.constant 92 : index
    %863 = memref.load %arg7[%c92] : memref<213xf32, #tpu.memory_space<smem>>
    %864 = vector.broadcast %863 : f32 to vector<2x16xf32>
    %865 = arith.addf %862, %864 : vector<2x16xf32>
    %866 = vector.shape_cast %849 : vector<2x16xf32> to vector<1x2x16xf32>
    %867 = vector.shape_cast %857 : vector<2x16xf32> to vector<1x2x16xf32>
    %868 = vector.shape_cast %865 : vector<2x16xf32> to vector<1x2x16xf32>
    %869 = tpu.concatenate %866, %867, %868 in 0 : vector<1x2x16xf32>, vector<1x2x16xf32>, vector<1x2x16xf32> -> vector<3x2x16xf32>
    %cst_75 = arith.constant 0.000000e+00 : f32
    %870 = vector.broadcast %cst_75 : f32 to vector<3x2x2xf32>
    %871 = vector.extract_strided_slice %869 {offsets = [0, 0, 0], sizes = [3, 2, 14], strides = [1, 1, 1]} : vector<3x2x16xf32> to vector<3x2x14xf32>
    %872 = tpu.concatenate %870, %871 in 2 : vector<3x2x2xf32>, vector<3x2x14xf32> -> vector<3x2x16xf32>
    %cst_76 = arith.constant 0.000000e+00 : f32
    %873 = vector.broadcast %cst_76 : f32 to vector<3x2x2xf32>
    %874 = vector.extract_strided_slice %869 {offsets = [0, 0, 2], sizes = [3, 2, 14], strides = [1, 1, 1]} : vector<3x2x16xf32> to vector<3x2x14xf32>
    %875 = tpu.concatenate %874, %873 in 2 : vector<3x2x14xf32>, vector<3x2x2xf32> -> vector<3x2x16xf32>
    %c93 = arith.constant 93 : index
    %876 = memref.load %arg7[%c93] : memref<213xf32, #tpu.memory_space<smem>>
    %877 = vector.extract_strided_slice %872 {offsets = [0, 0, 0], sizes = [1, 2, 16], strides = [1, 1, 1]} : vector<3x2x16xf32> to vector<1x2x16xf32>
    %878 = vector.shape_cast %877 : vector<1x2x16xf32> to vector<2x16xf32>
    %879 = vector.broadcast %876 : f32 to vector<2x16xf32>
    %880 = arith.mulf %879, %878 : vector<2x16xf32>
    %c94 = arith.constant 94 : index
    %881 = memref.load %arg7[%c94] : memref<213xf32, #tpu.memory_space<smem>>
    %882 = vector.extract_strided_slice %869 {offsets = [0, 0, 0], sizes = [1, 2, 16], strides = [1, 1, 1]} : vector<3x2x16xf32> to vector<1x2x16xf32>
    %883 = vector.shape_cast %882 : vector<1x2x16xf32> to vector<2x16xf32>
    %884 = vector.broadcast %881 : f32 to vector<2x16xf32>
    %885 = arith.mulf %884, %883 : vector<2x16xf32>
    %c95 = arith.constant 95 : index
    %886 = memref.load %arg7[%c95] : memref<213xf32, #tpu.memory_space<smem>>
    %887 = vector.extract_strided_slice %875 {offsets = [0, 0, 0], sizes = [1, 2, 16], strides = [1, 1, 1]} : vector<3x2x16xf32> to vector<1x2x16xf32>
    %888 = vector.shape_cast %887 : vector<1x2x16xf32> to vector<2x16xf32>
    %889 = vector.broadcast %886 : f32 to vector<2x16xf32>
    %890 = arith.mulf %889, %888 : vector<2x16xf32>
    %c96 = arith.constant 96 : index
    %891 = memref.load %arg7[%c96] : memref<213xf32, #tpu.memory_space<smem>>
    %892 = vector.extract_strided_slice %872 {offsets = [1, 0, 0], sizes = [1, 2, 16], strides = [1, 1, 1]} : vector<3x2x16xf32> to vector<1x2x16xf32>
    %893 = vector.shape_cast %892 : vector<1x2x16xf32> to vector<2x16xf32>
    %894 = vector.broadcast %891 : f32 to vector<2x16xf32>
    %895 = arith.mulf %894, %893 : vector<2x16xf32>
    %c97 = arith.constant 97 : index
    %896 = memref.load %arg7[%c97] : memref<213xf32, #tpu.memory_space<smem>>
    %897 = vector.extract_strided_slice %869 {offsets = [1, 0, 0], sizes = [1, 2, 16], strides = [1, 1, 1]} : vector<3x2x16xf32> to vector<1x2x16xf32>
    %898 = vector.shape_cast %897 : vector<1x2x16xf32> to vector<2x16xf32>
    %899 = vector.broadcast %896 : f32 to vector<2x16xf32>
    %900 = arith.mulf %899, %898 : vector<2x16xf32>
    %c98 = arith.constant 98 : index
    %901 = memref.load %arg7[%c98] : memref<213xf32, #tpu.memory_space<smem>>
    %902 = vector.extract_strided_slice %875 {offsets = [1, 0, 0], sizes = [1, 2, 16], strides = [1, 1, 1]} : vector<3x2x16xf32> to vector<1x2x16xf32>
    %903 = vector.shape_cast %902 : vector<1x2x16xf32> to vector<2x16xf32>
    %904 = vector.broadcast %901 : f32 to vector<2x16xf32>
    %905 = arith.mulf %904, %903 : vector<2x16xf32>
    %c99 = arith.constant 99 : index
    %906 = memref.load %arg7[%c99] : memref<213xf32, #tpu.memory_space<smem>>
    %907 = vector.extract_strided_slice %872 {offsets = [2, 0, 0], sizes = [1, 2, 16], strides = [1, 1, 1]} : vector<3x2x16xf32> to vector<1x2x16xf32>
    %908 = vector.shape_cast %907 : vector<1x2x16xf32> to vector<2x16xf32>
    %909 = vector.broadcast %906 : f32 to vector<2x16xf32>
    %910 = arith.mulf %909, %908 : vector<2x16xf32>
    %c100 = arith.constant 100 : index
    %911 = memref.load %arg7[%c100] : memref<213xf32, #tpu.memory_space<smem>>
    %912 = vector.extract_strided_slice %869 {offsets = [2, 0, 0], sizes = [1, 2, 16], strides = [1, 1, 1]} : vector<3x2x16xf32> to vector<1x2x16xf32>
    %913 = vector.shape_cast %912 : vector<1x2x16xf32> to vector<2x16xf32>
    %914 = vector.broadcast %911 : f32 to vector<2x16xf32>
    %915 = arith.mulf %914, %913 : vector<2x16xf32>
    %c101 = arith.constant 101 : index
    %916 = memref.load %arg7[%c101] : memref<213xf32, #tpu.memory_space<smem>>
    %917 = vector.extract_strided_slice %875 {offsets = [2, 0, 0], sizes = [1, 2, 16], strides = [1, 1, 1]} : vector<3x2x16xf32> to vector<1x2x16xf32>
    %918 = vector.shape_cast %917 : vector<1x2x16xf32> to vector<2x16xf32>
    %919 = vector.broadcast %916 : f32 to vector<2x16xf32>
    %920 = arith.mulf %919, %918 : vector<2x16xf32>
    %921 = arith.addf %880, %885 : vector<2x16xf32>
    %922 = arith.addf %890, %895 : vector<2x16xf32>
    %923 = arith.addf %900, %905 : vector<2x16xf32>
    %924 = arith.addf %910, %915 : vector<2x16xf32>
    %925 = arith.addf %921, %922 : vector<2x16xf32>
    %926 = arith.addf %923, %924 : vector<2x16xf32>
    %927 = arith.addf %925, %926 : vector<2x16xf32>
    %928 = arith.addf %927, %920 : vector<2x16xf32>
    %c120 = arith.constant 120 : index
    %929 = memref.load %arg7[%c120] : memref<213xf32, #tpu.memory_space<smem>>
    %930 = vector.broadcast %929 : f32 to vector<2x16xf32>
    %931 = arith.addf %928, %930 : vector<2x16xf32>
    %c102 = arith.constant 102 : index
    %932 = memref.load %arg7[%c102] : memref<213xf32, #tpu.memory_space<smem>>
    %933 = vector.extract_strided_slice %872 {offsets = [0, 0, 0], sizes = [1, 2, 16], strides = [1, 1, 1]} : vector<3x2x16xf32> to vector<1x2x16xf32>
    %934 = vector.shape_cast %933 : vector<1x2x16xf32> to vector<2x16xf32>
    %935 = vector.broadcast %932 : f32 to vector<2x16xf32>
    %936 = arith.mulf %935, %934 : vector<2x16xf32>
    %c103 = arith.constant 103 : index
    %937 = memref.load %arg7[%c103] : memref<213xf32, #tpu.memory_space<smem>>
    %938 = vector.extract_strided_slice %869 {offsets = [0, 0, 0], sizes = [1, 2, 16], strides = [1, 1, 1]} : vector<3x2x16xf32> to vector<1x2x16xf32>
    %939 = vector.shape_cast %938 : vector<1x2x16xf32> to vector<2x16xf32>
    %940 = vector.broadcast %937 : f32 to vector<2x16xf32>
    %941 = arith.mulf %940, %939 : vector<2x16xf32>
    %c104 = arith.constant 104 : index
    %942 = memref.load %arg7[%c104] : memref<213xf32, #tpu.memory_space<smem>>
    %943 = vector.extract_strided_slice %875 {offsets = [0, 0, 0], sizes = [1, 2, 16], strides = [1, 1, 1]} : vector<3x2x16xf32> to vector<1x2x16xf32>
    %944 = vector.shape_cast %943 : vector<1x2x16xf32> to vector<2x16xf32>
    %945 = vector.broadcast %942 : f32 to vector<2x16xf32>
    %946 = arith.mulf %945, %944 : vector<2x16xf32>
    %c105 = arith.constant 105 : index
    %947 = memref.load %arg7[%c105] : memref<213xf32, #tpu.memory_space<smem>>
    %948 = vector.extract_strided_slice %872 {offsets = [1, 0, 0], sizes = [1, 2, 16], strides = [1, 1, 1]} : vector<3x2x16xf32> to vector<1x2x16xf32>
    %949 = vector.shape_cast %948 : vector<1x2x16xf32> to vector<2x16xf32>
    %950 = vector.broadcast %947 : f32 to vector<2x16xf32>
    %951 = arith.mulf %950, %949 : vector<2x16xf32>
    %c106 = arith.constant 106 : index
    %952 = memref.load %arg7[%c106] : memref<213xf32, #tpu.memory_space<smem>>
    %953 = vector.extract_strided_slice %869 {offsets = [1, 0, 0], sizes = [1, 2, 16], strides = [1, 1, 1]} : vector<3x2x16xf32> to vector<1x2x16xf32>
    %954 = vector.shape_cast %953 : vector<1x2x16xf32> to vector<2x16xf32>
    %955 = vector.broadcast %952 : f32 to vector<2x16xf32>
    %956 = arith.mulf %955, %954 : vector<2x16xf32>
    %c107 = arith.constant 107 : index
    %957 = memref.load %arg7[%c107] : memref<213xf32, #tpu.memory_space<smem>>
    %958 = vector.extract_strided_slice %875 {offsets = [1, 0, 0], sizes = [1, 2, 16], strides = [1, 1, 1]} : vector<3x2x16xf32> to vector<1x2x16xf32>
    %959 = vector.shape_cast %958 : vector<1x2x16xf32> to vector<2x16xf32>
    %960 = vector.broadcast %957 : f32 to vector<2x16xf32>
    %961 = arith.mulf %960, %959 : vector<2x16xf32>
    %c108 = arith.constant 108 : index
    %962 = memref.load %arg7[%c108] : memref<213xf32, #tpu.memory_space<smem>>
    %963 = vector.extract_strided_slice %872 {offsets = [2, 0, 0], sizes = [1, 2, 16], strides = [1, 1, 1]} : vector<3x2x16xf32> to vector<1x2x16xf32>
    %964 = vector.shape_cast %963 : vector<1x2x16xf32> to vector<2x16xf32>
    %965 = vector.broadcast %962 : f32 to vector<2x16xf32>
    %966 = arith.mulf %965, %964 : vector<2x16xf32>
    %c109 = arith.constant 109 : index
    %967 = memref.load %arg7[%c109] : memref<213xf32, #tpu.memory_space<smem>>
    %968 = vector.extract_strided_slice %869 {offsets = [2, 0, 0], sizes = [1, 2, 16], strides = [1, 1, 1]} : vector<3x2x16xf32> to vector<1x2x16xf32>
    %969 = vector.shape_cast %968 : vector<1x2x16xf32> to vector<2x16xf32>
    %970 = vector.broadcast %967 : f32 to vector<2x16xf32>
    %971 = arith.mulf %970, %969 : vector<2x16xf32>
    %c110 = arith.constant 110 : index
    %972 = memref.load %arg7[%c110] : memref<213xf32, #tpu.memory_space<smem>>
    %973 = vector.extract_strided_slice %875 {offsets = [2, 0, 0], sizes = [1, 2, 16], strides = [1, 1, 1]} : vector<3x2x16xf32> to vector<1x2x16xf32>
    %974 = vector.shape_cast %973 : vector<1x2x16xf32> to vector<2x16xf32>
    %975 = vector.broadcast %972 : f32 to vector<2x16xf32>
    %976 = arith.mulf %975, %974 : vector<2x16xf32>
    %977 = arith.addf %936, %941 : vector<2x16xf32>
    %978 = arith.addf %946, %951 : vector<2x16xf32>
    %979 = arith.addf %956, %961 : vector<2x16xf32>
    %980 = arith.addf %966, %971 : vector<2x16xf32>
    %981 = arith.addf %977, %978 : vector<2x16xf32>
    %982 = arith.addf %979, %980 : vector<2x16xf32>
    %983 = arith.addf %981, %982 : vector<2x16xf32>
    %984 = arith.addf %983, %976 : vector<2x16xf32>
    %c121 = arith.constant 121 : index
    %985 = memref.load %arg7[%c121] : memref<213xf32, #tpu.memory_space<smem>>
    %986 = vector.broadcast %985 : f32 to vector<2x16xf32>
    %987 = arith.addf %984, %986 : vector<2x16xf32>
    %c111 = arith.constant 111 : index
    %988 = memref.load %arg7[%c111] : memref<213xf32, #tpu.memory_space<smem>>
    %989 = vector.extract_strided_slice %872 {offsets = [0, 0, 0], sizes = [1, 2, 16], strides = [1, 1, 1]} : vector<3x2x16xf32> to vector<1x2x16xf32>
    %990 = vector.shape_cast %989 : vector<1x2x16xf32> to vector<2x16xf32>
    %991 = vector.broadcast %988 : f32 to vector<2x16xf32>
    %992 = arith.mulf %991, %990 : vector<2x16xf32>
    %c112 = arith.constant 112 : index
    %993 = memref.load %arg7[%c112] : memref<213xf32, #tpu.memory_space<smem>>
    %994 = vector.extract_strided_slice %869 {offsets = [0, 0, 0], sizes = [1, 2, 16], strides = [1, 1, 1]} : vector<3x2x16xf32> to vector<1x2x16xf32>
    %995 = vector.shape_cast %994 : vector<1x2x16xf32> to vector<2x16xf32>
    %996 = vector.broadcast %993 : f32 to vector<2x16xf32>
    %997 = arith.mulf %996, %995 : vector<2x16xf32>
    %c113 = arith.constant 113 : index
    %998 = memref.load %arg7[%c113] : memref<213xf32, #tpu.memory_space<smem>>
    %999 = vector.extract_strided_slice %875 {offsets = [0, 0, 0], sizes = [1, 2, 16], strides = [1, 1, 1]} : vector<3x2x16xf32> to vector<1x2x16xf32>
    %1000 = vector.shape_cast %999 : vector<1x2x16xf32> to vector<2x16xf32>
    %1001 = vector.broadcast %998 : f32 to vector<2x16xf32>
    %1002 = arith.mulf %1001, %1000 : vector<2x16xf32>
    %c114 = arith.constant 114 : index
    %1003 = memref.load %arg7[%c114] : memref<213xf32, #tpu.memory_space<smem>>
    %1004 = vector.extract_strided_slice %872 {offsets = [1, 0, 0], sizes = [1, 2, 16], strides = [1, 1, 1]} : vector<3x2x16xf32> to vector<1x2x16xf32>
    %1005 = vector.shape_cast %1004 : vector<1x2x16xf32> to vector<2x16xf32>
    %1006 = vector.broadcast %1003 : f32 to vector<2x16xf32>
    %1007 = arith.mulf %1006, %1005 : vector<2x16xf32>
    %c115 = arith.constant 115 : index
    %1008 = memref.load %arg7[%c115] : memref<213xf32, #tpu.memory_space<smem>>
    %1009 = vector.extract_strided_slice %869 {offsets = [1, 0, 0], sizes = [1, 2, 16], strides = [1, 1, 1]} : vector<3x2x16xf32> to vector<1x2x16xf32>
    %1010 = vector.shape_cast %1009 : vector<1x2x16xf32> to vector<2x16xf32>
    %1011 = vector.broadcast %1008 : f32 to vector<2x16xf32>
    %1012 = arith.mulf %1011, %1010 : vector<2x16xf32>
    %c116 = arith.constant 116 : index
    %1013 = memref.load %arg7[%c116] : memref<213xf32, #tpu.memory_space<smem>>
    %1014 = vector.extract_strided_slice %875 {offsets = [1, 0, 0], sizes = [1, 2, 16], strides = [1, 1, 1]} : vector<3x2x16xf32> to vector<1x2x16xf32>
    %1015 = vector.shape_cast %1014 : vector<1x2x16xf32> to vector<2x16xf32>
    %1016 = vector.broadcast %1013 : f32 to vector<2x16xf32>
    %1017 = arith.mulf %1016, %1015 : vector<2x16xf32>
    %c117 = arith.constant 117 : index
    %1018 = memref.load %arg7[%c117] : memref<213xf32, #tpu.memory_space<smem>>
    %1019 = vector.extract_strided_slice %872 {offsets = [2, 0, 0], sizes = [1, 2, 16], strides = [1, 1, 1]} : vector<3x2x16xf32> to vector<1x2x16xf32>
    %1020 = vector.shape_cast %1019 : vector<1x2x16xf32> to vector<2x16xf32>
    %1021 = vector.broadcast %1018 : f32 to vector<2x16xf32>
    %1022 = arith.mulf %1021, %1020 : vector<2x16xf32>
    %c118 = arith.constant 118 : index
    %1023 = memref.load %arg7[%c118] : memref<213xf32, #tpu.memory_space<smem>>
    %1024 = vector.extract_strided_slice %869 {offsets = [2, 0, 0], sizes = [1, 2, 16], strides = [1, 1, 1]} : vector<3x2x16xf32> to vector<1x2x16xf32>
    %1025 = vector.shape_cast %1024 : vector<1x2x16xf32> to vector<2x16xf32>
    %1026 = vector.broadcast %1023 : f32 to vector<2x16xf32>
    %1027 = arith.mulf %1026, %1025 : vector<2x16xf32>
    %c119 = arith.constant 119 : index
    %1028 = memref.load %arg7[%c119] : memref<213xf32, #tpu.memory_space<smem>>
    %1029 = vector.extract_strided_slice %875 {offsets = [2, 0, 0], sizes = [1, 2, 16], strides = [1, 1, 1]} : vector<3x2x16xf32> to vector<1x2x16xf32>
    %1030 = vector.shape_cast %1029 : vector<1x2x16xf32> to vector<2x16xf32>
    %1031 = vector.broadcast %1028 : f32 to vector<2x16xf32>
    %1032 = arith.mulf %1031, %1030 : vector<2x16xf32>
    %1033 = arith.addf %992, %997 : vector<2x16xf32>
    %1034 = arith.addf %1002, %1007 : vector<2x16xf32>
    %1035 = arith.addf %1012, %1017 : vector<2x16xf32>
    %1036 = arith.addf %1022, %1027 : vector<2x16xf32>
    %1037 = arith.addf %1033, %1034 : vector<2x16xf32>
    %1038 = arith.addf %1035, %1036 : vector<2x16xf32>
    %1039 = arith.addf %1037, %1038 : vector<2x16xf32>
    %1040 = arith.addf %1039, %1032 : vector<2x16xf32>
    %c122 = arith.constant 122 : index
    %1041 = memref.load %arg7[%c122] : memref<213xf32, #tpu.memory_space<smem>>
    %1042 = vector.broadcast %1041 : f32 to vector<2x16xf32>
    %1043 = arith.addf %1040, %1042 : vector<2x16xf32>
    %cst_77 = arith.constant 0.000000e+00 : f32
    %1044 = vector.broadcast %cst_77 : f32 to vector<2x16xf32>
    %1045 = arith.maximumf %931, %1044 : vector<2x16xf32>
    %cst_78 = arith.constant 0.000000e+00 : f32
    %1046 = vector.broadcast %cst_78 : f32 to vector<2x16xf32>
    %1047 = arith.maximumf %987, %1046 : vector<2x16xf32>
    %cst_79 = arith.constant 0.000000e+00 : f32
    %1048 = vector.broadcast %cst_79 : f32 to vector<2x16xf32>
    %1049 = arith.maximumf %1043, %1048 : vector<2x16xf32>
    %1050 = vector.shape_cast %1045 : vector<2x16xf32> to vector<1x2x16xf32>
    %1051 = vector.shape_cast %1047 : vector<2x16xf32> to vector<1x2x16xf32>
    %1052 = vector.shape_cast %1049 : vector<2x16xf32> to vector<1x2x16xf32>
    %1053 = tpu.concatenate %1050, %1051, %1052 in 0 : vector<1x2x16xf32>, vector<1x2x16xf32>, vector<1x2x16xf32> -> vector<3x2x16xf32>
    %cst_80 = arith.constant 0.000000e+00 : f32
    %1054 = vector.broadcast %cst_80 : f32 to vector<3x2x2xf32>
    %1055 = vector.extract_strided_slice %1053 {offsets = [0, 0, 0], sizes = [3, 2, 14], strides = [1, 1, 1]} : vector<3x2x16xf32> to vector<3x2x14xf32>
    %1056 = tpu.concatenate %1054, %1055 in 2 : vector<3x2x2xf32>, vector<3x2x14xf32> -> vector<3x2x16xf32>
    %cst_81 = arith.constant 0.000000e+00 : f32
    %1057 = vector.broadcast %cst_81 : f32 to vector<3x2x2xf32>
    %1058 = vector.extract_strided_slice %1053 {offsets = [0, 0, 2], sizes = [3, 2, 14], strides = [1, 1, 1]} : vector<3x2x16xf32> to vector<3x2x14xf32>
    %1059 = tpu.concatenate %1058, %1057 in 2 : vector<3x2x14xf32>, vector<3x2x2xf32> -> vector<3x2x16xf32>
    %c123 = arith.constant 123 : index
    %1060 = memref.load %arg7[%c123] : memref<213xf32, #tpu.memory_space<smem>>
    %1061 = vector.extract_strided_slice %1056 {offsets = [0, 0, 0], sizes = [1, 2, 16], strides = [1, 1, 1]} : vector<3x2x16xf32> to vector<1x2x16xf32>
    %1062 = vector.shape_cast %1061 : vector<1x2x16xf32> to vector<2x16xf32>
    %1063 = vector.broadcast %1060 : f32 to vector<2x16xf32>
    %1064 = arith.mulf %1063, %1062 : vector<2x16xf32>
    %c124 = arith.constant 124 : index
    %1065 = memref.load %arg7[%c124] : memref<213xf32, #tpu.memory_space<smem>>
    %1066 = vector.extract_strided_slice %1053 {offsets = [0, 0, 0], sizes = [1, 2, 16], strides = [1, 1, 1]} : vector<3x2x16xf32> to vector<1x2x16xf32>
    %1067 = vector.shape_cast %1066 : vector<1x2x16xf32> to vector<2x16xf32>
    %1068 = vector.broadcast %1065 : f32 to vector<2x16xf32>
    %1069 = arith.mulf %1068, %1067 : vector<2x16xf32>
    %c125 = arith.constant 125 : index
    %1070 = memref.load %arg7[%c125] : memref<213xf32, #tpu.memory_space<smem>>
    %1071 = vector.extract_strided_slice %1059 {offsets = [0, 0, 0], sizes = [1, 2, 16], strides = [1, 1, 1]} : vector<3x2x16xf32> to vector<1x2x16xf32>
    %1072 = vector.shape_cast %1071 : vector<1x2x16xf32> to vector<2x16xf32>
    %1073 = vector.broadcast %1070 : f32 to vector<2x16xf32>
    %1074 = arith.mulf %1073, %1072 : vector<2x16xf32>
    %c126 = arith.constant 126 : index
    %1075 = memref.load %arg7[%c126] : memref<213xf32, #tpu.memory_space<smem>>
    %1076 = vector.extract_strided_slice %1056 {offsets = [1, 0, 0], sizes = [1, 2, 16], strides = [1, 1, 1]} : vector<3x2x16xf32> to vector<1x2x16xf32>
    %1077 = vector.shape_cast %1076 : vector<1x2x16xf32> to vector<2x16xf32>
    %1078 = vector.broadcast %1075 : f32 to vector<2x16xf32>
    %1079 = arith.mulf %1078, %1077 : vector<2x16xf32>
    %c127 = arith.constant 127 : index
    %1080 = memref.load %arg7[%c127] : memref<213xf32, #tpu.memory_space<smem>>
    %1081 = vector.extract_strided_slice %1053 {offsets = [1, 0, 0], sizes = [1, 2, 16], strides = [1, 1, 1]} : vector<3x2x16xf32> to vector<1x2x16xf32>
    %1082 = vector.shape_cast %1081 : vector<1x2x16xf32> to vector<2x16xf32>
    %1083 = vector.broadcast %1080 : f32 to vector<2x16xf32>
    %1084 = arith.mulf %1083, %1082 : vector<2x16xf32>
    %c128 = arith.constant 128 : index
    %1085 = memref.load %arg7[%c128] : memref<213xf32, #tpu.memory_space<smem>>
    %1086 = vector.extract_strided_slice %1059 {offsets = [1, 0, 0], sizes = [1, 2, 16], strides = [1, 1, 1]} : vector<3x2x16xf32> to vector<1x2x16xf32>
    %1087 = vector.shape_cast %1086 : vector<1x2x16xf32> to vector<2x16xf32>
    %1088 = vector.broadcast %1085 : f32 to vector<2x16xf32>
    %1089 = arith.mulf %1088, %1087 : vector<2x16xf32>
    %c129 = arith.constant 129 : index
    %1090 = memref.load %arg7[%c129] : memref<213xf32, #tpu.memory_space<smem>>
    %1091 = vector.extract_strided_slice %1056 {offsets = [2, 0, 0], sizes = [1, 2, 16], strides = [1, 1, 1]} : vector<3x2x16xf32> to vector<1x2x16xf32>
    %1092 = vector.shape_cast %1091 : vector<1x2x16xf32> to vector<2x16xf32>
    %1093 = vector.broadcast %1090 : f32 to vector<2x16xf32>
    %1094 = arith.mulf %1093, %1092 : vector<2x16xf32>
    %c130 = arith.constant 130 : index
    %1095 = memref.load %arg7[%c130] : memref<213xf32, #tpu.memory_space<smem>>
    %1096 = vector.extract_strided_slice %1053 {offsets = [2, 0, 0], sizes = [1, 2, 16], strides = [1, 1, 1]} : vector<3x2x16xf32> to vector<1x2x16xf32>
    %1097 = vector.shape_cast %1096 : vector<1x2x16xf32> to vector<2x16xf32>
    %1098 = vector.broadcast %1095 : f32 to vector<2x16xf32>
    %1099 = arith.mulf %1098, %1097 : vector<2x16xf32>
    %c131 = arith.constant 131 : index
    %1100 = memref.load %arg7[%c131] : memref<213xf32, #tpu.memory_space<smem>>
    %1101 = vector.extract_strided_slice %1059 {offsets = [2, 0, 0], sizes = [1, 2, 16], strides = [1, 1, 1]} : vector<3x2x16xf32> to vector<1x2x16xf32>
    %1102 = vector.shape_cast %1101 : vector<1x2x16xf32> to vector<2x16xf32>
    %1103 = vector.broadcast %1100 : f32 to vector<2x16xf32>
    %1104 = arith.mulf %1103, %1102 : vector<2x16xf32>
    %1105 = arith.addf %1064, %1069 : vector<2x16xf32>
    %1106 = arith.addf %1074, %1079 : vector<2x16xf32>
    %1107 = arith.addf %1084, %1089 : vector<2x16xf32>
    %1108 = arith.addf %1094, %1099 : vector<2x16xf32>
    %1109 = arith.addf %1105, %1106 : vector<2x16xf32>
    %1110 = arith.addf %1107, %1108 : vector<2x16xf32>
    %1111 = arith.addf %1109, %1110 : vector<2x16xf32>
    %1112 = arith.addf %1111, %1104 : vector<2x16xf32>
    %c150 = arith.constant 150 : index
    %1113 = memref.load %arg7[%c150] : memref<213xf32, #tpu.memory_space<smem>>
    %1114 = vector.broadcast %1113 : f32 to vector<2x16xf32>
    %1115 = arith.addf %1112, %1114 : vector<2x16xf32>
    %c132 = arith.constant 132 : index
    %1116 = memref.load %arg7[%c132] : memref<213xf32, #tpu.memory_space<smem>>
    %1117 = vector.extract_strided_slice %1056 {offsets = [0, 0, 0], sizes = [1, 2, 16], strides = [1, 1, 1]} : vector<3x2x16xf32> to vector<1x2x16xf32>
    %1118 = vector.shape_cast %1117 : vector<1x2x16xf32> to vector<2x16xf32>
    %1119 = vector.broadcast %1116 : f32 to vector<2x16xf32>
    %1120 = arith.mulf %1119, %1118 : vector<2x16xf32>
    %c133 = arith.constant 133 : index
    %1121 = memref.load %arg7[%c133] : memref<213xf32, #tpu.memory_space<smem>>
    %1122 = vector.extract_strided_slice %1053 {offsets = [0, 0, 0], sizes = [1, 2, 16], strides = [1, 1, 1]} : vector<3x2x16xf32> to vector<1x2x16xf32>
    %1123 = vector.shape_cast %1122 : vector<1x2x16xf32> to vector<2x16xf32>
    %1124 = vector.broadcast %1121 : f32 to vector<2x16xf32>
    %1125 = arith.mulf %1124, %1123 : vector<2x16xf32>
    %c134 = arith.constant 134 : index
    %1126 = memref.load %arg7[%c134] : memref<213xf32, #tpu.memory_space<smem>>
    %1127 = vector.extract_strided_slice %1059 {offsets = [0, 0, 0], sizes = [1, 2, 16], strides = [1, 1, 1]} : vector<3x2x16xf32> to vector<1x2x16xf32>
    %1128 = vector.shape_cast %1127 : vector<1x2x16xf32> to vector<2x16xf32>
    %1129 = vector.broadcast %1126 : f32 to vector<2x16xf32>
    %1130 = arith.mulf %1129, %1128 : vector<2x16xf32>
    %c135 = arith.constant 135 : index
    %1131 = memref.load %arg7[%c135] : memref<213xf32, #tpu.memory_space<smem>>
    %1132 = vector.extract_strided_slice %1056 {offsets = [1, 0, 0], sizes = [1, 2, 16], strides = [1, 1, 1]} : vector<3x2x16xf32> to vector<1x2x16xf32>
    %1133 = vector.shape_cast %1132 : vector<1x2x16xf32> to vector<2x16xf32>
    %1134 = vector.broadcast %1131 : f32 to vector<2x16xf32>
    %1135 = arith.mulf %1134, %1133 : vector<2x16xf32>
    %c136 = arith.constant 136 : index
    %1136 = memref.load %arg7[%c136] : memref<213xf32, #tpu.memory_space<smem>>
    %1137 = vector.extract_strided_slice %1053 {offsets = [1, 0, 0], sizes = [1, 2, 16], strides = [1, 1, 1]} : vector<3x2x16xf32> to vector<1x2x16xf32>
    %1138 = vector.shape_cast %1137 : vector<1x2x16xf32> to vector<2x16xf32>
    %1139 = vector.broadcast %1136 : f32 to vector<2x16xf32>
    %1140 = arith.mulf %1139, %1138 : vector<2x16xf32>
    %c137 = arith.constant 137 : index
    %1141 = memref.load %arg7[%c137] : memref<213xf32, #tpu.memory_space<smem>>
    %1142 = vector.extract_strided_slice %1059 {offsets = [1, 0, 0], sizes = [1, 2, 16], strides = [1, 1, 1]} : vector<3x2x16xf32> to vector<1x2x16xf32>
    %1143 = vector.shape_cast %1142 : vector<1x2x16xf32> to vector<2x16xf32>
    %1144 = vector.broadcast %1141 : f32 to vector<2x16xf32>
    %1145 = arith.mulf %1144, %1143 : vector<2x16xf32>
    %c138 = arith.constant 138 : index
    %1146 = memref.load %arg7[%c138] : memref<213xf32, #tpu.memory_space<smem>>
    %1147 = vector.extract_strided_slice %1056 {offsets = [2, 0, 0], sizes = [1, 2, 16], strides = [1, 1, 1]} : vector<3x2x16xf32> to vector<1x2x16xf32>
    %1148 = vector.shape_cast %1147 : vector<1x2x16xf32> to vector<2x16xf32>
    %1149 = vector.broadcast %1146 : f32 to vector<2x16xf32>
    %1150 = arith.mulf %1149, %1148 : vector<2x16xf32>
    %c139 = arith.constant 139 : index
    %1151 = memref.load %arg7[%c139] : memref<213xf32, #tpu.memory_space<smem>>
    %1152 = vector.extract_strided_slice %1053 {offsets = [2, 0, 0], sizes = [1, 2, 16], strides = [1, 1, 1]} : vector<3x2x16xf32> to vector<1x2x16xf32>
    %1153 = vector.shape_cast %1152 : vector<1x2x16xf32> to vector<2x16xf32>
    %1154 = vector.broadcast %1151 : f32 to vector<2x16xf32>
    %1155 = arith.mulf %1154, %1153 : vector<2x16xf32>
    %c140 = arith.constant 140 : index
    %1156 = memref.load %arg7[%c140] : memref<213xf32, #tpu.memory_space<smem>>
    %1157 = vector.extract_strided_slice %1059 {offsets = [2, 0, 0], sizes = [1, 2, 16], strides = [1, 1, 1]} : vector<3x2x16xf32> to vector<1x2x16xf32>
    %1158 = vector.shape_cast %1157 : vector<1x2x16xf32> to vector<2x16xf32>
    %1159 = vector.broadcast %1156 : f32 to vector<2x16xf32>
    %1160 = arith.mulf %1159, %1158 : vector<2x16xf32>
    %1161 = arith.addf %1120, %1125 : vector<2x16xf32>
    %1162 = arith.addf %1130, %1135 : vector<2x16xf32>
    %1163 = arith.addf %1140, %1145 : vector<2x16xf32>
    %1164 = arith.addf %1150, %1155 : vector<2x16xf32>
    %1165 = arith.addf %1161, %1162 : vector<2x16xf32>
    %1166 = arith.addf %1163, %1164 : vector<2x16xf32>
    %1167 = arith.addf %1165, %1166 : vector<2x16xf32>
    %1168 = arith.addf %1167, %1160 : vector<2x16xf32>
    %c151 = arith.constant 151 : index
    %1169 = memref.load %arg7[%c151] : memref<213xf32, #tpu.memory_space<smem>>
    %1170 = vector.broadcast %1169 : f32 to vector<2x16xf32>
    %1171 = arith.addf %1168, %1170 : vector<2x16xf32>
    %c141 = arith.constant 141 : index
    %1172 = memref.load %arg7[%c141] : memref<213xf32, #tpu.memory_space<smem>>
    %1173 = vector.extract_strided_slice %1056 {offsets = [0, 0, 0], sizes = [1, 2, 16], strides = [1, 1, 1]} : vector<3x2x16xf32> to vector<1x2x16xf32>
    %1174 = vector.shape_cast %1173 : vector<1x2x16xf32> to vector<2x16xf32>
    %1175 = vector.broadcast %1172 : f32 to vector<2x16xf32>
    %1176 = arith.mulf %1175, %1174 : vector<2x16xf32>
    %c142 = arith.constant 142 : index
    %1177 = memref.load %arg7[%c142] : memref<213xf32, #tpu.memory_space<smem>>
    %1178 = vector.extract_strided_slice %1053 {offsets = [0, 0, 0], sizes = [1, 2, 16], strides = [1, 1, 1]} : vector<3x2x16xf32> to vector<1x2x16xf32>
    %1179 = vector.shape_cast %1178 : vector<1x2x16xf32> to vector<2x16xf32>
    %1180 = vector.broadcast %1177 : f32 to vector<2x16xf32>
    %1181 = arith.mulf %1180, %1179 : vector<2x16xf32>
    %c143 = arith.constant 143 : index
    %1182 = memref.load %arg7[%c143] : memref<213xf32, #tpu.memory_space<smem>>
    %1183 = vector.extract_strided_slice %1059 {offsets = [0, 0, 0], sizes = [1, 2, 16], strides = [1, 1, 1]} : vector<3x2x16xf32> to vector<1x2x16xf32>
    %1184 = vector.shape_cast %1183 : vector<1x2x16xf32> to vector<2x16xf32>
    %1185 = vector.broadcast %1182 : f32 to vector<2x16xf32>
    %1186 = arith.mulf %1185, %1184 : vector<2x16xf32>
    %c144 = arith.constant 144 : index
    %1187 = memref.load %arg7[%c144] : memref<213xf32, #tpu.memory_space<smem>>
    %1188 = vector.extract_strided_slice %1056 {offsets = [1, 0, 0], sizes = [1, 2, 16], strides = [1, 1, 1]} : vector<3x2x16xf32> to vector<1x2x16xf32>
    %1189 = vector.shape_cast %1188 : vector<1x2x16xf32> to vector<2x16xf32>
    %1190 = vector.broadcast %1187 : f32 to vector<2x16xf32>
    %1191 = arith.mulf %1190, %1189 : vector<2x16xf32>
    %c145 = arith.constant 145 : index
    %1192 = memref.load %arg7[%c145] : memref<213xf32, #tpu.memory_space<smem>>
    %1193 = vector.extract_strided_slice %1053 {offsets = [1, 0, 0], sizes = [1, 2, 16], strides = [1, 1, 1]} : vector<3x2x16xf32> to vector<1x2x16xf32>
    %1194 = vector.shape_cast %1193 : vector<1x2x16xf32> to vector<2x16xf32>
    %1195 = vector.broadcast %1192 : f32 to vector<2x16xf32>
    %1196 = arith.mulf %1195, %1194 : vector<2x16xf32>
    %c146 = arith.constant 146 : index
    %1197 = memref.load %arg7[%c146] : memref<213xf32, #tpu.memory_space<smem>>
    %1198 = vector.extract_strided_slice %1059 {offsets = [1, 0, 0], sizes = [1, 2, 16], strides = [1, 1, 1]} : vector<3x2x16xf32> to vector<1x2x16xf32>
    %1199 = vector.shape_cast %1198 : vector<1x2x16xf32> to vector<2x16xf32>
    %1200 = vector.broadcast %1197 : f32 to vector<2x16xf32>
    %1201 = arith.mulf %1200, %1199 : vector<2x16xf32>
    %c147 = arith.constant 147 : index
    %1202 = memref.load %arg7[%c147] : memref<213xf32, #tpu.memory_space<smem>>
    %1203 = vector.extract_strided_slice %1056 {offsets = [2, 0, 0], sizes = [1, 2, 16], strides = [1, 1, 1]} : vector<3x2x16xf32> to vector<1x2x16xf32>
    %1204 = vector.shape_cast %1203 : vector<1x2x16xf32> to vector<2x16xf32>
    %1205 = vector.broadcast %1202 : f32 to vector<2x16xf32>
    %1206 = arith.mulf %1205, %1204 : vector<2x16xf32>
    %c148 = arith.constant 148 : index
    %1207 = memref.load %arg7[%c148] : memref<213xf32, #tpu.memory_space<smem>>
    %1208 = vector.extract_strided_slice %1053 {offsets = [2, 0, 0], sizes = [1, 2, 16], strides = [1, 1, 1]} : vector<3x2x16xf32> to vector<1x2x16xf32>
    %1209 = vector.shape_cast %1208 : vector<1x2x16xf32> to vector<2x16xf32>
    %1210 = vector.broadcast %1207 : f32 to vector<2x16xf32>
    %1211 = arith.mulf %1210, %1209 : vector<2x16xf32>
    %c149 = arith.constant 149 : index
    %1212 = memref.load %arg7[%c149] : memref<213xf32, #tpu.memory_space<smem>>
    %1213 = vector.extract_strided_slice %1059 {offsets = [2, 0, 0], sizes = [1, 2, 16], strides = [1, 1, 1]} : vector<3x2x16xf32> to vector<1x2x16xf32>
    %1214 = vector.shape_cast %1213 : vector<1x2x16xf32> to vector<2x16xf32>
    %1215 = vector.broadcast %1212 : f32 to vector<2x16xf32>
    %1216 = arith.mulf %1215, %1214 : vector<2x16xf32>
    %1217 = arith.addf %1176, %1181 : vector<2x16xf32>
    %1218 = arith.addf %1186, %1191 : vector<2x16xf32>
    %1219 = arith.addf %1196, %1201 : vector<2x16xf32>
    %1220 = arith.addf %1206, %1211 : vector<2x16xf32>
    %1221 = arith.addf %1217, %1218 : vector<2x16xf32>
    %1222 = arith.addf %1219, %1220 : vector<2x16xf32>
    %1223 = arith.addf %1221, %1222 : vector<2x16xf32>
    %1224 = arith.addf %1223, %1216 : vector<2x16xf32>
    %c152 = arith.constant 152 : index
    %1225 = memref.load %arg7[%c152] : memref<213xf32, #tpu.memory_space<smem>>
    %1226 = vector.broadcast %1225 : f32 to vector<2x16xf32>
    %1227 = arith.addf %1224, %1226 : vector<2x16xf32>
    %1228 = arith.addf %1115, %849 : vector<2x16xf32>
    %cst_82 = arith.constant 0.000000e+00 : f32
    %1229 = vector.broadcast %cst_82 : f32 to vector<2x16xf32>
    %1230 = arith.maximumf %1228, %1229 : vector<2x16xf32>
    %1231 = arith.addf %1171, %857 : vector<2x16xf32>
    %cst_83 = arith.constant 0.000000e+00 : f32
    %1232 = vector.broadcast %cst_83 : f32 to vector<2x16xf32>
    %1233 = arith.maximumf %1231, %1232 : vector<2x16xf32>
    %1234 = arith.addf %1227, %865 : vector<2x16xf32>
    %cst_84 = arith.constant 0.000000e+00 : f32
    %1235 = vector.broadcast %cst_84 : f32 to vector<2x16xf32>
    %1236 = arith.maximumf %1234, %1235 : vector<2x16xf32>
    %1237 = vector.shape_cast %1230 : vector<2x16xf32> to vector<1x2x16xf32>
    %1238 = vector.shape_cast %1233 : vector<2x16xf32> to vector<1x2x16xf32>
    %1239 = vector.shape_cast %1236 : vector<2x16xf32> to vector<1x2x16xf32>
    %1240 = tpu.concatenate %1237, %1238, %1239 in 0 : vector<1x2x16xf32>, vector<1x2x16xf32>, vector<1x2x16xf32> -> vector<3x2x16xf32>
    %cst_85 = arith.constant 0.000000e+00 : f32
    %1241 = vector.broadcast %cst_85 : f32 to vector<3x2x2xf32>
    %1242 = vector.extract_strided_slice %1240 {offsets = [0, 0, 0], sizes = [3, 2, 14], strides = [1, 1, 1]} : vector<3x2x16xf32> to vector<3x2x14xf32>
    %1243 = tpu.concatenate %1241, %1242 in 2 : vector<3x2x2xf32>, vector<3x2x14xf32> -> vector<3x2x16xf32>
    %cst_86 = arith.constant 0.000000e+00 : f32
    %1244 = vector.broadcast %cst_86 : f32 to vector<3x2x2xf32>
    %1245 = vector.extract_strided_slice %1240 {offsets = [0, 0, 2], sizes = [3, 2, 14], strides = [1, 1, 1]} : vector<3x2x16xf32> to vector<3x2x14xf32>
    %1246 = tpu.concatenate %1245, %1244 in 2 : vector<3x2x14xf32>, vector<3x2x2xf32> -> vector<3x2x16xf32>
    %c153 = arith.constant 153 : index
    %1247 = memref.load %arg7[%c153] : memref<213xf32, #tpu.memory_space<smem>>
    %1248 = vector.extract_strided_slice %1243 {offsets = [0, 0, 0], sizes = [1, 2, 16], strides = [1, 1, 1]} : vector<3x2x16xf32> to vector<1x2x16xf32>
    %1249 = vector.shape_cast %1248 : vector<1x2x16xf32> to vector<2x16xf32>
    %1250 = vector.broadcast %1247 : f32 to vector<2x16xf32>
    %1251 = arith.mulf %1250, %1249 : vector<2x16xf32>
    %c154 = arith.constant 154 : index
    %1252 = memref.load %arg7[%c154] : memref<213xf32, #tpu.memory_space<smem>>
    %1253 = vector.extract_strided_slice %1240 {offsets = [0, 0, 0], sizes = [1, 2, 16], strides = [1, 1, 1]} : vector<3x2x16xf32> to vector<1x2x16xf32>
    %1254 = vector.shape_cast %1253 : vector<1x2x16xf32> to vector<2x16xf32>
    %1255 = vector.broadcast %1252 : f32 to vector<2x16xf32>
    %1256 = arith.mulf %1255, %1254 : vector<2x16xf32>
    %c155 = arith.constant 155 : index
    %1257 = memref.load %arg7[%c155] : memref<213xf32, #tpu.memory_space<smem>>
    %1258 = vector.extract_strided_slice %1246 {offsets = [0, 0, 0], sizes = [1, 2, 16], strides = [1, 1, 1]} : vector<3x2x16xf32> to vector<1x2x16xf32>
    %1259 = vector.shape_cast %1258 : vector<1x2x16xf32> to vector<2x16xf32>
    %1260 = vector.broadcast %1257 : f32 to vector<2x16xf32>
    %1261 = arith.mulf %1260, %1259 : vector<2x16xf32>
    %c156 = arith.constant 156 : index
    %1262 = memref.load %arg7[%c156] : memref<213xf32, #tpu.memory_space<smem>>
    %1263 = vector.extract_strided_slice %1243 {offsets = [1, 0, 0], sizes = [1, 2, 16], strides = [1, 1, 1]} : vector<3x2x16xf32> to vector<1x2x16xf32>
    %1264 = vector.shape_cast %1263 : vector<1x2x16xf32> to vector<2x16xf32>
    %1265 = vector.broadcast %1262 : f32 to vector<2x16xf32>
    %1266 = arith.mulf %1265, %1264 : vector<2x16xf32>
    %c157 = arith.constant 157 : index
    %1267 = memref.load %arg7[%c157] : memref<213xf32, #tpu.memory_space<smem>>
    %1268 = vector.extract_strided_slice %1240 {offsets = [1, 0, 0], sizes = [1, 2, 16], strides = [1, 1, 1]} : vector<3x2x16xf32> to vector<1x2x16xf32>
    %1269 = vector.shape_cast %1268 : vector<1x2x16xf32> to vector<2x16xf32>
    %1270 = vector.broadcast %1267 : f32 to vector<2x16xf32>
    %1271 = arith.mulf %1270, %1269 : vector<2x16xf32>
    %c158 = arith.constant 158 : index
    %1272 = memref.load %arg7[%c158] : memref<213xf32, #tpu.memory_space<smem>>
    %1273 = vector.extract_strided_slice %1246 {offsets = [1, 0, 0], sizes = [1, 2, 16], strides = [1, 1, 1]} : vector<3x2x16xf32> to vector<1x2x16xf32>
    %1274 = vector.shape_cast %1273 : vector<1x2x16xf32> to vector<2x16xf32>
    %1275 = vector.broadcast %1272 : f32 to vector<2x16xf32>
    %1276 = arith.mulf %1275, %1274 : vector<2x16xf32>
    %c159 = arith.constant 159 : index
    %1277 = memref.load %arg7[%c159] : memref<213xf32, #tpu.memory_space<smem>>
    %1278 = vector.extract_strided_slice %1243 {offsets = [2, 0, 0], sizes = [1, 2, 16], strides = [1, 1, 1]} : vector<3x2x16xf32> to vector<1x2x16xf32>
    %1279 = vector.shape_cast %1278 : vector<1x2x16xf32> to vector<2x16xf32>
    %1280 = vector.broadcast %1277 : f32 to vector<2x16xf32>
    %1281 = arith.mulf %1280, %1279 : vector<2x16xf32>
    %c160 = arith.constant 160 : index
    %1282 = memref.load %arg7[%c160] : memref<213xf32, #tpu.memory_space<smem>>
    %1283 = vector.extract_strided_slice %1240 {offsets = [2, 0, 0], sizes = [1, 2, 16], strides = [1, 1, 1]} : vector<3x2x16xf32> to vector<1x2x16xf32>
    %1284 = vector.shape_cast %1283 : vector<1x2x16xf32> to vector<2x16xf32>
    %1285 = vector.broadcast %1282 : f32 to vector<2x16xf32>
    %1286 = arith.mulf %1285, %1284 : vector<2x16xf32>
    %c161 = arith.constant 161 : index
    %1287 = memref.load %arg7[%c161] : memref<213xf32, #tpu.memory_space<smem>>
    %1288 = vector.extract_strided_slice %1246 {offsets = [2, 0, 0], sizes = [1, 2, 16], strides = [1, 1, 1]} : vector<3x2x16xf32> to vector<1x2x16xf32>
    %1289 = vector.shape_cast %1288 : vector<1x2x16xf32> to vector<2x16xf32>
    %1290 = vector.broadcast %1287 : f32 to vector<2x16xf32>
    %1291 = arith.mulf %1290, %1289 : vector<2x16xf32>
    %1292 = arith.addf %1251, %1256 : vector<2x16xf32>
    %1293 = arith.addf %1261, %1266 : vector<2x16xf32>
    %1294 = arith.addf %1271, %1276 : vector<2x16xf32>
    %1295 = arith.addf %1281, %1286 : vector<2x16xf32>
    %1296 = arith.addf %1292, %1293 : vector<2x16xf32>
    %1297 = arith.addf %1294, %1295 : vector<2x16xf32>
    %1298 = arith.addf %1296, %1297 : vector<2x16xf32>
    %1299 = arith.addf %1298, %1291 : vector<2x16xf32>
    %c180 = arith.constant 180 : index
    %1300 = memref.load %arg7[%c180] : memref<213xf32, #tpu.memory_space<smem>>
    %1301 = vector.broadcast %1300 : f32 to vector<2x16xf32>
    %1302 = arith.addf %1299, %1301 : vector<2x16xf32>
    %c162 = arith.constant 162 : index
    %1303 = memref.load %arg7[%c162] : memref<213xf32, #tpu.memory_space<smem>>
    %1304 = vector.extract_strided_slice %1243 {offsets = [0, 0, 0], sizes = [1, 2, 16], strides = [1, 1, 1]} : vector<3x2x16xf32> to vector<1x2x16xf32>
    %1305 = vector.shape_cast %1304 : vector<1x2x16xf32> to vector<2x16xf32>
    %1306 = vector.broadcast %1303 : f32 to vector<2x16xf32>
    %1307 = arith.mulf %1306, %1305 : vector<2x16xf32>
    %c163 = arith.constant 163 : index
    %1308 = memref.load %arg7[%c163] : memref<213xf32, #tpu.memory_space<smem>>
    %1309 = vector.extract_strided_slice %1240 {offsets = [0, 0, 0], sizes = [1, 2, 16], strides = [1, 1, 1]} : vector<3x2x16xf32> to vector<1x2x16xf32>
    %1310 = vector.shape_cast %1309 : vector<1x2x16xf32> to vector<2x16xf32>
    %1311 = vector.broadcast %1308 : f32 to vector<2x16xf32>
    %1312 = arith.mulf %1311, %1310 : vector<2x16xf32>
    %c164 = arith.constant 164 : index
    %1313 = memref.load %arg7[%c164] : memref<213xf32, #tpu.memory_space<smem>>
    %1314 = vector.extract_strided_slice %1246 {offsets = [0, 0, 0], sizes = [1, 2, 16], strides = [1, 1, 1]} : vector<3x2x16xf32> to vector<1x2x16xf32>
    %1315 = vector.shape_cast %1314 : vector<1x2x16xf32> to vector<2x16xf32>
    %1316 = vector.broadcast %1313 : f32 to vector<2x16xf32>
    %1317 = arith.mulf %1316, %1315 : vector<2x16xf32>
    %c165 = arith.constant 165 : index
    %1318 = memref.load %arg7[%c165] : memref<213xf32, #tpu.memory_space<smem>>
    %1319 = vector.extract_strided_slice %1243 {offsets = [1, 0, 0], sizes = [1, 2, 16], strides = [1, 1, 1]} : vector<3x2x16xf32> to vector<1x2x16xf32>
    %1320 = vector.shape_cast %1319 : vector<1x2x16xf32> to vector<2x16xf32>
    %1321 = vector.broadcast %1318 : f32 to vector<2x16xf32>
    %1322 = arith.mulf %1321, %1320 : vector<2x16xf32>
    %c166 = arith.constant 166 : index
    %1323 = memref.load %arg7[%c166] : memref<213xf32, #tpu.memory_space<smem>>
    %1324 = vector.extract_strided_slice %1240 {offsets = [1, 0, 0], sizes = [1, 2, 16], strides = [1, 1, 1]} : vector<3x2x16xf32> to vector<1x2x16xf32>
    %1325 = vector.shape_cast %1324 : vector<1x2x16xf32> to vector<2x16xf32>
    %1326 = vector.broadcast %1323 : f32 to vector<2x16xf32>
    %1327 = arith.mulf %1326, %1325 : vector<2x16xf32>
    %c167 = arith.constant 167 : index
    %1328 = memref.load %arg7[%c167] : memref<213xf32, #tpu.memory_space<smem>>
    %1329 = vector.extract_strided_slice %1246 {offsets = [1, 0, 0], sizes = [1, 2, 16], strides = [1, 1, 1]} : vector<3x2x16xf32> to vector<1x2x16xf32>
    %1330 = vector.shape_cast %1329 : vector<1x2x16xf32> to vector<2x16xf32>
    %1331 = vector.broadcast %1328 : f32 to vector<2x16xf32>
    %1332 = arith.mulf %1331, %1330 : vector<2x16xf32>
    %c168 = arith.constant 168 : index
    %1333 = memref.load %arg7[%c168] : memref<213xf32, #tpu.memory_space<smem>>
    %1334 = vector.extract_strided_slice %1243 {offsets = [2, 0, 0], sizes = [1, 2, 16], strides = [1, 1, 1]} : vector<3x2x16xf32> to vector<1x2x16xf32>
    %1335 = vector.shape_cast %1334 : vector<1x2x16xf32> to vector<2x16xf32>
    %1336 = vector.broadcast %1333 : f32 to vector<2x16xf32>
    %1337 = arith.mulf %1336, %1335 : vector<2x16xf32>
    %c169 = arith.constant 169 : index
    %1338 = memref.load %arg7[%c169] : memref<213xf32, #tpu.memory_space<smem>>
    %1339 = vector.extract_strided_slice %1240 {offsets = [2, 0, 0], sizes = [1, 2, 16], strides = [1, 1, 1]} : vector<3x2x16xf32> to vector<1x2x16xf32>
    %1340 = vector.shape_cast %1339 : vector<1x2x16xf32> to vector<2x16xf32>
    %1341 = vector.broadcast %1338 : f32 to vector<2x16xf32>
    %1342 = arith.mulf %1341, %1340 : vector<2x16xf32>
    %c170 = arith.constant 170 : index
    %1343 = memref.load %arg7[%c170] : memref<213xf32, #tpu.memory_space<smem>>
    %1344 = vector.extract_strided_slice %1246 {offsets = [2, 0, 0], sizes = [1, 2, 16], strides = [1, 1, 1]} : vector<3x2x16xf32> to vector<1x2x16xf32>
    %1345 = vector.shape_cast %1344 : vector<1x2x16xf32> to vector<2x16xf32>
    %1346 = vector.broadcast %1343 : f32 to vector<2x16xf32>
    %1347 = arith.mulf %1346, %1345 : vector<2x16xf32>
    %1348 = arith.addf %1307, %1312 : vector<2x16xf32>
    %1349 = arith.addf %1317, %1322 : vector<2x16xf32>
    %1350 = arith.addf %1327, %1332 : vector<2x16xf32>
    %1351 = arith.addf %1337, %1342 : vector<2x16xf32>
    %1352 = arith.addf %1348, %1349 : vector<2x16xf32>
    %1353 = arith.addf %1350, %1351 : vector<2x16xf32>
    %1354 = arith.addf %1352, %1353 : vector<2x16xf32>
    %1355 = arith.addf %1354, %1347 : vector<2x16xf32>
    %c181 = arith.constant 181 : index
    %1356 = memref.load %arg7[%c181] : memref<213xf32, #tpu.memory_space<smem>>
    %1357 = vector.broadcast %1356 : f32 to vector<2x16xf32>
    %1358 = arith.addf %1355, %1357 : vector<2x16xf32>
    %c171 = arith.constant 171 : index
    %1359 = memref.load %arg7[%c171] : memref<213xf32, #tpu.memory_space<smem>>
    %1360 = vector.extract_strided_slice %1243 {offsets = [0, 0, 0], sizes = [1, 2, 16], strides = [1, 1, 1]} : vector<3x2x16xf32> to vector<1x2x16xf32>
    %1361 = vector.shape_cast %1360 : vector<1x2x16xf32> to vector<2x16xf32>
    %1362 = vector.broadcast %1359 : f32 to vector<2x16xf32>
    %1363 = arith.mulf %1362, %1361 : vector<2x16xf32>
    %c172 = arith.constant 172 : index
    %1364 = memref.load %arg7[%c172] : memref<213xf32, #tpu.memory_space<smem>>
    %1365 = vector.extract_strided_slice %1240 {offsets = [0, 0, 0], sizes = [1, 2, 16], strides = [1, 1, 1]} : vector<3x2x16xf32> to vector<1x2x16xf32>
    %1366 = vector.shape_cast %1365 : vector<1x2x16xf32> to vector<2x16xf32>
    %1367 = vector.broadcast %1364 : f32 to vector<2x16xf32>
    %1368 = arith.mulf %1367, %1366 : vector<2x16xf32>
    %c173 = arith.constant 173 : index
    %1369 = memref.load %arg7[%c173] : memref<213xf32, #tpu.memory_space<smem>>
    %1370 = vector.extract_strided_slice %1246 {offsets = [0, 0, 0], sizes = [1, 2, 16], strides = [1, 1, 1]} : vector<3x2x16xf32> to vector<1x2x16xf32>
    %1371 = vector.shape_cast %1370 : vector<1x2x16xf32> to vector<2x16xf32>
    %1372 = vector.broadcast %1369 : f32 to vector<2x16xf32>
    %1373 = arith.mulf %1372, %1371 : vector<2x16xf32>
    %c174 = arith.constant 174 : index
    %1374 = memref.load %arg7[%c174] : memref<213xf32, #tpu.memory_space<smem>>
    %1375 = vector.extract_strided_slice %1243 {offsets = [1, 0, 0], sizes = [1, 2, 16], strides = [1, 1, 1]} : vector<3x2x16xf32> to vector<1x2x16xf32>
    %1376 = vector.shape_cast %1375 : vector<1x2x16xf32> to vector<2x16xf32>
    %1377 = vector.broadcast %1374 : f32 to vector<2x16xf32>
    %1378 = arith.mulf %1377, %1376 : vector<2x16xf32>
    %c175 = arith.constant 175 : index
    %1379 = memref.load %arg7[%c175] : memref<213xf32, #tpu.memory_space<smem>>
    %1380 = vector.extract_strided_slice %1240 {offsets = [1, 0, 0], sizes = [1, 2, 16], strides = [1, 1, 1]} : vector<3x2x16xf32> to vector<1x2x16xf32>
    %1381 = vector.shape_cast %1380 : vector<1x2x16xf32> to vector<2x16xf32>
    %1382 = vector.broadcast %1379 : f32 to vector<2x16xf32>
    %1383 = arith.mulf %1382, %1381 : vector<2x16xf32>
    %c176 = arith.constant 176 : index
    %1384 = memref.load %arg7[%c176] : memref<213xf32, #tpu.memory_space<smem>>
    %1385 = vector.extract_strided_slice %1246 {offsets = [1, 0, 0], sizes = [1, 2, 16], strides = [1, 1, 1]} : vector<3x2x16xf32> to vector<1x2x16xf32>
    %1386 = vector.shape_cast %1385 : vector<1x2x16xf32> to vector<2x16xf32>
    %1387 = vector.broadcast %1384 : f32 to vector<2x16xf32>
    %1388 = arith.mulf %1387, %1386 : vector<2x16xf32>
    %c177 = arith.constant 177 : index
    %1389 = memref.load %arg7[%c177] : memref<213xf32, #tpu.memory_space<smem>>
    %1390 = vector.extract_strided_slice %1243 {offsets = [2, 0, 0], sizes = [1, 2, 16], strides = [1, 1, 1]} : vector<3x2x16xf32> to vector<1x2x16xf32>
    %1391 = vector.shape_cast %1390 : vector<1x2x16xf32> to vector<2x16xf32>
    %1392 = vector.broadcast %1389 : f32 to vector<2x16xf32>
    %1393 = arith.mulf %1392, %1391 : vector<2x16xf32>
    %c178 = arith.constant 178 : index
    %1394 = memref.load %arg7[%c178] : memref<213xf32, #tpu.memory_space<smem>>
    %1395 = vector.extract_strided_slice %1240 {offsets = [2, 0, 0], sizes = [1, 2, 16], strides = [1, 1, 1]} : vector<3x2x16xf32> to vector<1x2x16xf32>
    %1396 = vector.shape_cast %1395 : vector<1x2x16xf32> to vector<2x16xf32>
    %1397 = vector.broadcast %1394 : f32 to vector<2x16xf32>
    %1398 = arith.mulf %1397, %1396 : vector<2x16xf32>
    %c179 = arith.constant 179 : index
    %1399 = memref.load %arg7[%c179] : memref<213xf32, #tpu.memory_space<smem>>
    %1400 = vector.extract_strided_slice %1246 {offsets = [2, 0, 0], sizes = [1, 2, 16], strides = [1, 1, 1]} : vector<3x2x16xf32> to vector<1x2x16xf32>
    %1401 = vector.shape_cast %1400 : vector<1x2x16xf32> to vector<2x16xf32>
    %1402 = vector.broadcast %1399 : f32 to vector<2x16xf32>
    %1403 = arith.mulf %1402, %1401 : vector<2x16xf32>
    %1404 = arith.addf %1363, %1368 : vector<2x16xf32>
    %1405 = arith.addf %1373, %1378 : vector<2x16xf32>
    %1406 = arith.addf %1383, %1388 : vector<2x16xf32>
    %1407 = arith.addf %1393, %1398 : vector<2x16xf32>
    %1408 = arith.addf %1404, %1405 : vector<2x16xf32>
    %1409 = arith.addf %1406, %1407 : vector<2x16xf32>
    %1410 = arith.addf %1408, %1409 : vector<2x16xf32>
    %1411 = arith.addf %1410, %1403 : vector<2x16xf32>
    %c182 = arith.constant 182 : index
    %1412 = memref.load %arg7[%c182] : memref<213xf32, #tpu.memory_space<smem>>
    %1413 = vector.broadcast %1412 : f32 to vector<2x16xf32>
    %1414 = arith.addf %1411, %1413 : vector<2x16xf32>
    %cst_87 = arith.constant 0.000000e+00 : f32
    %1415 = vector.broadcast %cst_87 : f32 to vector<2x16xf32>
    %1416 = arith.maximumf %1302, %1415 : vector<2x16xf32>
    %cst_88 = arith.constant 0.000000e+00 : f32
    %1417 = vector.broadcast %cst_88 : f32 to vector<2x16xf32>
    %1418 = arith.maximumf %1358, %1417 : vector<2x16xf32>
    %cst_89 = arith.constant 0.000000e+00 : f32
    %1419 = vector.broadcast %cst_89 : f32 to vector<2x16xf32>
    %1420 = arith.maximumf %1414, %1419 : vector<2x16xf32>
    %1421 = vector.shape_cast %1416 : vector<2x16xf32> to vector<1x2x16xf32>
    %1422 = vector.shape_cast %1418 : vector<2x16xf32> to vector<1x2x16xf32>
    %1423 = vector.shape_cast %1420 : vector<2x16xf32> to vector<1x2x16xf32>
    %1424 = tpu.concatenate %1421, %1422, %1423 in 0 : vector<1x2x16xf32>, vector<1x2x16xf32>, vector<1x2x16xf32> -> vector<3x2x16xf32>
    %cst_90 = arith.constant 0.000000e+00 : f32
    %1425 = vector.broadcast %cst_90 : f32 to vector<3x2x2xf32>
    %1426 = vector.extract_strided_slice %1424 {offsets = [0, 0, 0], sizes = [3, 2, 14], strides = [1, 1, 1]} : vector<3x2x16xf32> to vector<3x2x14xf32>
    %1427 = tpu.concatenate %1425, %1426 in 2 : vector<3x2x2xf32>, vector<3x2x14xf32> -> vector<3x2x16xf32>
    %cst_91 = arith.constant 0.000000e+00 : f32
    %1428 = vector.broadcast %cst_91 : f32 to vector<3x2x2xf32>
    %1429 = vector.extract_strided_slice %1424 {offsets = [0, 0, 2], sizes = [3, 2, 14], strides = [1, 1, 1]} : vector<3x2x16xf32> to vector<3x2x14xf32>
    %1430 = tpu.concatenate %1429, %1428 in 2 : vector<3x2x14xf32>, vector<3x2x2xf32> -> vector<3x2x16xf32>
    %c183 = arith.constant 183 : index
    %1431 = memref.load %arg7[%c183] : memref<213xf32, #tpu.memory_space<smem>>
    %1432 = vector.extract_strided_slice %1427 {offsets = [0, 0, 0], sizes = [1, 2, 16], strides = [1, 1, 1]} : vector<3x2x16xf32> to vector<1x2x16xf32>
    %1433 = vector.shape_cast %1432 : vector<1x2x16xf32> to vector<2x16xf32>
    %1434 = vector.broadcast %1431 : f32 to vector<2x16xf32>
    %1435 = arith.mulf %1434, %1433 : vector<2x16xf32>
    %c184 = arith.constant 184 : index
    %1436 = memref.load %arg7[%c184] : memref<213xf32, #tpu.memory_space<smem>>
    %1437 = vector.extract_strided_slice %1424 {offsets = [0, 0, 0], sizes = [1, 2, 16], strides = [1, 1, 1]} : vector<3x2x16xf32> to vector<1x2x16xf32>
    %1438 = vector.shape_cast %1437 : vector<1x2x16xf32> to vector<2x16xf32>
    %1439 = vector.broadcast %1436 : f32 to vector<2x16xf32>
    %1440 = arith.mulf %1439, %1438 : vector<2x16xf32>
    %c185 = arith.constant 185 : index
    %1441 = memref.load %arg7[%c185] : memref<213xf32, #tpu.memory_space<smem>>
    %1442 = vector.extract_strided_slice %1430 {offsets = [0, 0, 0], sizes = [1, 2, 16], strides = [1, 1, 1]} : vector<3x2x16xf32> to vector<1x2x16xf32>
    %1443 = vector.shape_cast %1442 : vector<1x2x16xf32> to vector<2x16xf32>
    %1444 = vector.broadcast %1441 : f32 to vector<2x16xf32>
    %1445 = arith.mulf %1444, %1443 : vector<2x16xf32>
    %c186 = arith.constant 186 : index
    %1446 = memref.load %arg7[%c186] : memref<213xf32, #tpu.memory_space<smem>>
    %1447 = vector.extract_strided_slice %1427 {offsets = [1, 0, 0], sizes = [1, 2, 16], strides = [1, 1, 1]} : vector<3x2x16xf32> to vector<1x2x16xf32>
    %1448 = vector.shape_cast %1447 : vector<1x2x16xf32> to vector<2x16xf32>
    %1449 = vector.broadcast %1446 : f32 to vector<2x16xf32>
    %1450 = arith.mulf %1449, %1448 : vector<2x16xf32>
    %c187 = arith.constant 187 : index
    %1451 = memref.load %arg7[%c187] : memref<213xf32, #tpu.memory_space<smem>>
    %1452 = vector.extract_strided_slice %1424 {offsets = [1, 0, 0], sizes = [1, 2, 16], strides = [1, 1, 1]} : vector<3x2x16xf32> to vector<1x2x16xf32>
    %1453 = vector.shape_cast %1452 : vector<1x2x16xf32> to vector<2x16xf32>
    %1454 = vector.broadcast %1451 : f32 to vector<2x16xf32>
    %1455 = arith.mulf %1454, %1453 : vector<2x16xf32>
    %c188 = arith.constant 188 : index
    %1456 = memref.load %arg7[%c188] : memref<213xf32, #tpu.memory_space<smem>>
    %1457 = vector.extract_strided_slice %1430 {offsets = [1, 0, 0], sizes = [1, 2, 16], strides = [1, 1, 1]} : vector<3x2x16xf32> to vector<1x2x16xf32>
    %1458 = vector.shape_cast %1457 : vector<1x2x16xf32> to vector<2x16xf32>
    %1459 = vector.broadcast %1456 : f32 to vector<2x16xf32>
    %1460 = arith.mulf %1459, %1458 : vector<2x16xf32>
    %c189 = arith.constant 189 : index
    %1461 = memref.load %arg7[%c189] : memref<213xf32, #tpu.memory_space<smem>>
    %1462 = vector.extract_strided_slice %1427 {offsets = [2, 0, 0], sizes = [1, 2, 16], strides = [1, 1, 1]} : vector<3x2x16xf32> to vector<1x2x16xf32>
    %1463 = vector.shape_cast %1462 : vector<1x2x16xf32> to vector<2x16xf32>
    %1464 = vector.broadcast %1461 : f32 to vector<2x16xf32>
    %1465 = arith.mulf %1464, %1463 : vector<2x16xf32>
    %c190 = arith.constant 190 : index
    %1466 = memref.load %arg7[%c190] : memref<213xf32, #tpu.memory_space<smem>>
    %1467 = vector.extract_strided_slice %1424 {offsets = [2, 0, 0], sizes = [1, 2, 16], strides = [1, 1, 1]} : vector<3x2x16xf32> to vector<1x2x16xf32>
    %1468 = vector.shape_cast %1467 : vector<1x2x16xf32> to vector<2x16xf32>
    %1469 = vector.broadcast %1466 : f32 to vector<2x16xf32>
    %1470 = arith.mulf %1469, %1468 : vector<2x16xf32>
    %c191 = arith.constant 191 : index
    %1471 = memref.load %arg7[%c191] : memref<213xf32, #tpu.memory_space<smem>>
    %1472 = vector.extract_strided_slice %1430 {offsets = [2, 0, 0], sizes = [1, 2, 16], strides = [1, 1, 1]} : vector<3x2x16xf32> to vector<1x2x16xf32>
    %1473 = vector.shape_cast %1472 : vector<1x2x16xf32> to vector<2x16xf32>
    %1474 = vector.broadcast %1471 : f32 to vector<2x16xf32>
    %1475 = arith.mulf %1474, %1473 : vector<2x16xf32>
    %1476 = arith.addf %1435, %1440 : vector<2x16xf32>
    %1477 = arith.addf %1445, %1450 : vector<2x16xf32>
    %1478 = arith.addf %1455, %1460 : vector<2x16xf32>
    %1479 = arith.addf %1465, %1470 : vector<2x16xf32>
    %1480 = arith.addf %1476, %1477 : vector<2x16xf32>
    %1481 = arith.addf %1478, %1479 : vector<2x16xf32>
    %1482 = arith.addf %1480, %1481 : vector<2x16xf32>
    %1483 = arith.addf %1482, %1475 : vector<2x16xf32>
    %c210 = arith.constant 210 : index
    %1484 = memref.load %arg7[%c210] : memref<213xf32, #tpu.memory_space<smem>>
    %1485 = vector.broadcast %1484 : f32 to vector<2x16xf32>
    %1486 = arith.addf %1483, %1485 : vector<2x16xf32>
    %c192 = arith.constant 192 : index
    %1487 = memref.load %arg7[%c192] : memref<213xf32, #tpu.memory_space<smem>>
    %1488 = vector.extract_strided_slice %1427 {offsets = [0, 0, 0], sizes = [1, 2, 16], strides = [1, 1, 1]} : vector<3x2x16xf32> to vector<1x2x16xf32>
    %1489 = vector.shape_cast %1488 : vector<1x2x16xf32> to vector<2x16xf32>
    %1490 = vector.broadcast %1487 : f32 to vector<2x16xf32>
    %1491 = arith.mulf %1490, %1489 : vector<2x16xf32>
    %c193 = arith.constant 193 : index
    %1492 = memref.load %arg7[%c193] : memref<213xf32, #tpu.memory_space<smem>>
    %1493 = vector.extract_strided_slice %1424 {offsets = [0, 0, 0], sizes = [1, 2, 16], strides = [1, 1, 1]} : vector<3x2x16xf32> to vector<1x2x16xf32>
    %1494 = vector.shape_cast %1493 : vector<1x2x16xf32> to vector<2x16xf32>
    %1495 = vector.broadcast %1492 : f32 to vector<2x16xf32>
    %1496 = arith.mulf %1495, %1494 : vector<2x16xf32>
    %c194 = arith.constant 194 : index
    %1497 = memref.load %arg7[%c194] : memref<213xf32, #tpu.memory_space<smem>>
    %1498 = vector.extract_strided_slice %1430 {offsets = [0, 0, 0], sizes = [1, 2, 16], strides = [1, 1, 1]} : vector<3x2x16xf32> to vector<1x2x16xf32>
    %1499 = vector.shape_cast %1498 : vector<1x2x16xf32> to vector<2x16xf32>
    %1500 = vector.broadcast %1497 : f32 to vector<2x16xf32>
    %1501 = arith.mulf %1500, %1499 : vector<2x16xf32>
    %c195 = arith.constant 195 : index
    %1502 = memref.load %arg7[%c195] : memref<213xf32, #tpu.memory_space<smem>>
    %1503 = vector.extract_strided_slice %1427 {offsets = [1, 0, 0], sizes = [1, 2, 16], strides = [1, 1, 1]} : vector<3x2x16xf32> to vector<1x2x16xf32>
    %1504 = vector.shape_cast %1503 : vector<1x2x16xf32> to vector<2x16xf32>
    %1505 = vector.broadcast %1502 : f32 to vector<2x16xf32>
    %1506 = arith.mulf %1505, %1504 : vector<2x16xf32>
    %c196 = arith.constant 196 : index
    %1507 = memref.load %arg7[%c196] : memref<213xf32, #tpu.memory_space<smem>>
    %1508 = vector.extract_strided_slice %1424 {offsets = [1, 0, 0], sizes = [1, 2, 16], strides = [1, 1, 1]} : vector<3x2x16xf32> to vector<1x2x16xf32>
    %1509 = vector.shape_cast %1508 : vector<1x2x16xf32> to vector<2x16xf32>
    %1510 = vector.broadcast %1507 : f32 to vector<2x16xf32>
    %1511 = arith.mulf %1510, %1509 : vector<2x16xf32>
    %c197 = arith.constant 197 : index
    %1512 = memref.load %arg7[%c197] : memref<213xf32, #tpu.memory_space<smem>>
    %1513 = vector.extract_strided_slice %1430 {offsets = [1, 0, 0], sizes = [1, 2, 16], strides = [1, 1, 1]} : vector<3x2x16xf32> to vector<1x2x16xf32>
    %1514 = vector.shape_cast %1513 : vector<1x2x16xf32> to vector<2x16xf32>
    %1515 = vector.broadcast %1512 : f32 to vector<2x16xf32>
    %1516 = arith.mulf %1515, %1514 : vector<2x16xf32>
    %c198 = arith.constant 198 : index
    %1517 = memref.load %arg7[%c198] : memref<213xf32, #tpu.memory_space<smem>>
    %1518 = vector.extract_strided_slice %1427 {offsets = [2, 0, 0], sizes = [1, 2, 16], strides = [1, 1, 1]} : vector<3x2x16xf32> to vector<1x2x16xf32>
    %1519 = vector.shape_cast %1518 : vector<1x2x16xf32> to vector<2x16xf32>
    %1520 = vector.broadcast %1517 : f32 to vector<2x16xf32>
    %1521 = arith.mulf %1520, %1519 : vector<2x16xf32>
    %c199 = arith.constant 199 : index
    %1522 = memref.load %arg7[%c199] : memref<213xf32, #tpu.memory_space<smem>>
    %1523 = vector.extract_strided_slice %1424 {offsets = [2, 0, 0], sizes = [1, 2, 16], strides = [1, 1, 1]} : vector<3x2x16xf32> to vector<1x2x16xf32>
    %1524 = vector.shape_cast %1523 : vector<1x2x16xf32> to vector<2x16xf32>
    %1525 = vector.broadcast %1522 : f32 to vector<2x16xf32>
    %1526 = arith.mulf %1525, %1524 : vector<2x16xf32>
    %c200 = arith.constant 200 : index
    %1527 = memref.load %arg7[%c200] : memref<213xf32, #tpu.memory_space<smem>>
    %1528 = vector.extract_strided_slice %1430 {offsets = [2, 0, 0], sizes = [1, 2, 16], strides = [1, 1, 1]} : vector<3x2x16xf32> to vector<1x2x16xf32>
    %1529 = vector.shape_cast %1528 : vector<1x2x16xf32> to vector<2x16xf32>
    %1530 = vector.broadcast %1527 : f32 to vector<2x16xf32>
    %1531 = arith.mulf %1530, %1529 : vector<2x16xf32>
    %1532 = arith.addf %1491, %1496 : vector<2x16xf32>
    %1533 = arith.addf %1501, %1506 : vector<2x16xf32>
    %1534 = arith.addf %1511, %1516 : vector<2x16xf32>
    %1535 = arith.addf %1521, %1526 : vector<2x16xf32>
    %1536 = arith.addf %1532, %1533 : vector<2x16xf32>
    %1537 = arith.addf %1534, %1535 : vector<2x16xf32>
    %1538 = arith.addf %1536, %1537 : vector<2x16xf32>
    %1539 = arith.addf %1538, %1531 : vector<2x16xf32>
    %c211 = arith.constant 211 : index
    %1540 = memref.load %arg7[%c211] : memref<213xf32, #tpu.memory_space<smem>>
    %1541 = vector.broadcast %1540 : f32 to vector<2x16xf32>
    %1542 = arith.addf %1539, %1541 : vector<2x16xf32>
    %c201 = arith.constant 201 : index
    %1543 = memref.load %arg7[%c201] : memref<213xf32, #tpu.memory_space<smem>>
    %1544 = vector.extract_strided_slice %1427 {offsets = [0, 0, 0], sizes = [1, 2, 16], strides = [1, 1, 1]} : vector<3x2x16xf32> to vector<1x2x16xf32>
    %1545 = vector.shape_cast %1544 : vector<1x2x16xf32> to vector<2x16xf32>
    %1546 = vector.broadcast %1543 : f32 to vector<2x16xf32>
    %1547 = arith.mulf %1546, %1545 : vector<2x16xf32>
    %c202 = arith.constant 202 : index
    %1548 = memref.load %arg7[%c202] : memref<213xf32, #tpu.memory_space<smem>>
    %1549 = vector.extract_strided_slice %1424 {offsets = [0, 0, 0], sizes = [1, 2, 16], strides = [1, 1, 1]} : vector<3x2x16xf32> to vector<1x2x16xf32>
    %1550 = vector.shape_cast %1549 : vector<1x2x16xf32> to vector<2x16xf32>
    %1551 = vector.broadcast %1548 : f32 to vector<2x16xf32>
    %1552 = arith.mulf %1551, %1550 : vector<2x16xf32>
    %c203 = arith.constant 203 : index
    %1553 = memref.load %arg7[%c203] : memref<213xf32, #tpu.memory_space<smem>>
    %1554 = vector.extract_strided_slice %1430 {offsets = [0, 0, 0], sizes = [1, 2, 16], strides = [1, 1, 1]} : vector<3x2x16xf32> to vector<1x2x16xf32>
    %1555 = vector.shape_cast %1554 : vector<1x2x16xf32> to vector<2x16xf32>
    %1556 = vector.broadcast %1553 : f32 to vector<2x16xf32>
    %1557 = arith.mulf %1556, %1555 : vector<2x16xf32>
    %c204 = arith.constant 204 : index
    %1558 = memref.load %arg7[%c204] : memref<213xf32, #tpu.memory_space<smem>>
    %1559 = vector.extract_strided_slice %1427 {offsets = [1, 0, 0], sizes = [1, 2, 16], strides = [1, 1, 1]} : vector<3x2x16xf32> to vector<1x2x16xf32>
    %1560 = vector.shape_cast %1559 : vector<1x2x16xf32> to vector<2x16xf32>
    %1561 = vector.broadcast %1558 : f32 to vector<2x16xf32>
    %1562 = arith.mulf %1561, %1560 : vector<2x16xf32>
    %c205 = arith.constant 205 : index
    %1563 = memref.load %arg7[%c205] : memref<213xf32, #tpu.memory_space<smem>>
    %1564 = vector.extract_strided_slice %1424 {offsets = [1, 0, 0], sizes = [1, 2, 16], strides = [1, 1, 1]} : vector<3x2x16xf32> to vector<1x2x16xf32>
    %1565 = vector.shape_cast %1564 : vector<1x2x16xf32> to vector<2x16xf32>
    %1566 = vector.broadcast %1563 : f32 to vector<2x16xf32>
    %1567 = arith.mulf %1566, %1565 : vector<2x16xf32>
    %c206 = arith.constant 206 : index
    %1568 = memref.load %arg7[%c206] : memref<213xf32, #tpu.memory_space<smem>>
    %1569 = vector.extract_strided_slice %1430 {offsets = [1, 0, 0], sizes = [1, 2, 16], strides = [1, 1, 1]} : vector<3x2x16xf32> to vector<1x2x16xf32>
    %1570 = vector.shape_cast %1569 : vector<1x2x16xf32> to vector<2x16xf32>
    %1571 = vector.broadcast %1568 : f32 to vector<2x16xf32>
    %1572 = arith.mulf %1571, %1570 : vector<2x16xf32>
    %c207 = arith.constant 207 : index
    %1573 = memref.load %arg7[%c207] : memref<213xf32, #tpu.memory_space<smem>>
    %1574 = vector.extract_strided_slice %1427 {offsets = [2, 0, 0], sizes = [1, 2, 16], strides = [1, 1, 1]} : vector<3x2x16xf32> to vector<1x2x16xf32>
    %1575 = vector.shape_cast %1574 : vector<1x2x16xf32> to vector<2x16xf32>
    %1576 = vector.broadcast %1573 : f32 to vector<2x16xf32>
    %1577 = arith.mulf %1576, %1575 : vector<2x16xf32>
    %c208 = arith.constant 208 : index
    %1578 = memref.load %arg7[%c208] : memref<213xf32, #tpu.memory_space<smem>>
    %1579 = vector.extract_strided_slice %1424 {offsets = [2, 0, 0], sizes = [1, 2, 16], strides = [1, 1, 1]} : vector<3x2x16xf32> to vector<1x2x16xf32>
    %1580 = vector.shape_cast %1579 : vector<1x2x16xf32> to vector<2x16xf32>
    %1581 = vector.broadcast %1578 : f32 to vector<2x16xf32>
    %1582 = arith.mulf %1581, %1580 : vector<2x16xf32>
    %c209 = arith.constant 209 : index
    %1583 = memref.load %arg7[%c209] : memref<213xf32, #tpu.memory_space<smem>>
    %1584 = vector.extract_strided_slice %1430 {offsets = [2, 0, 0], sizes = [1, 2, 16], strides = [1, 1, 1]} : vector<3x2x16xf32> to vector<1x2x16xf32>
    %1585 = vector.shape_cast %1584 : vector<1x2x16xf32> to vector<2x16xf32>
    %1586 = vector.broadcast %1583 : f32 to vector<2x16xf32>
    %1587 = arith.mulf %1586, %1585 : vector<2x16xf32>
    %1588 = arith.addf %1547, %1552 : vector<2x16xf32>
    %1589 = arith.addf %1557, %1562 : vector<2x16xf32>
    %1590 = arith.addf %1567, %1572 : vector<2x16xf32>
    %1591 = arith.addf %1577, %1582 : vector<2x16xf32>
    %1592 = arith.addf %1588, %1589 : vector<2x16xf32>
    %1593 = arith.addf %1590, %1591 : vector<2x16xf32>
    %1594 = arith.addf %1592, %1593 : vector<2x16xf32>
    %1595 = arith.addf %1594, %1587 : vector<2x16xf32>
    %c212 = arith.constant 212 : index
    %1596 = memref.load %arg7[%c212] : memref<213xf32, #tpu.memory_space<smem>>
    %1597 = vector.broadcast %1596 : f32 to vector<2x16xf32>
    %1598 = arith.addf %1595, %1597 : vector<2x16xf32>
    %1599 = arith.addf %1486, %1230 : vector<2x16xf32>
    %cst_92 = arith.constant 0.000000e+00 : f32
    %1600 = vector.broadcast %cst_92 : f32 to vector<2x16xf32>
    %1601 = arith.maximumf %1599, %1600 : vector<2x16xf32>
    %1602 = arith.addf %1542, %1233 : vector<2x16xf32>
    %cst_93 = arith.constant 0.000000e+00 : f32
    %1603 = vector.broadcast %cst_93 : f32 to vector<2x16xf32>
    %1604 = arith.maximumf %1602, %1603 : vector<2x16xf32>
    %1605 = arith.addf %1598, %1236 : vector<2x16xf32>
    %cst_94 = arith.constant 0.000000e+00 : f32
    %1606 = vector.broadcast %cst_94 : f32 to vector<2x16xf32>
    %1607 = arith.maximumf %1605, %1606 : vector<2x16xf32>
    %1608 = tpu.iota {dimensions = array<i32: 1>} : vector<1x16xi32>
    %c2_i32_95 = arith.constant 2 : i32
    %c0_i32_96 = arith.constant 0 : i32
    %1609 = arith.cmpi eq, %c2_i32_95, %c0_i32_96 : i32
    %c1_i32_97 = arith.constant 1 : i32
    %1610 = arith.select %1609, %c1_i32_97, %c2_i32_95 : i32
    %1611 = vector.broadcast %1610 : i32 to vector<1x16xi32>
    %1612 = arith.remsi %1608, %1611 : vector<1x16xi32>
    %c0_i32_98 = arith.constant 0 : i32
    %1613 = vector.broadcast %c0_i32_98 : i32 to vector<1x16xi32>
    %1614 = arith.cmpi ne, %1612, %1613 : vector<1x16xi32>
    %c0_i32_99 = arith.constant 0 : i32
    %1615 = vector.broadcast %c0_i32_99 : i32 to vector<1x16xi32>
    %1616 = arith.cmpi slt, %1612, %1615 : vector<1x16xi32>
    %c0_i32_100 = arith.constant 0 : i32
    %1617 = arith.cmpi slt, %1610, %c0_i32_100 : i32
    %1618 = vector.broadcast %1617 : i1 to vector<1x16xi1>
    %1619 = vector.broadcast %1618 : vector<1x16xi1> to vector<1x16xi1>
    %1620 = arith.xori %1616, %1619 : vector<1x16xi1>
    %1621 = arith.andi %1620, %1614 : vector<1x16xi1>
    %1622 = vector.broadcast %1610 : i32 to vector<1x16xi32>
    %1623 = arith.addi %1612, %1622 : vector<1x16xi32>
    %1624 = arith.select %1621, %1623, %1612 : vector<1x16xi1>, vector<1x16xi32>
    %c0_i32_101 = arith.constant 0 : i32
    %1625 = vector.broadcast %c0_i32_101 : i32 to vector<1x16xi32>
    %1626 = arith.cmpi eq, %1624, %1625 : vector<1x16xi32>
    %cst_102 = arith.constant 0.000000e+00 : f32
    %1627 = vector.shape_cast %1626 : vector<1x16xi1> to vector<1x16xi1>
    %1628 = vector.broadcast %1627 : vector<1x16xi1> to vector<2x16xi1>
    %1629 = vector.broadcast %cst_102 : f32 to vector<2x16xf32>
    %1630 = arith.select %1628, %1601, %1629 : vector<2x16xi1>, vector<2x16xf32>
    %cst_103 = arith.constant dense<0.000000e+00> : vector<2xf32>
    %1631 = vector.multi_reduction <add>, %1630, %cst_103 [1] : vector<2x16xf32> to vector<2xf32>
    %1632 = vector.shape_cast %1631 : vector<2xf32> to vector<2x1xf32>
    %1633 = vector.extract_strided_slice %1630 {offsets = [0, 0], sizes = [2, 1], strides = [1, 1]} : vector<2x16xf32> to vector<2x1xf32>
    %1634 = vector.extract_strided_slice %1630 {offsets = [0, 14], sizes = [2, 1], strides = [1, 1]} : vector<2x16xf32> to vector<2x1xf32>
    %1635 = arith.subf %1632, %1634 : vector<2x1xf32>
    %1636 = arith.subf %1632, %1633 : vector<2x1xf32>
    %cst_104 = arith.constant 0.000000e+00 : f32
    %1637 = vector.shape_cast %1626 : vector<1x16xi1> to vector<1x16xi1>
    %1638 = vector.broadcast %1637 : vector<1x16xi1> to vector<2x16xi1>
    %1639 = vector.broadcast %cst_104 : f32 to vector<2x16xf32>
    %1640 = arith.select %1638, %1604, %1639 : vector<2x16xi1>, vector<2x16xf32>
    %cst_105 = arith.constant dense<0.000000e+00> : vector<2xf32>
    %1641 = vector.multi_reduction <add>, %1640, %cst_105 [1] : vector<2x16xf32> to vector<2xf32>
    %1642 = vector.shape_cast %1641 : vector<2xf32> to vector<2x1xf32>
    %1643 = vector.extract_strided_slice %1640 {offsets = [0, 0], sizes = [2, 1], strides = [1, 1]} : vector<2x16xf32> to vector<2x1xf32>
    %1644 = vector.extract_strided_slice %1640 {offsets = [0, 14], sizes = [2, 1], strides = [1, 1]} : vector<2x16xf32> to vector<2x1xf32>
    %1645 = arith.subf %1642, %1644 : vector<2x1xf32>
    %1646 = arith.subf %1642, %1643 : vector<2x1xf32>
    %cst_106 = arith.constant 0.000000e+00 : f32
    %1647 = vector.shape_cast %1626 : vector<1x16xi1> to vector<1x16xi1>
    %1648 = vector.broadcast %1647 : vector<1x16xi1> to vector<2x16xi1>
    %1649 = vector.broadcast %cst_106 : f32 to vector<2x16xf32>
    %1650 = arith.select %1648, %1607, %1649 : vector<2x16xi1>, vector<2x16xf32>
    %cst_107 = arith.constant dense<0.000000e+00> : vector<2xf32>
    %1651 = vector.multi_reduction <add>, %1650, %cst_107 [1] : vector<2x16xf32> to vector<2xf32>
    %1652 = vector.shape_cast %1651 : vector<2xf32> to vector<2x1xf32>
    %1653 = vector.extract_strided_slice %1650 {offsets = [0, 0], sizes = [2, 1], strides = [1, 1]} : vector<2x16xf32> to vector<2x1xf32>
    %1654 = vector.extract_strided_slice %1650 {offsets = [0, 14], sizes = [2, 1], strides = [1, 1]} : vector<2x16xf32> to vector<2x1xf32>
    %1655 = arith.subf %1652, %1654 : vector<2x1xf32>
    %1656 = arith.subf %1652, %1653 : vector<2x1xf32>
    %1657 = tpu.concatenate %1635, %1632, %1636, %1645, %1642, %1646, %1655, %1652, %1656 in 1 : vector<2x1xf32>, vector<2x1xf32>, vector<2x1xf32>, vector<2x1xf32>, vector<2x1xf32>, vector<2x1xf32>, vector<2x1xf32>, vector<2x1xf32>, vector<2x1xf32> -> vector<2x9xf32>
    %cst_108 = arith.constant 1.250000e-01 : f32
    %1658 = vector.broadcast %cst_108 : f32 to vector<2x9xf32>
    %1659 = arith.mulf %1657, %1658 : vector<2x9xf32>
    %c0_109 = arith.constant 0 : index
    %c0_110 = arith.constant 0 : index
    %1660 = vector.load %arg5[%c0_109, %c0_110] : memref<9x46xf32, #tpu.memory_space<vmem>>, vector<9x46xf32>
    %cst_111 = arith.constant dense<0.000000e+00> : vector<2x46xf32>
    %1661 = tpu.matmul %1659, %1660, %cst_111 {dimension_numbers = #tpu.dot_dimension_numbers<[1], [0], [0], [1], [0, 0, 1, 1], [], []>} : vector<2x9xf32>, vector<9x46xf32>, vector<2x46xf32> -> vector<2x46xf32>
    %c0_112 = arith.constant 0 : index
    %c0_113 = arith.constant 0 : index
    %1662 = vector.load %arg6[%c0_112, %c0_113] : memref<1x46xf32, #tpu.memory_space<vmem>>, vector<1x46xf32>
    %1663 = vector.broadcast %1662 : vector<1x46xf32> to vector<2x46xf32>
    %1664 = arith.addf %1661, %1663 : vector<2x46xf32>
    %cst_114 = arith.constant dense<0xFF800000> : vector<2xf32>
    %1665 = vector.multi_reduction <maximumf>, %1664, %cst_114 [1] : vector<2x46xf32> to vector<2xf32>
    %1666 = vector.shape_cast %1665 : vector<2xf32> to vector<2x1xf32>
    %1667 = vector.broadcast %1666 : vector<2x1xf32> to vector<2x46xf32>
    %1668 = arith.subf %1664, %1667 : vector<2x46xf32>
    %1669 = math.exp %1668 : vector<2x46xf32>
    %cst_115 = arith.constant dense<0.000000e+00> : vector<2xf32>
    %1670 = vector.multi_reduction <add>, %1669, %cst_115 [1] : vector<2x46xf32> to vector<2xf32>
    %1671 = vector.shape_cast %1670 : vector<2xf32> to vector<2x1xf32>
    %1672 = vector.broadcast %1671 : vector<2x1xf32> to vector<2x46xf32>
    %1673 = arith.divf %1669, %1672 : vector<2x46xf32>
    %c0_116 = arith.constant 0 : index
    %c0_117 = arith.constant 0 : index
    %c0_118 = arith.constant 0 : index
    %1674 = vector.load %arg8[%c0_116, %c0_117, %c0_118] : memref<2x1x46xf32, #tpu.memory_space<vmem>>, vector<2x1x46xf32>
    %1675 = vector.shape_cast %1674 : vector<2x1x46xf32> to vector<2x46xf32>
    %1676 = vector.shape_cast %1673 : vector<2x46xf32> to vector<2x1x46xf32>
    tpu.vector_store %arg8[%c0_116, %c0_117, %c0_118], %1676 {strides = array<i32>} : memref<2x1x46xf32, #tpu.memory_space<vmem>>, vector<2x1x46xf32>,
    return
  }
  func.func @transform_0(%arg0: i32) -> (i32, i32, i32) {
    %c0_i32 = arith.constant 0 : i32
    %c0_i32_0 = arith.constant 0 : i32
    %c0_i32_1 = arith.constant 0 : i32
    return %c0_i32, %arg0, %c0_i32_0 : i32, i32, i32
  }
  func.func @transform_1(%arg0: i32) -> (i32, i32, i32) {
    %c0_i32 = arith.constant 0 : i32
    %c0_i32_0 = arith.constant 0 : i32
    %c0_i32_1 = arith.constant 0 : i32
    %c0_i32_2 = arith.constant 0 : i32
    return %c0_i32, %c0_i32_0, %c0_i32_1 : i32, i32, i32
  }
  func.func @transform_2(%arg0: i32) -> (i32, i32, i32) {
    %c0_i32 = arith.constant 0 : i32
    %c0_i32_0 = arith.constant 0 : i32
    %c0_i32_1 = arith.constant 0 : i32
    %c0_i32_2 = arith.constant 0 : i32
    return %c0_i32, %c0_i32_0, %c0_i32_1 : i32, i32, i32
  }
  func.func @transform_3(%arg0: i32) -> (i32, i32, i32) {
    %c0_i32 = arith.constant 0 : i32
    %c0_i32_0 = arith.constant 0 : i32
    %c0_i32_1 = arith.constant 0 : i32
    %c0_i32_2 = arith.constant 0 : i32
    return %c0_i32, %c0_i32_0, %c0_i32_1 : i32, i32, i32
  }
  func.func @transform_4(%arg0: i32) -> (i32, i32) {
    %c0_i32 = arith.constant 0 : i32
    %c0_i32_0 = arith.constant 0 : i32
    %c0_i32_1 = arith.constant 0 : i32
    return %c0_i32, %c0_i32_0 : i32, i32
  }
  func.func @transform_5(%arg0: i32) -> (i32, i32) {
    %c0_i32 = arith.constant 0 : i32
    %c0_i32_0 = arith.constant 0 : i32
    %c0_i32_1 = arith.constant 0 : i32
    return %c0_i32, %c0_i32_0 : i32, i32
  }
  func.func @transform_6(%arg0: i32) -> i32 {
    %c0_i32 = arith.constant 0 : i32
    %c0_i32_0 = arith.constant 0 : i32
    return %c0_i32 : i32
  }
  func.func @transform_7(%arg0: i32) -> (i32, i32, i32) {
    %c0_i32 = arith.constant 0 : i32
    %c0_i32_0 = arith.constant 0 : i32
    %c0_i32_1 = arith.constant 0 : i32
    return %arg0, %c0_i32, %c0_i32_0 : i32, i32, i32
  }
}

</mosaic_0001>

<bundles_post_ra>
// kernel: inception_lstm_forward.1
= control target key start
LH: loop header
LB: loop body
LE: loop exit
PB: predicated region body
PF: predicated region fallthrough
CT: control target
= control target key end

     0   :  { %s3764_s0 = inlined_call_operand.vmem [shape: f32[4,2,64], index: 0, kind: input, shape index: {}]   ;;  %s3765_s1 = inlined_call_operand.vmem [shape: f32[3,16,64], index: 1, kind: input, shape index: {}]   ;;  %s3766_s2 = inlined_call_operand.vmem [shape: f32[2,16,64], index: 2, kind: input, shape index: {}]   ;;  %s3767_s3 = inlined_call_operand.vmem [shape: f32[2,1,64], index: 3, kind: input, shape index: {}]   ;;  %s3768_s4 = inlined_call_operand.hbm [shape: f32[9,46], index: 4, kind: input, shape index: {}]   ;;  %s3769_s5 = inlined_call_operand.vmem [shape: f32[1,46], index: 5, kind: input, shape index: {}]   ;;  %s3770_s6 = inlined_call_operand.vmem [shape: f32[213], index: 6, kind: input, shape index: {}]   ;;  %s3771_s7 = inlined_call_operand.hbm [shape: f32[2,1,46], index: 7, kind: output, shape index: {}]  }
   0x1   :  { %3782 = sst [smem:[#allocation18_spill]] %s3769_s5 }
   0x2   :  { %3783 = sst [smem:[#allocation19_spill]] %s3771_s7 }
   0x3   :  { %12 = vsyncpa [#allocation4], 0 }
   0x4   :  { %13 = vsyncpa [#allocation6], 0 }
   0x5   :  { %14 = vsyncpa [#allocation5], 0  ;;  %s27_s26 = sshll.u32 %s3768_s4, 4  ;;  %s2451_s27 = smov [#allocation3]   ;;  %s28_s26 = int_to_ptr.hbm [resolvable:$true] %s27_s26 }
   0x6   :  { %s29_s28 = sshll.u32 %s2451_s27, 4  ;;  %s43_s8 = sshll.u32 %s3770_s6, 4  ;;  %s30_s28 = int_to_ptr.vmem [resolvable:$true] %s29_s28  ;;  %s44_s8 = int_to_ptr.vmem [resolvable:$true] %s43_s8 }
   0x7   :  { %s2452_s9 = smov 128   ;;  %s3773_s10 = smov 8  }
   0x8   :  { %35 = dma.hbm_to_vmem [thread:$0]  %s28_s26, 256, %s30_s28, [#allocation4], %s2452_s9, %s2452_s9, %s3773_s10  }
   0x9   :  { %s2454_s11 = smov [#allocation7]  }
   0xa   :  { %46 = dma.vmem_to_smem %s44_s8, 32, %s2454_s11, [#allocation6]  }
   0xb   :  { %2445 = dma.done.wait [#allocation4], 256  }
   0xc   :  { %2446 = vsyncadd [#allocation4], 4294967040 }
   0xd   :  { %2447 = dma.done.wait [#allocation6], 32  }
   0xe   :  { %2448 = vsyncadd [#allocation6], 4294967264 }
   0xf   :  { %55 = sfence }
  0x10   :  { %v2522_v0 = vld [vmem:[%s3765_s1 + $0x8] sm:$0xff]  ;;  %v2527_v1 = vld [vmem:[%s3765_s1] sm:$0xff]  ;;  %v2455_v2 = vmov 0.0   ;;  %v72_v3 = vlaneseq  ;;  %v2456_v6 = vmov 0.5   ;;  %s2457_s16 = smov 96   ;;  %s3772_s17 = smov 16  }
  0x11   :  { %97 = vmatpush.msra.mxu0 %v2522_v0  ;;  %v143_v5 = vld [vmem:[%s3764_s0] sm:$0x3]  ;;  %s2459_s18 = smov 32   ;;  %v2552_v21 = vld [vmem:[%s3765_s1 + $0x18] sm:$0xff]  ;;  %v2557_v22 = vld [vmem:[%s3765_s1 + $0x10] sm:$0xff]  ;;  %s2460_s27 = smov 80  }
  0x12   :  { %v2532_v4 = vand.u32 127, %v72_v3  ;;  %v2562_v23 = vld [vmem:[%s3766_s2 + $0x8] sm:$0xff]  ;;  %117 = vmatpush.msra.mxu1 %v2552_v21  ;;  %v2569_v24 = vld [vmem:[%s3766_s2] sm:$0xff]  ;;  %vm79_vm3 = vcmask 130048   ;;  %v2620_v60 = vld [vmem:[%s3766_s2 + $0x18] sm:$0xff]  ;;  %vm270_vm4 = vcmask 123904  }
  0x13   :  { %98 = vmatpush.msra.mxu0 %v2527_v1  ;;  %185 = vmatpush.msra.mxu3 %v2562_v23  ;;  %v2582_v29 = vld [vmem:[%s3767_s3] ss:$0 sm:$0xff]  ;;  %v2080_v31 = vld [vmem:[%s3764_s0 + $0x2] sm:$0x3]  ;;  %v2610_v58 = vld [vmem:[%s3765_s1 + $0x28] sm:$0xff]  ;;  %s2462_s22 = smov 3  }
  0x14   :  { %99 = vmatmul.f32.vlgmr.msra.gmra.mxu0 %v2455_v2  ;;  %vm74_vm0 = vcmp.ge.s32.totalorder %v2532_v4, 32  ;;  %vm75_vm1 = vcmp.lt.s32.totalorder %v2532_v4, 48  ;;  %118 = vmatpush.msra.mxu1 %v2557_v22  ;;  %v2615_v59 = vld [vmem:[%s3765_s1 + $0x20] sm:$0xff]  ;;  %v2627_v61 = vld [vmem:[%s3766_s2 + $0x10] sm:$0xff]  ;;  %s3774_s23 = smov 126   ;;  %s3780_s24 = smov 1  }
  0x15   :  { %vm76_vm2 = vmand %vm74_vm0, %vm75_vm1  ;;  %186 = vmatpush.msra.mxu3 %v2569_v24  ;;  %119 = vmatmul.f32.vlgmr.msra.gmra.mxu1 %v2455_v2  ;;  %s2466_s25 = smov 125   ;;  %s2837_s26 = sld [smem:[#allocation7 + $0x1f]]  ;;  %vm912_vm5 = vcmask 15360   ;;  %vm850_vm6 = vcmask 23552   ;;  %vm1081_vm7 = vcmask 121856   ;;  %vm1143_vm8 = vcmask 113664  }
  0x16   :  { %v2539_v7 = vsel %vm76_vm2, 1.0, %v2456_v6  ;;  %v2542_v12 = vsel %vm76_vm2, 0.0, %v2456_v6  ;;  %286 = vmatpush.msrb.mxu1 %v2522_v0  ;;  %137 = vmatpush.msra.mxu2 %v2610_v58  ;;  %v2662_v6 = vld [vmem:[%s3767_s3 + $0x1] ss:$0 sm:$0xff]  ;;  %s2841_s28 = sld [smem:[#allocation7 + $0xa]]  ;;  %vm974_vm9 = vcmask 7168  }
  0x17   :  { %235 = vmatpush.msrb.mxu0 %v2620_v60  ;;  %328 = vmatpush.msrb.mxu3 %v2610_v58  ;;  %s2843_s29 = sld [smem:[#allocation7 + $0x26]]  ;;  %vm1205_vm10 = vcmask 105472   ;;  %vm1993_vm12 = vcmask 1040384   ;;  %vm1972_vm13 = vcmask 31744   ;;  %vm1974_vm14 = vcmask 39936  }
  0x18   :  { %287 = vmatpush.msrb.mxu1 %v2527_v1  ;;  %138 = vmatpush.msra.mxu2 %v2615_v59  ;;  %s2845_s30 = sld [smem:[#allocation7 + $0x42]]  ;;  %vm1976_vm15 = vcmask 48128   ;;  %vm1978_vm0 = vcmask 56320   ;;  %vm1980_vm1 = vcmask 64512   ;;  %vm1989_vm2 = vcmask 72704  }
  0x19   :  { %236 = vmatpush.msrb.mxu0 %v2627_v61  ;;  %139 = vmatmul.f32.vlgmr.msra.gmra.mxu2 %v2455_v2  ;;  %s2847_s8 = sld [smem:[#allocation7 + $0x11]] }
  0x1a   :  { %424 = vmatpush.msra.mxu1 %v2620_v60  ;;  %306 = vmatpush.msrb.mxu2 %v2552_v21  ;;  %s2849_s9 = sld [smem:[#allocation7 + $0x2d]] }
  0x1b   :  { %377 = vmatpush.msra.mxu0 %v2562_v23  ;;  %329 = vmatpush.msrb.mxu3 %v2615_v59  ;;  %s2851_s11 = sld [smem:[#allocation7 + $0x49]] }
  0x1c   :  { %307 = vmatpush.msrb.mxu2 %v2557_v22  ;;  %425 = vmatpush.msra.mxu1 %v2627_v61  ;;  %s2853_s4 = sld [smem:[#allocation7 + $0x1]] }
  0x1d   :  { %378 = vmatpush.msra.mxu0 %v2569_v24  ;;  %s2855_s12 = sld [smem:[#allocation7 + $0x1d]] }
  0x1e   :  { %472 = vmatpush.msra.mxu2 %v2522_v0  ;;  %s2861_s13 = sld [smem:[#allocation7 + $0x39]] }
  0x1f   :  { %s2863_s14 = sld [smem:[#allocation7]] }
  0x20   :  { %473 = vmatpush.msra.mxu2 %v2527_v1  ;;  %s2865_s6 = sld [smem:[#allocation7 + $0x1c]] }
  0x21   :  { %s2867_s15 = sld [smem:[#allocation7 + $0x38]] }
  0x22   :  { %s2869_s1 = sld [smem:[#allocation7 + $0x8]] }
  0x23   :  { %s2871_s2 = sld [smem:[#allocation7 + $0x24]] }
  0x24   :  { %s2873_s19 = sld [smem:[#allocation7 + $0x40]] }
  0x25   :  { %s2875_s20 = sld [smem:[#allocation7 + $0x4]] }
  0x26   :  { %s2877_s3 = sld [smem:[#allocation7 + $0x20]] }
  0x27   :  { %s2879_s21 = sld [smem:[#allocation7 + $0x3c]] }
  0x28   :  { %s2891_s10 = sld [smem:[#allocation7 + $0x10]] }
  0x29   :  { %s2901_s7 = sld [smem:[#allocation7 + $0x3e]] }
  0x2a   :  { %s2905_s5 = sld [smem:[#allocation7 + $0x7]] }
  0x2e   :  { %3784 = sst [smem:[#allocation12_spill]] %s2891_s10 }
  0x2f   :  { %3787 = sst [smem:[#allocation15_spill]] %s2901_s7 }
  0x30   :  { %3788 = sst [smem:[#allocation16_spill]] %s2905_s5 }
  0x31   :  { %s2909_s10 = sld [smem:[#allocation7 + $0x23]] }
  0x32   :  { %s2919_s7 = sld [smem:[#allocation7 + $0x1e]] }
  0x33   :  { %s2924_s5 = sld [smem:[#allocation7 + $0x3a]] }
  0x37   :  { %3789 = sst [smem:[#allocation17_spill]] %s2909_s10 }
  0x38   :  { %s2930_s10 = sld [smem:[#allocation7 + $0xb]] }
  0x91   :  { %v100_v8 = vpop.f32.mrf.mxu0 }
  0x92   :  { %v144_v9 = vadd.f32 %v143_v5, %v100_v8  ;;  %v120_v28 = vpop.f32.mrf.mxu1 }
  0x94   :  { %v145_v10 = vmul.f32 %v144_v9, %v2539_v7 }
  0x96   :  { %2333 = vtanh.f32 %v145_v10 }
  0x9c   :  { %v2334_v11 = vpop.eup %2333  ;;  %v140_v5 = vpop.f32.mrf.mxu2 }
  0x9d   :  { %v147_v13 = vmul.f32 %v2334_v11, %v2539_v7 }
  0x9f   :  { %v148_v14 = vadd.f32 %v147_v13, %v2542_v12 }
  0xa1   :  { %151 = vrot.lane.b32.xlu0 %v148_v14, %s2457_s16  ;;  %v149_v17 = vmul.f32 0.0, %v148_v14 }
 0x113   :  { %v152_v15 = vpop.permute.xlu0 %151 }
 0x114   :  { %v154_v16 = vmul.f32 %v152_v15, %v148_v14 }
 0x116   :  { %156 = vrot.lane.b32.xlu0 %v154_v16, %s3772_s17 }
 0x188   :  { %v157_v18 = vpop.permute.xlu0 %156 }
 0x189   :  { %v159_v19 = vadd.f32 %v157_v18, %v149_v17  ;;  %v2086_v17 = vld [vmem:[%s3764_s0 + $0x4] sm:$0x3] }
 0x18b   :  { %2335 = vtanh.f32 %v159_v19 }
 0x191   :  { %v2336_v20 = vpop.eup %2335 }
 0x192   :  { %162 = vrot.lane.b32.xlu1 %v2336_v20, %s2459_s18 }
 0x204   :  { %v163_v25 = vpop.permute.xlu1 %162 }
 0x205   :  { %v165_v26 = vmul.f32 %v163_v25, %v148_v14 }
 0x207   :  { %167 = vrot.lane.b32.xlu1 %v165_v26, %s2460_s27 }
 0x279   :  { %v168_v27 = vpop.permute.xlu1 %167 }
 0x27a   :  { %2075 = vmatmul.msk.f32.vlgmr.msra.gmra.mxu3 %vm79_vm3, %v168_v27  ;;  %2077 = vmatmul.msk.f32.vlgmr.msrb.gmra.mxu1 %vm79_vm3, %v168_v27 }
 0x27b   :  { %492 = vmatpush.msra.mxu3 %v2552_v21  ;;  %563 = vmatpush.msrb.mxu1 %v2562_v23 }
 0x27d   :  { %493 = vmatpush.msra.mxu3 %v2557_v22  ;;  %564 = vmatpush.msrb.mxu1 %v2569_v24 }
 0x2f7   :  { %v289_v30 = vpop.f32.mrf.mxu1 }
 0x2f8   :  { %v336_v34 = vadd.f32 %v2080_v31, %v289_v30 }
 0x2fa   :  { %v337_v37 = vmul.f32 %v336_v34, %v2539_v7 }
 0x2fd   :  { %v188_v32 = vpop.f32.mrf.mxu3 }
 0x2fe   :  { %v189_v33 = vadd.f32 %v188_v32, %v120_v28 }
 0x300   :  { %v194_v35 = vadd.f32 %v2582_v29, %v189_v33 }
 0x302   :  { %v195_v36 = vmul.f32 %v194_v35, %v2539_v7 }
 0x304   :  { %2337 = vtanh.f32 %v195_v36 }
 0x305   :  { %2339 = vtanh.f32 %v337_v37 }
 0x30a   :  { %v2338_v38 = vpop.eup %2337 }
 0x30b   :  { %v197_v39 = vmul.f32 %v2338_v38, %v2539_v7  ;;  %v2340_v41 = vpop.eup %2339 }
 0x30c   :  { %v339_v42 = vmul.f32 %v2340_v41, %v2539_v7 }
 0x30d   :  { %v198_v40 = vadd.f32 %v197_v39, %v2542_v12 }
 0x30e   :  { %v340_v43 = vadd.f32 %v339_v42, %v2542_v12 }
 0x30f   :  { %201 = vrot.lane.b32.xlu2 %v198_v40, %s2457_s16  ;;  %v199_v48 = vmul.f32 0.0, %v198_v40 }
 0x310   :  { %v341_v51 = vmul.f32 %v340_v43, %v159_v19 }
 0x317   :  { %343 = vrot.lane.b32.xlu2 %v340_v43, %s2457_s16 }
 0x369   :  { %v202_v44 = vpop.permute.xlu2 %201 }
 0x36a   :  { %v204_v45 = vmul.f32 %v202_v44, %v198_v40 }
 0x36c   :  { %206 = vrot.lane.b32.xlu0 %v204_v45, %s3772_s17 }
 0x371   :  { %v344_v46 = vpop.permute.xlu2 %343 }
 0x372   :  { %v346_v47 = vmul.f32 %v344_v46, %v340_v43 }
 0x374   :  { %348 = vrot.lane.b32.xlu1 %v346_v47, %s3772_s17 }
 0x3de   :  { %v207_v49 = vpop.permute.xlu0 %206 }
 0x3df   :  { %v2598_v50 = vadd.f32 %v207_v49, %v199_v48 }
 0x3e1   :  { %2341 = vtanh.f32 %v2598_v50 }
 0x3e6   :  { %v349_v52 = vpop.permute.xlu1 %348 }
 0x3e7   :  { %v2342_v53 = vpop.eup %2341  ;;  %v2601_v54 = vadd.f32 %v349_v52, %v341_v51 }
 0x3e8   :  { %212 = vrot.lane.b32.xlu2 %v2342_v53, %s2459_s18 }
 0x3e9   :  { %2343 = vtanh.f32 %v2601_v54 }
 0x3ef   :  { %v2344_v55 = vpop.eup %2343 }
 0x3f0   :  { %354 = vrot.lane.b32.xlu0 %v2344_v55, %s2459_s18 }
 0x442   :  { %v213_v56 = vpop.permute.xlu2 %212 }
 0x443   :  { %v215_v57 = vmul.f32 %v213_v56, %v198_v40 }
 0x445   :  { %217 = vrot.lane.b32.xlu1 %v215_v57, %s2460_s27 }
 0x462   :  { %v355_v62 = vpop.permute.xlu0 %354 }
 0x463   :  { %v357_v63 = vmul.f32 %v355_v62, %v340_v43 }
 0x465   :  { %359 = vrot.lane.b32.xlu2 %v357_v63, %s2460_s27 }
 0x4b7   :  { %v218_v2 = vpop.permute.xlu1 %217 }
 0x4b8   :  { %2076 = vmatmul.msk.f32.vlgmr.msrb.gmra.mxu0 %vm79_vm3, %v218_v2  ;;  %2078 = vmatmul.msk.f32.vlgmr.msrb.gmra.mxu2 %vm79_vm3, %v218_v2 }
 0x4b9   :  { %514 = vmatpush.msrb.mxu0 %v2610_v58  ;;  %610 = vmatpush.msrb.mxu2 %v2620_v60 }
 0x4bb   :  { %515 = vmatpush.msrb.mxu0 %v2615_v59  ;;  %611 = vmatpush.msrb.mxu2 %v2627_v61 }
 0x4bf   :  { %v360_v3 = vpop.permute.xlu2 %359 }
 0x4c0   :  { %2081 = vmatmul.msk.f32.vlgmr.msra.gmra.mxu0 %vm79_vm3, %v360_v3  ;;  %2083 = vmatmul.msk.f32.vlgmr.msra.gmra.mxu2 %vm79_vm3, %v360_v3 }
 0x4c1   :  { %678 = vmatpush.msra.mxu0 %v2552_v21  ;;  %749 = vmatpush.msra.mxu2 %v2562_v23 }
 0x4c3   :  { %679 = vmatpush.msra.mxu0 %v2557_v22  ;;  %750 = vmatpush.msra.mxu2 %v2569_v24 }
 0x535   :  { %v238_v8 = vpop.f32.mrf.mxu0 }
 0x536   :  { %v239_v9 = vadd.f32 %v238_v8, %v140_v5 }
 0x538   :  { %v244_v10 = vadd.f32 %v2662_v6, %v239_v9 }
 0x53a   :  { %v245_v11 = vmul.f32 %v244_v10, %v2539_v7 }
 0x53b   :  { %v309_v13 = vpop.f32.mrf.mxu2 }
 0x53c   :  { %2345 = vtanh.f32 %v245_v11 }
 0x53d   :  { %v380_v14 = vpop.f32.mrf.mxu0 }
 0x53e   :  { %v381_v15 = vadd.f32 %v380_v14, %v309_v13 }
 0x540   :  { %v383_v16 = vadd.f32 %v2582_v29, %v381_v15 }
 0x542   :  { %v2346_v18 = vpop.eup %2345  ;;  %v384_v19 = vmul.f32 %v383_v16, %v2539_v7 }
 0x543   :  { %v475_v20 = vpop.f32.mrf.mxu2  ;;  %v247_v21 = vmul.f32 %v2346_v18, %v2539_v7 }
 0x544   :  { %2347 = vtanh.f32 %v384_v19  ;;  %v522_v22 = vadd.f32 %v2086_v17, %v475_v20 }
 0x545   :  { %v248_v23 = vadd.f32 %v247_v21, %v2542_v12 }
 0x546   :  { %v523_v24 = vmul.f32 %v522_v22, %v2539_v7 }
 0x547   :  { %251 = vrot.lane.b32.xlu0 %v248_v23, %s2457_s16  ;;  %v249_v42 = vmul.f32 0.0, %v248_v23 }
 0x548   :  { %2349 = vtanh.f32 %v523_v24 }
 0x54a   :  { %v2348_v25 = vpop.eup %2347 }
 0x54b   :  { %v386_v26 = vmul.f32 %v2348_v25, %v2539_v7 }
 0x54d   :  { %v387_v27 = vadd.f32 %v386_v26, %v2542_v12 }
 0x54e   :  { %v2350_v28 = vpop.eup %2349 }
 0x54f   :  { %390 = vrot.lane.b32.xlu1 %v387_v27, %s2457_s16  ;;  %v525_v30 = vmul.f32 %v2350_v28, %v2539_v7  ;;  %v388_v45 = vmul.f32 %v387_v27, %v2598_v50 }
 0x551   :  { %v526_v31 = vadd.f32 %v525_v30, %v2542_v12 }
 0x553   :  { %529 = vrot.lane.b32.xlu2 %v526_v31, %s2457_s16  ;;  %v527_v38 = vmul.f32 %v526_v31, %v2601_v54 }
 0x5ad   :  { %v530_v32 = vpop.permute.xlu2 %529 }
 0x5ae   :  { %v532_v33 = vmul.f32 %v530_v32, %v526_v31 }
 0x5b0   :  { %534 = vrot.lane.b32.xlu2 %v532_v33, %s3772_s17 }
 0x5b9   :  { %v252_v34 = vpop.permute.xlu0 %251 }
 0x5ba   :  { %v254_v35 = vmul.f32 %v252_v34, %v248_v23 }
 0x5bc   :  { %256 = vrot.lane.b32.xlu0 %v254_v35, %s3772_s17 }
 0x5c1   :  { %v391_v36 = vpop.permute.xlu1 %390 }
 0x5c2   :  { %v393_v37 = vmul.f32 %v391_v36, %v387_v27 }
 0x5c4   :  { %395 = vrot.lane.b32.xlu1 %v393_v37, %s3772_s17 }
 0x60a   :  { %v535_v39 = vpop.permute.xlu2 %534 }
 0x60b   :  { %v2685_v40 = vadd.f32 %v535_v39, %v527_v38 }
 0x60d   :  { %2351 = vtanh.f32 %v2685_v40 }
 0x613   :  { %v2352_v41 = vpop.eup %2351 }
 0x614   :  { %540 = vrot.lane.b32.xlu2 %v2352_v41, %s2459_s18 }
 0x62e   :  { %v257_v43 = vpop.permute.xlu0 %256 }
 0x62f   :  { %v2689_v44 = vadd.f32 %v257_v43, %v249_v42 }
 0x631   :  { %2353 = vtanh.f32 %v2689_v44 }
 0x636   :  { %v396_v46 = vpop.permute.xlu1 %395 }
 0x637   :  { %v2354_v47 = vpop.eup %2353  ;;  %v2693_v48 = vadd.f32 %v396_v46, %v388_v45 }
 0x638   :  { %262 = vrot.lane.b32.xlu0 %v2354_v47, %s2459_s18 }
 0x639   :  { %2355 = vtanh.f32 %v2693_v48 }
 0x63f   :  { %v2356_v49 = vpop.eup %2355 }
 0x640   :  { %401 = vrot.lane.b32.xlu1 %v2356_v49, %s2459_s18 }
 0x66e   :  { %v541_v51 = vpop.permute.xlu2 %540 }
 0x66f   :  { %v543_v52 = vmul.f32 %v541_v51, %v526_v31 }
 0x671   :  { %545 = vrot.lane.b32.xlu2 %v543_v52, %s2460_s27 }
 0x6aa   :  { %v263_v53 = vpop.permute.xlu0 %262 }
 0x6ab   :  { %v265_v54 = vmul.f32 %v263_v53, %v248_v23 }
 0x6ad   :  { %267 = vrot.lane.b32.xlu0 %v265_v54, %s2460_s27 }
 0x6b2   :  { %v402_v50 = vpop.permute.xlu1 %401 }
 0x6b3   :  { %v404_v55 = vmul.f32 %v402_v50, %v387_v27 }
 0x6b5   :  { %406 = vrot.lane.b32.xlu1 %v404_v55, %s2460_s27 }
 0x6cb   :  { %v546_v62 = vpop.permute.xlu2 %545 }
 0x71f   :  { %v268_v56 = vpop.permute.xlu0 %267 }
 0x720   :  { %271 = vst.msk [vmem:[#allocation2] sm:$0x3] %vm270_vm4, %v268_v56  ;;  %2079 = vmatmul.msk.f32.vlgmr.msrb.gmra.mxu3 %vm79_vm3, %v268_v56 }
 0x721   :  { %658 = vmatpush.msrb.mxu3 %v2522_v0 }
 0x723   :  { %659 = vmatpush.msrb.mxu3 %v2527_v1 }
 0x727   :  { %v407_v57 = vpop.permute.xlu1 %406 }
 0x728   :  { %2082 = vmatmul.msk.f32.vlgmr.msra.gmra.mxu1 %vm79_vm3, %v407_v57  ;;  %2084 = vmatmul.msk.f32.vlgmr.msra.gmra.mxu3 %vm79_vm3, %v407_v57 }
 0x729   :  { %700 = vmatpush.msra.mxu1 %v2610_v58  ;;  %796 = vmatpush.msra.mxu3 %v2620_v60 }
 0x72b   :  { %701 = vmatpush.msra.mxu1 %v2615_v59  ;;  %797 = vmatpush.msra.mxu3 %v2627_v61  ;;  %v2092_v61 = vld [vmem:[%s3764_s0 + $0x6] sm:$0x3]  ;;  %s3776_s0 = smov 2  }
 0x730   :  { %2087 = vmatmul.msk.f32.vlgmr.msrb.gmra.mxu1 %vm79_vm3, %v546_v62  ;;  %2089 = vmatmul.msk.f32.vlgmr.msrb.gmra.mxu3 %vm79_vm3, %v546_v62 }
 0x7a3   :  { %v331_v0 = vpop.f32.mrf.mxu3 }
 0x7a5   :  { %v427_v1 = vpop.f32.mrf.mxu1 }
 0x7a6   :  { %v428_v63 = vadd.f32 %v427_v1, %v331_v0 }
 0x7a8   :  { %v430_v2 = vadd.f32 %v2662_v6, %v428_v63 }
 0x7aa   :  { %v431_v3 = vmul.f32 %v430_v2, %v2539_v7 }
 0x7ab   :  { %v495_v5 = vpop.f32.mrf.mxu3 }
 0x7ac   :  { %2357 = vtanh.f32 %v431_v3 }
 0x7ad   :  { %v566_v58 = vpop.f32.mrf.mxu1 }
 0x7ae   :  { %v567_v60 = vadd.f32 %v566_v58, %v495_v5 }
 0x7b0   :  { %v569_v59 = vadd.f32 %v2582_v29, %v567_v60 }
 0x7b2   :  { %v2358_v8 = vpop.eup %2357  ;;  %v570_v9 = vmul.f32 %v569_v59, %v2539_v7 }
 0x7b3   :  { %v661_v10 = vpop.f32.mrf.mxu3  ;;  %v433_v11 = vmul.f32 %v2358_v8, %v2539_v7 }
 0x7b4   :  { %2359 = vtanh.f32 %v570_v9  ;;  %v708_v13 = vadd.f32 %v2092_v61, %v661_v10 }
 0x7b5   :  { %v434_v14 = vadd.f32 %v433_v11, %v2542_v12 }
 0x7b6   :  { %v709_v15 = vmul.f32 %v708_v13, %v2539_v7 }
 0x7b7   :  { %437 = vrot.lane.b32.xlu1 %v434_v14, %s2457_s16  ;;  %v435_v33 = vmul.f32 %v434_v14, %v2689_v44 }
 0x7b8   :  { %2361 = vtanh.f32 %v709_v15 }
 0x7ba   :  { %v2360_v16 = vpop.eup %2359 }
 0x7bb   :  { %v572_v17 = vmul.f32 %v2360_v16, %v2539_v7 }
 0x7bd   :  { %v573_v18 = vadd.f32 %v572_v17, %v2542_v12 }
 0x7be   :  { %v2362_v19 = vpop.eup %2361 }
 0x7bf   :  { %576 = vrot.lane.b32.xlu0 %v573_v18, %s2457_s16  ;;  %v711_v20 = vmul.f32 %v2362_v19, %v2539_v7  ;;  %v574_v36 = vmul.f32 %v573_v18, %v2693_v48 }
 0x7c1   :  { %v712_v21 = vadd.f32 %v711_v20, %v2542_v12 }
 0x7c3   :  { %715 = vrot.lane.b32.xlu2 %v712_v21, %s2457_s16  ;;  %v713_v28 = vmul.f32 %v712_v21, %v2685_v40 }
 0x81d   :  { %v716_v22 = vpop.permute.xlu2 %715 }
 0x81e   :  { %v718_v23 = vmul.f32 %v716_v22, %v712_v21 }
 0x820   :  { %720 = vrot.lane.b32.xlu2 %v718_v23, %s3772_s17 }
 0x829   :  { %v438_v24 = vpop.permute.xlu1 %437 }
 0x82a   :  { %v440_v25 = vmul.f32 %v438_v24, %v434_v14 }
 0x82c   :  { %442 = vrot.lane.b32.xlu1 %v440_v25, %s3772_s17 }
 0x831   :  { %v577_v26 = vpop.permute.xlu0 %576 }
 0x832   :  { %v579_v27 = vmul.f32 %v577_v26, %v573_v18 }
 0x834   :  { %581 = vrot.lane.b32.xlu0 %v579_v27, %s3772_s17 }
 0x87a   :  { %v721_v30 = vpop.permute.xlu2 %720 }
 0x87b   :  { %v723_v31 = vadd.f32 %v721_v30, %v713_v28 }
 0x87d   :  { %2363 = vtanh.f32 %v723_v31 }
 0x883   :  { %v2364_v32 = vpop.eup %2363 }
 0x884   :  { %726 = vrot.lane.b32.xlu2 %v2364_v32, %s2459_s18  ;;  %v2771_v32 = vld [vmem:[#allocation2] sm:$0x3] }
 0x89e   :  { %v443_v34 = vpop.permute.xlu1 %442 }
 0x89f   :  { %v445_v35 = vadd.f32 %v443_v34, %v435_v33 }
 0x8a1   :  { %2365 = vtanh.f32 %v445_v35 }
 0x8a6   :  { %v582_v37 = vpop.permute.xlu0 %581 }
 0x8a7   :  { %v2366_v38 = vpop.eup %2365  ;;  %v584_v39 = vadd.f32 %v582_v37, %v574_v36 }
 0x8a8   :  { %448 = vrot.lane.b32.xlu1 %v2366_v38, %s2459_s18 }
 0x8a9   :  { %2367 = vtanh.f32 %v584_v39 }
 0x8af   :  { %v2368_v40 = vpop.eup %2367 }
 0x8b0   :  { %587 = vrot.lane.b32.xlu0 %v2368_v40, %s2459_s18 }
 0x8de   :  { %v727_v41 = vpop.permute.xlu2 %726 }
 0x8df   :  { %v729_v42 = vmul.f32 %v727_v41, %v712_v21 }
 0x8e1   :  { %731 = vrot.lane.b32.xlu2 %v729_v42, %s2460_s27 }
 0x91a   :  { %v449_v43 = vpop.permute.xlu1 %448 }
 0x91b   :  { %v451_v44 = vmul.f32 %v449_v43, %v434_v14 }
 0x91d   :  { %453 = vrot.lane.b32.xlu1 %v451_v44, %s2460_s27 }
 0x922   :  { %v588_v45 = vpop.permute.xlu0 %587 }
 0x923   :  { %v590_v46 = vmul.f32 %v588_v45, %v573_v18 }
 0x925   :  { %592 = vrot.lane.b32.xlu0 %v590_v46, %s2460_s27 }
 0x93b   :  { %v732_v49 = vpop.permute.xlu2 %731 }
 0x98f   :  { %v454_v47 = vpop.permute.xlu1 %453 }
 0x990   :  { %457 = vst.msk [vmem:[#allocation2 + $0x2] sm:$0x3] %vm270_vm4, %v454_v47  ;;  %2085 = vmatmul.msk.f32.vlgmr.msrb.gmra.mxu0 %vm79_vm3, %v454_v47 }
 0x997   :  { %v593_v48 = vpop.permute.xlu0 %592 }
 0x998   :  { %2088 = vmatmul.msk.f32.vlgmr.msrb.gmra.mxu2 %vm79_vm3, %v593_v48  ;;  %2090 = vmatmul.msk.f32.vlgmr.msra.gmra.mxu0 %vm79_vm3, %v593_v48 }
 0x9a0   :  { %2093 = vmatmul.msk.f32.vlgmr.msra.gmra.mxu2 %vm79_vm3, %v732_v49 }
 0xa0d   :  { %v517_v51 = vpop.f32.mrf.mxu0 }
 0xa15   :  { %v681_v55 = vpop.f32.mrf.mxu0 }
 0xa1b   :  { %v613_v52 = vpop.f32.mrf.mxu2 }
 0xa1c   :  { %v614_v53 = vadd.f32 %v613_v52, %v517_v51  ;;  %v1028_v52 = vstv %s2841_s28  ;;  %s2934_s28 = sld [smem:[#allocation7 + $0x27]] }
 0xa1e   :  { %v616_v54 = vadd.f32 %v2662_v6, %v614_v53  ;;  %v1043_v53 = vstv %s2843_s29  ;;  %s2956_s29 = sld [smem:[#allocation7 + $0x46]] }
 0xa20   :  { %v617_v50 = vmul.f32 %v616_v54, %v2539_v7 }
 0xa22   :  { %2369 = vtanh.f32 %v617_v50  ;;  %v1040_v50 = vstv %s2837_s26  ;;  %s2943_s26 = sld [smem:[#allocation7 + $0xe]] }
 0xa23   :  { %v752_v56 = vpop.f32.mrf.mxu2 }
 0xa24   :  { %v753_v57 = vadd.f32 %v752_v56, %v681_v55  ;;  %v1058_v55 = vstv %s2845_s30  ;;  %v1032_v56 = vstv %s2847_s8  ;;  %s2960_s30 = sld [smem:[#allocation7 + $0x12]] }
 0xa25   :  { %s2966_s8 = sld [smem:[#allocation7 + $0x2e]] }
 0xa26   :  { %v755_v62 = vadd.f32 %v2582_v29, %v753_v57  ;;  %v1047_v57 = vstv %s2849_s9  ;;  %s2973_s9 = sld [smem:[#allocation7 + $0x4a]] }
 0xa28   :  { %v2370_v0 = vpop.eup %2369  ;;  %v756_v1 = vmul.f32 %v755_v62, %v2539_v7 }
 0xa29   :  { %v619_v63 = vmul.f32 %v2370_v0, %v2539_v7 }
 0xa2a   :  { %2371 = vtanh.f32 %v756_v1 }
 0xa2b   :  { %v620_v2 = vadd.f32 %v619_v63, %v2542_v12  ;;  %v1062_v63 = vstv %s2851_s11  ;;  %s2980_s11 = sld [smem:[#allocation7 + $0xd]] }
 0xa2d   :  { %623 = vrot.lane.b32.xlu1 %v620_v2, %s2457_s16  ;;  %v621_v13 = vmul.f32 %v620_v2, %v445_v35 }
 0xa30   :  { %v2372_v3 = vpop.eup %2371 }
 0xa31   :  { %v758_v5 = vmul.f32 %v2372_v3, %v2539_v7  ;;  %v1041_v3 = vmul.f32 %v1040_v50, %v2771_v32 }
 0xa33   :  { %v759_v58 = vadd.f32 %v758_v5, %v2542_v12 }
 0xa35   :  { %762 = vrot.lane.b32.xlu0 %v759_v58, %s2457_s16  ;;  %v760_v8 = vmul.f32 %v759_v58, %v584_v39 }
 0xa9f   :  { %v624_v60 = vpop.permute.xlu1 %623 }
 0xaa0   :  { %v626_v59 = vmul.f32 %v624_v60, %v620_v2 }
 0xaa2   :  { %628 = vrot.lane.b32.xlu0 %v626_v59, %s3772_s17 }
 0xaa7   :  { %v763_v29 = vpop.permute.xlu0 %762 }
 0xaa8   :  { %v765_v61 = vmul.f32 %v763_v29, %v759_v58 }
 0xaaa   :  { %767 = vrot.lane.b32.xlu2 %v765_v61, %s3772_s17 }
 0xb04   :  { %v768_v9 = vpop.permute.xlu2 %767 }
 0xb05   :  { %v770_v10 = vadd.f32 %v768_v9, %v760_v8  ;;  %v918_v9 = vstv %s2853_s4  ;;  %s3790_s4 = sld [smem:[#allocation12_spill]] }
 0xb07   :  { %2373 = vtanh.f32 %v770_v10  ;;  %v933_v10 = vstv %s2855_s12 }
 0xb0d   :  { %v2374_v11 = vpop.eup %2373 }
 0xb0e   :  { %773 = vrot.lane.b32.xlu1 %v2374_v11, %s2459_s18  ;;  %v948_v11 = vstv %s2861_s13  ;;  %s2985_s13 = sld [smem:[#allocation7 + $0x29]] }
 0xb14   :  { %v629_v14 = vpop.permute.xlu0 %628 }
 0xb15   :  { %v631_v15 = vadd.f32 %v629_v14, %v621_v13 }
 0xb17   :  { %2375 = vtanh.f32 %v631_v15 }
 0xb1d   :  { %v2376_v16 = vpop.eup %2375 }
 0xb1e   :  { %634 = vrot.lane.b32.xlu2 %v2376_v16, %s2459_s18 }
 0xb78   :  { %v635_v17 = vpop.permute.xlu2 %634 }
 0xb79   :  { %v637_v18 = vmul.f32 %v635_v17, %v620_v2 }
 0xb7b   :  { %639 = vrot.lane.b32.xlu1 %v637_v18, %s2460_s27 }
 0xb80   :  { %v774_v19 = vpop.permute.xlu1 %773 }
 0xb81   :  { %v776_v20 = vmul.f32 %v774_v19, %v759_v58 }
 0xb83   :  { %778 = vrot.lane.b32.xlu0 %v776_v20, %s2460_s27 }
 0xbed   :  { %v640_v21 = vpop.permute.xlu1 %639 }
 0xbee   :  { %643 = vst.msk [vmem:[#allocation2 + $0x4] sm:$0x3] %vm270_vm4, %v640_v21  ;;  %2091 = vmatmul.msk.f32.vlgmr.msra.gmra.mxu1 %vm79_vm3, %v640_v21 }
 0xbf5   :  { %v779_v22 = vpop.permute.xlu0 %778 }
 0xbf6   :  { %2094 = vmatmul.msk.f32.vlgmr.msra.gmra.mxu3 %vm79_vm3, %v779_v22  ;;  %vm2017_vm3 = vcmask 369664  }
 0xc6b   :  { %v703_v23 = vpop.f32.mrf.mxu1 }
 0xc79   :  { %v799_v24 = vpop.f32.mrf.mxu3 }
 0xc7a   :  { %v800_v25 = vadd.f32 %v799_v24, %v703_v23  ;;  %v856_v24 = vstv %s2863_s14  ;;  %s2991_s14 = sld [smem:[#allocation7 + $0x45]] }
 0xc7c   :  { %v802_v26 = vadd.f32 %v2662_v6, %v800_v25  ;;  %v2778_v6 = vld [vmem:[#allocation2 + $0x2] sm:$0x3]  ;;  %v871_v25 = vstv %s2865_s6  ;;  %s2994_s6 = sld [smem:[#allocation7 + $0x9]] }
 0xc7d   :  { %v1029_v62 = vmul.f32 %v1028_v52, %v2778_v6  ;;  %v1044_v0 = vmul.f32 %v1043_v53, %v2778_v6  ;;  %v1059_v5 = vmul.f32 %v1058_v55, %v2778_v6 }
 0xc7e   :  { %v803_v27 = vmul.f32 %v802_v26, %v2539_v7  ;;  %v886_v26 = vstv %s2867_s15 }
 0xc7f   :  { %v1045_v8 = vadd.f32 %v1044_v0, %v1041_v3 }
 0xc80   :  { %2377 = vtanh.f32 %v803_v27  ;;  %v921_v27 = vstv %s2869_s1  ;;  %s2999_s1 = sld [smem:[#allocation7 + $0x25]] }
 0xc86   :  { %v2378_v28 = vpop.eup %2377 }
 0xc87   :  { %v805_v30 = vmul.f32 %v2378_v28, %v2539_v7  ;;  %v2786_v7 = vld [vmem:[#allocation2 + $0x4] sm:$0x3]  ;;  %v936_v28 = vstv %s2871_s2  ;;  %s3793_s2 = sld [smem:[#allocation15_spill]] }
 0xc88   :  { %v1033_v58 = vmul.f32 %v1032_v56, %v2786_v7  ;;  %v1048_v60 = vmul.f32 %v1047_v57, %v2786_v7  ;;  %v1063_v29 = vmul.f32 %v1062_v63, %v2786_v7 }
 0xc89   :  { %v806_v31 = vadd.f32 %v805_v30, %v2542_v12  ;;  %v951_v30 = vstv %s2873_s19  ;;  %s3015_s19 = sld [smem:[#allocation7 + $0x18]] }
 0xc8a   :  { %v2964_v19 = vadd.f32 %v1048_v60, %v1045_v8 }
 0xc8b   :  { %809 = vrot.lane.b32.xlu2 %v806_v31, %s2457_s16  ;;  %s3778_s16 = smov 127   ;;  %v807_v12 = vmul.f32 %v806_v31, %v631_v15 }
 0xc8d   :  { %v1241_v63 = vstv %s3793_s2  ;;  %s3188_s2 = sld [smem:[#allocation7 + $0x1a]] }
 0xc93   :  { %900 = vrot.lane.b32.xlu2 %v2771_v32, %s3776_s0 }
 0xce5   :  { %v810_v33 = vpop.permute.xlu2 %809 }
 0xce6   :  { %v812_v34 = vmul.f32 %v810_v33, %v806_v31  ;;  %v1102_v33 = vstv %s2877_s3  ;;  %s3795_s3 = sld [smem:[#allocation17_spill]] }
 0xce8   :  { %814 = vrot.lane.b32.xlu0 %v812_v34, %s3772_s17  ;;  %s2889_s17 = sld [smem:[#allocation7 + $0x44]]  ;;  %v1117_v34 = vstv %s2879_s21 }
 0xce9   :  { %s3041_s21 = sld [smem:[#allocation7 + $0x5]] }
 0xced   :  { %v2814_v40 = vpop.permute.xlu2 %900 }
 0xcee   :  { %v913_v13 = vsel %vm912_vm5, 0.0, %v2814_v40 }
 0xcef   :  { %v919_v20 = vmul.f32 %v918_v9, %v913_v13  ;;  %v934_v21 = vmul.f32 %v933_v10, %v913_v13  ;;  %v949_v22 = vmul.f32 %v948_v11, %v913_v13 }
 0xcf0   :  { %838 = vrot.lane.b32.xlu0 %v2771_v32, %s2462_s22 }
 0xcf8   :  { %902 = vrot.lane.b32.xlu0 %v2778_v6, %s3776_s0 }
 0xd00   :  { %1069 = vrot.lane.b32.xlu0 %v2771_v32, %s3778_s16 }
 0xd08   :  { %1133 = vrot.lane.b32.xlu0 %v2778_v6, %s3774_s23 }
 0xd10   :  { %966 = vrot.lane.b32.xlu0 %v2786_v7, %s3780_s24 }
 0xd18   :  { %1193 = vrot.lane.b32.xlu0 %v2771_v32, %s2466_s25 }
 0xd5a   :  { %v815_v35 = vpop.permute.xlu0 %814 }
 0xd5b   :  { %v817_v36 = vadd.f32 %v815_v35, %v807_v12 }
 0xd5d   :  { %2379 = vtanh.f32 %v817_v36 }
 0xd62   :  { %v2833_v43 = vpop.permute.xlu0 %838 }
 0xd63   :  { %v2380_v37 = vpop.eup %2379 }
 0xd64   :  { %820 = vrot.lane.b32.xlu1 %v2380_v37, %s2459_s18  ;;  %s2835_s18 = sld [smem:[#allocation7 + $0x3]]  ;;  %v1182_v37 = vstv %s2889_s17 }
 0xd65   :  { %s3005_s17 = sld [smem:[#allocation7 + $0x41]] }
 0xd6a   :  { %v2857_v44 = vpop.permute.xlu0 %902  ;;  %v1025_v54 = vstv %s2835_s18  ;;  %s2939_s18 = sld [smem:[#allocation7 + $0x43]] }
 0xd6b   :  { %v1026_v2 = vmul.f32 %v1025_v54, %v2771_v32 }
 0xd6c   :  { %840 = vrot.lane.b32.xlu1 %v2778_v6, %s2462_s22 }
 0xd6d   :  { %v1030_v61 = vadd.f32 %v1029_v62, %v1026_v2 }
 0xd6f   :  { %v2962_v18 = vadd.f32 %v1033_v58, %v1030_v61 }
 0xd72   :  { %v2881_v46 = vpop.permute.xlu0 %1069 }
 0xd73   :  { %v1082_v52 = vsel %vm1081_vm7, %v2881_v46, 0.0 }
 0xd74   :  { %962 = vrot.lane.b32.xlu1 %v2771_v32, %s3780_s24  ;;  %v3034_v58 = vmul.f32 %v1117_v34, %v1082_v52 }
 0xd7a   :  { %v2903_v48 = vpop.permute.xlu0 %1133 }
 0xd7b   :  { %v1145_v55 = vsel %vm1143_vm8, %v2903_v48, 0.0  ;;  %v3029_v48 = vmul.f32 %v1102_v33, %v1082_v52 }
 0xd7c   :  { %1071 = vrot.lane.b32.xlu1 %v2778_v6, %s3778_s16  ;;  %v3045_v8 = vmul.f32 %v1182_v37, %v1145_v55 }
 0xd82   :  { %v967_v14 = vpop.permute.xlu0 %966 }
 0xd84   :  { %842 = vrot.lane.b32.xlu1 %v2786_v7, %s2462_s22 }
 0xd8a   :  { %v1194_v53 = vpop.permute.xlu0 %1193 }
 0xd8c   :  { %1073 = vrot.lane.b32.xlu1 %v2786_v7, %s3778_s16 }
 0xd94   :  { %1195 = vrot.lane.b32.xlu1 %v2778_v6, %s2466_s25 }
 0xdd6   :  { %v821_v38 = vpop.permute.xlu1 %820 }
 0xdd7   :  { %v823_v39 = vmul.f32 %v821_v38, %v806_v31  ;;  %v914_v31 = vsel %vm912_vm5, 0.0, %v2857_v44 }
 0xdd8   :  { %v922_v35 = vmul.f32 %v921_v27, %v914_v31  ;;  %v937_v36 = vmul.f32 %v936_v28, %v914_v31  ;;  %v952_v38 = vmul.f32 %v951_v30, %v914_v31  ;;  %v1105_v27 = vstv %s2934_s28  ;;  %s3107_s28 = sld [smem:[#allocation7 + $0x4d]] }
 0xdd9   :  { %825 = vrot.lane.b32.xlu2 %v823_v39, %s2460_s27  ;;  %s2839_s27 = sld [smem:[#allocation7 + $0x3b]]  ;;  %v987_v39 = vstv %s3790_s4  ;;  %v1120_v28 = vstv %s2939_s18  ;;  %v863_v30 = vstv %s2943_s26 }
 0xdda   :  { %v3017_v0 = vadd.f32 %v922_v35, %v919_v20  ;;  %v3019_v46 = vadd.f32 %v937_v36, %v934_v21  ;;  %v3025_v2 = vadd.f32 %v952_v38, %v949_v22  ;;  %s3066_s4 = sld [smem:[#allocation7 + $0xf]]  ;;  %v1124_v38 = vstv %s2973_s9 }
 0xddb   :  { %s3110_s18 = sld [smem:[#allocation7 + $0x19]] }
 0xddc   :  { %s3115_s26 = sld [smem:[#allocation7 + $0x35]] }
 0xddd   :  { %s3156_s9 = sld [smem:[#allocation7 + $0x16]] }
 0xdde   :  { %v2859_v45 = vpop.permute.xlu1 %840 }
 0xddf   :  { %v1055_v1 = vstv %s2839_s27  ;;  %s2952_s27 = sld [smem:[#allocation7 + $0x2a]] }
 0xde0   :  { %v1056_v59 = vmul.f32 %v1055_v1, %v2771_v32  ;;  %v977_v1 = vsel %vm974_vm9, 0.0, %v967_v14 }
 0xde1   :  { %964 = vrot.lane.b32.xlu2 %v2778_v6, %s3780_s24  ;;  %v851_v6 = vsel %vm850_vm6, 0.0, %v2833_v43  ;;  %v3047_v9 = vmul.f32 %v987_v39, %v977_v1 }
 0xde2   :  { %v1060_v17 = vadd.f32 %v1059_v5, %v1056_v59  ;;  %v857_v43 = vmul.f32 %v856_v24, %v851_v6  ;;  %v3001_v44 = vmul.f32 %v871_v25, %v851_v6  ;;  %v3007_v50 = vmul.f32 %v886_v26, %v851_v6 }
 0xde3   :  { %v1206_v5 = vsel %vm1205_vm10, %v1194_v53, 0.0  ;;  %v995_v24 = vstv %s2919_s7  ;;  %v1010_v25 = vstv %s2924_s5  ;;  %v1090_v26 = vstv %s2930_s10  ;;  %s3084_s5 = sld [smem:[#allocation7 + $0x13]] }
 0xde4   :  { %v2968_v23 = vadd.f32 %v1063_v29, %v1060_v17  ;;  %v852_v29 = vsel %vm850_vm6, 0.0, %v2859_v45  ;;  %v3059_v14 = vmul.f32 %v1241_v63, %v1206_v5  ;;  %v874_v17 = vstv %s3795_s3  ;;  %s3089_s7 = sld [smem:[#allocation7 + $0x2f]] }
 0xde5   :  { %v878_v31 = vstv %s2952_s27  ;;  %v875_v33 = vmul.f32 %v874_v17, %v852_v29  ;;  %v1094_v6 = vstv %s2960_s30  ;;  %s3098_s10 = sld [smem:[#allocation7 + $0x4b]]  ;;  %v1244_v63 = vstv %s2991_s14 }
 0xde6   :  { %v2883_v47 = vpop.permute.xlu1 %962  ;;  %s3121_s27 = sld [smem:[#allocation7 + $0x51]] }
 0xde7   :  { %s3144_s30 = sld [smem:[#allocation7 + $0x37]] }
 0xde8   :  { %s3174_s14 = sld [smem:[#allocation7 + $0x17]] }
 0xde9   :  { %1131 = vrot.lane.b32.xlu2 %v2771_v32, %s3774_s23  ;;  %v1087_v32 = vstv %s2875_s20  ;;  %s3023_s20 = sld [smem:[#allocation7 + $0x34]] }
 0xdea   :  { %v3027_v3 = vmul.f32 %v1087_v32, %v1082_v52  ;;  %v893_v32 = vstv %s2956_s29  ;;  %v1229_v52 = vstv %s2985_s13  ;;  %s3133_s29 = sld [smem:[#allocation7 + $0x1b]] }
 0xdeb   :  { %s3168_s13 = sld [smem:[#allocation7 + $0x4e]] }
 0xdec   :  { %s3258_s3 = sld [smem:[#allocation7 + $0x56]] }
 0xdee   :  { %v2907_v49 = vpop.permute.xlu1 %1071 }
 0xdef   :  { %v1083_v34 = vsel %vm1081_vm7, %v2907_v49, 0.0 }
 0xdf0   :  { %v1106_v53 = vmul.f32 %v1105_v27, %v1083_v34 }
 0xdf1   :  { %904 = vrot.lane.b32.xlu2 %v2786_v7, %s3776_s0 }
 0xdf6   :  { %v2954_v15 = vpop.permute.xlu1 %842 }
 0xdf7   :  { %v853_v37 = vsel %vm850_vm6, 0.0, %v2954_v15 }
 0xdf9   :  { %1135 = vrot.lane.b32.xlu2 %v2786_v7, %s3774_s23 }
 0xdfe   :  { %v1074_v54 = vpop.permute.xlu1 %1073 }
 0xdff   :  { %v1084_v49 = vsel %vm1081_vm7, %v1074_v54, 0.0 }
 0xe00   :  { %v1095_v54 = vmul.f32 %v1094_v6, %v1084_v49 }
 0xe33   :  { %v826_v41 = vpop.permute.xlu2 %825 }
 0xe34   :  { %829 = vst.msk [vmem:[#allocation2 + $0x6] sm:$0x3] %vm270_vm4, %v826_v41 }
 0xe3b   :  { %v2817_v42 = vld [vmem:[#allocation2 + $0x6] sm:$0x3]  ;;  %v2911_v51 = vpop.permute.xlu2 %964 }
 0xe3c   :  { %844 = vrot.lane.b32.xlu2 %v2817_v42, %s2462_s22  ;;  %906 = vrot.lane.b32.xlu0 %v2817_v42, %s3776_s0  ;;  %s2885_s22 = sld [smem:[#allocation7 + $0xc]]  ;;  %v976_v6 = vsel %vm974_vm9, 0.0, %v2911_v51  ;;  %v1051_v51 = vstv %s3023_s20 }
 0xe3d   :  { %968 = vrot.lane.b32.xlu1 %v2817_v42, %s3780_s24  ;;  %s2895_s0 = sld [smem:[#allocation7 + $0x48]] }
 0xe3e   :  { %s2899_s24 = sld [smem:[#allocation7 + $0x22]] }
 0xe3f   :  { %s3225_s20 = sld [smem:[#allocation7 + $0x30]] }
 0xe43   :  { %3785 = sst [smem:[#allocation13_spill]] %s2895_s0  ;;  %v2958_v16 = vpop.permute.xlu2 %1131 }
 0xe44   :  { %1075 = vrot.lane.b32.xlu2 %v2817_v42, %s3778_s16  ;;  %1137 = vrot.lane.b32.xlu0 %v2817_v42, %s3774_s23  ;;  %s2893_s23 = sld [smem:[#allocation7 + $0x2c]] }
 0xe45   :  { %1197 = vrot.lane.b32.xlu1 %v2786_v7, %s2466_s25  ;;  %s2897_s16 = sld [smem:[#allocation7 + $0x6]]  ;;  %v1152_v7 = vstv %s2885_s22 }
 0xe46   :  { %3786 = sst [smem:[#allocation14_spill]] %s2899_s24  ;;  %v3036_v60 = vmul.f32 %v1152_v7, %v1145_v55  ;;  %v1109_v7 = vstv %s2966_s8 }
 0xe47   :  { %s2913_s0 = sld [smem:[#allocation7 + $0x3f]] }
 0xe48   :  { %s2917_s24 = sld [smem:[#allocation7 + $0x2]] }
 0xe49   :  { %s3791_s12 = sld [smem:[#allocation13_spill]] }
 0xe4a   :  { %s3792_s15 = sld [smem:[#allocation14_spill]]  ;;  %v1002_v40 = vstv %s2893_s23 }
 0xe4b   :  { %v1211_v56 = vstv %s2897_s16  ;;  %s3794_s23 = sld [smem:[#allocation16_spill]]  ;;  %v3013_v62 = vpop.permute.xlu2 %904  ;;  %v3049_v10 = vmul.f32 %v1002_v40, %v977_v1  ;;  %v975_v40 = vsel %vm974_vm9, 0.0, %v2883_v47  ;;  %v894_v47 = vmul.f32 %v893_v32, %v853_v37 }
 0xe4c   :  { %1199 = vrot.lane.b32.xlu2 %v2817_v42, %s2466_s25  ;;  %s2887_s25 = sld [smem:[#allocation7 + $0x28]]  ;;  %v3055_v45 = vmul.f32 %v1211_v56, %v1206_v5  ;;  %v876_v56 = vadd.f32 %v875_v33, %v3001_v44 }
 0xe4d   :  { %s3032_s16 = sld [smem:[#allocation7 + $0x50]]  ;;  %v889_v20 = vstv %s2913_s0 }
 0xe4e   :  { %s3051_s22 = sld [smem:[#allocation7 + $0x21]]  ;;  %v980_v22 = vstv %s2917_s24  ;;  %v890_v36 = vmul.f32 %v889_v20, %v852_v29 }
 0xe4f   :  { %v1017_v41 = vstv %s3791_s12  ;;  %s3072_s12 = sld [smem:[#allocation7 + $0x2b]]  ;;  %v981_v17 = vmul.f32 %v980_v22, %v975_v40 }
 0xe50   :  { %v1226_v57 = vstv %s3792_s15  ;;  %v3053_v11 = vmul.f32 %v1017_v41, %v977_v1  ;;  %s3078_s15 = sld [smem:[#allocation7 + $0x47]]  ;;  %v1214_v41 = vstv %s2980_s11  ;;  %v879_v1 = vmul.f32 %v878_v31, %v853_v37 }
 0xe51   :  { %v859_v59 = vstv %s3794_s23  ;;  %v3057_v13 = vmul.f32 %v1226_v57, %v1206_v5  ;;  %s3101_s0 = sld [smem:[#allocation7 + $0x15]]  ;;  %v864_v57 = vmul.f32 %v863_v30, %v853_v37  ;;  %v1110_v5 = vmul.f32 %v1109_v7, %v1084_v49 }
 0xe52   :  { %v1167_v12 = vstv %s2887_s25  ;;  %s3061_s25 = sld [smem:[#allocation7 + $0x3d]]  ;;  %v860_v21 = vmul.f32 %v859_v59, %v852_v29  ;;  %v1125_v59 = vmul.f32 %v1124_v38, %v1084_v49  ;;  %v891_v29 = vadd.f32 %v890_v36, %v3007_v50 }
 0xe53   :  { %v3043_v61 = vmul.f32 %v1167_v12, %v1145_v55  ;;  %v1196_v12 = vpop.permute.xlu1 %1195  ;;  %v3091_v39 = vpop.permute.xlu2 %1135  ;;  %v1121_v55 = vmul.f32 %v1120_v28, %v1083_v34  ;;  %s3105_s24 = sld [smem:[#allocation7 + $0x31]]  ;;  %v996_v30 = vmul.f32 %v995_v24, %v975_v40  ;;  %v1011_v31 = vmul.f32 %v1010_v25, %v975_v40 }
 0xe54   :  { %v861_v35 = vadd.f32 %v860_v21, %v857_v43  ;;  %v1091_v43 = vmul.f32 %v1090_v26, %v1083_v34  ;;  %v1207_v15 = vsel %vm1205_vm10, %v1196_v12, 0.0  ;;  %v1107_v26 = vadd.f32 %v1106_v53, %v3029_v48  ;;  %s3151_s8 = sld [smem:[#allocation7 + $0x53]] }
 0xe55   :  { %v1215_v20 = vmul.f32 %v1214_v41, %v1207_v15  ;;  %v1230_v21 = vmul.f32 %v1229_v52, %v1207_v15  ;;  %v1122_v27 = vadd.f32 %v1121_v55, %v3034_v58  ;;  %v1245_v28 = vmul.f32 %v1244_v63, %v1207_v15  ;;  %s3163_s11 = sld [smem:[#allocation7 + $0x32]] }
 0xe56   :  { %v1092_v44 = vadd.f32 %v1091_v43, %v3027_v3  ;;  %v3117_v32 = vadd.f32 %v864_v57, %v861_v35  ;;  %v3119_v50 = vadd.f32 %v879_v1, %v876_v56  ;;  %v3123_v3 = vadd.f32 %v894_v47, %v891_v29  ;;  %s3196_s23 = sld [smem:[#allocation7 + $0x52]] }
 0xe57   :  { %v3127_v58 = vadd.f32 %v1110_v5, %v1107_v26  ;;  %v3129_v22 = vadd.f32 %v1125_v59, %v1122_v27  ;;  %v3136_v25 = vadd.f32 %v1215_v20, %v3055_v45  ;;  %v3139_v33 = vadd.f32 %v1230_v21, %v3057_v13 }
 0xe58   :  { %v3125_v48 = vadd.f32 %v1095_v54, %v1092_v44  ;;  %v983_v34 = vstv %s2994_s6  ;;  %v3147_v7 = vadd.f32 %v1245_v28, %v3059_v14  ;;  %v998_v12 = vstv %s2999_s1  ;;  %s3181_s6 = sld [smem:[#allocation7 + $0x33]] }
 0xe59   :  { %v1013_v35 = vstv %s3005_s17  ;;  %v1036_v45 = vstv %s3015_s19  ;;  %v1149_v13 = vstv %s3041_s21  ;;  %v1164_v36 = vstv %s3051_s22  ;;  %s3184_s1 = sld [smem:[#allocation7 + $0x4f]] }
 0xe5a   :  { %v1066_v37 = vstv %s3032_s16  ;;  %v984_v38 = vmul.f32 %v983_v34, %v976_v6  ;;  %v1179_v40 = vstv %s3061_s25  ;;  %v925_v14 = vstv %s3066_s4  ;;  %s3190_s17 = sld [smem:[#allocation7 + $0x36]]  ;;  %s3796_s25 = smov 1  }
 0xe5b   :  { %v940_v49 = vstv %s3072_s12  ;;  %v999_v41 = vmul.f32 %v998_v12, %v976_v6  ;;  %v1014_v52 = vmul.f32 %v1013_v35, %v976_v6  ;;  %v1144_v43 = vsel %vm1143_vm8, %v2958_v16, 0.0  ;;  %s3217_s19 = sld [smem:[#allocation7 + $0x14]]  ;;  %s3797_s4 = smov 127  }
 0xe5c   :  { %v955_v53 = vstv %s3078_s15  ;;  %v1156_v55 = vstv %s3084_s5  ;;  %v1171_v15 = vstv %s3089_s7  ;;  %v1186_v56 = vstv %s3098_s10  ;;  %s3232_s16 = sld [smem:[#allocation7 + $0x4c]]  ;;  %s3798_s5 = smov 2  }
 0xe5d   :  { %v867_v57 = vstv %s3101_s0  ;;  %v915_v1 = vsel %vm912_vm5, 0.0, %v3013_v62  ;;  %v1146_v63 = vsel %vm1143_vm8, %v3091_v39, 0.0  ;;  %v882_v47 = vstv %s3105_s24  ;;  %s3261_s21 = sld [smem:[#allocation7 + $0x55]]  ;;  %s3799_s7 = smov 126  }
 0xe5e   :  { %v1037_v16 = vmul.f32 %v1036_v45, %v2817_v42  ;;  %v985_v54 = vadd.f32 %v984_v38, %v981_v17  ;;  %v1150_v5 = vmul.f32 %v1149_v13, %v1144_v43  ;;  %v1052_v59 = vmul.f32 %v1051_v51, %v2817_v42  ;;  %s3264_s22 = sld [smem:[#allocation7 + $0x54]] }
 0xe5f   :  { %v1067_v29 = vmul.f32 %v1066_v37, %v2817_v42  ;;  %v1000_v20 = vadd.f32 %v999_v41, %v996_v30  ;;  %v1015_v21 = vadd.f32 %v1014_v52, %v1011_v31  ;;  %v1165_v62 = vmul.f32 %v1164_v36, %v1144_v43  ;;  %s2185_s12 = sld [smem:[#allocation7 + $0x59]] }
 0xe60   :  { %v1180_v44 = vmul.f32 %v1179_v40, %v1144_v43  ;;  %v926_v39 = vmul.f32 %v925_v14, %v915_v1  ;;  %v941_v26 = vmul.f32 %v940_v49, %v915_v1  ;;  %v956_v27 = vmul.f32 %v955_v53, %v915_v1  ;;  %s2186_s15 = sld [smem:[#allocation7 + $0x5c]] }
 0xe61   :  { %v1157_v28 = vmul.f32 %v1156_v55, %v1146_v63  ;;  %v1172_v17 = vmul.f32 %v1171_v15, %v1146_v63  ;;  %v1187_v6 = vmul.f32 %v1186_v56, %v1146_v63  ;;  %v897_v12 = vstv %s3107_s28  ;;  %s2183_s10 = sld [smem:[#allocation7 + $0x58]] }
 0xe62   :  { %v3194_v35 = vadd.f32 %v1037_v16, %v2962_v18  ;;  %v1154_v42 = vadd.f32 %v3036_v60, %v1150_v5  ;;  %v3200_v30 = vadd.f32 %v3047_v9, %v985_v54  ;;  %v3203_v31 = vadd.f32 %v1052_v59, %v2964_v19  ;;  %s2181_s0 = sld [smem:[#allocation7 + $0x57]] }
 0xe63   :  { %v3206_v45 = vadd.f32 %v1067_v29, %v2968_v23  ;;  %v1169_v13 = vadd.f32 %v3043_v61, %v1165_v62  ;;  %v1184_v18 = vadd.f32 %v3045_v8, %v1180_v44  ;;  %v1004_v36 = vadd.f32 %v3049_v10, %v1000_v20  ;;  %s2184_s24 = sld [smem:[#allocation7 + $0x5b]] }
 0xe64   :  { %v1019_v60 = vadd.f32 %v3053_v11, %v1015_v21  ;;  %v927_v9 = vadd.f32 %v926_v39, %v3017_v0  ;;  %v942_v19 = vadd.f32 %v941_v26, %v3019_v46  ;;  %v957_v23 = vadd.f32 %v956_v27, %v3025_v2  ;;  %s2182_s28 = sld [smem:[#allocation7 + $0x5a]] }
 0xe65   :  { %v3215_v51 = vadd.f32 %v1157_v28, %v1154_v42  ;;  %v3219_v61 = vadd.f32 %v1172_v17, %v1169_v13  ;;  %v3221_v8 = vadd.f32 %v1187_v6, %v1184_v18  ;;  %v1098_v0 = vstv %s3110_s18  ;;  %s3308_s18 = sld [smem:[#allocation7 + $0x64]] }
 0xe66   :  { %v1113_v10 = vstv %s3115_s26  ;;  %v1128_v2 = vstv %s3121_s27  ;;  %v1222_v11 = vstv %s3133_s29  ;;  %v1237_v37 = vstv %s3144_s30  ;;  %s3310_s26 = sld [smem:[#allocation7 + $0x6d]] }
 0xe67   :  { %v1252_v40 = vstv %s3151_s8  ;;  %v929_v14 = vstv %s3156_s9  ;;  %v944_v49 = vstv %s3163_s11  ;;  %v959_v41 = vstv %s3168_s13  ;;  %s3312_s27 = sld [smem:[#allocation7 + $0x76]] }
 0xe68   :  { %v991_v52 = vstv %s3174_s14  ;;  %v1006_v43 = vstv %s3181_s6  ;;  %v1021_v53 = vstv %s3184_s1  ;;  %v1160_v56 = vstv %s3188_s2  ;;  %s3314_s29 = sld [smem:[#allocation7 + $0x5e]] }
 0xe69   :  { %v1190_v1 = vstv %s3196_s23  ;;  %v1218_v27 = vstv %s3217_s19  ;;  %v1233_v17 = vstv %s3225_s20  ;;  %v1248_v13 = vstv %s3232_s16  ;;  %s3316_s30 = sld [smem:[#allocation7 + $0x67]] }
 0xe6a   :  { %s3318_s8 = sld [smem:[#allocation7 + $0x70]] }
 0xe6b   :  { %s3320_s9 = sld [smem:[#allocation7 + $0x61]] }
 0xe6c   :  { %s3322_s11 = sld [smem:[#allocation7 + $0x6a]] }
 0xe6d   :  { %s3324_s13 = sld [smem:[#allocation7 + $0x73]] }
 0xe6e   :  { %s3326_s14 = sld [smem:[#allocation7 + $0x63]] }
 0xe6f   :  { %s3328_s6 = sld [smem:[#allocation7 + $0x6c]] }
 0xe70   :  { %s3330_s1 = sld [smem:[#allocation7 + $0x75]] }
 0xe71   :  { %s3332_s2 = sld [smem:[#allocation7 + $0x65]] }
 0xe72   :  { %s3336_s23 = sld [smem:[#allocation7 + $0x60]] }
 0xe73   :  { %s3338_s19 = sld [smem:[#allocation7 + $0x69]] }
 0xe74   :  { %s3340_s20 = sld [smem:[#allocation7 + $0x72]] }
 0xe75   :  { %s3342_s16 = sld [smem:[#allocation7 + $0x5d]] }
 0xe96   :  { %v3131_v24 = vpop.permute.xlu2 %844 }
 0xe97   :  { %v854_v46 = vsel %vm850_vm6, 0.0, %v3131_v24  ;;  %v1175_v24 = vstv %s3190_s17  ;;  %s3334_s17 = sld [smem:[#allocation7 + $0x6e]] }
 0xe98   :  { %v868_v55 = vmul.f32 %v867_v57, %v854_v46  ;;  %v883_v63 = vmul.f32 %v882_v47, %v854_v46  ;;  %v898_v16 = vmul.f32 %v897_v12, %v854_v46 }
 0xe9a   :  { %v869_v18 = vadd.f32 %v868_v55, %v3117_v32  ;;  %v899_v46 = vadd.f32 %v898_v16, %v3123_v3 }
 0xe9e   :  { %v1076_v34 = vpop.permute.xlu2 %1075 }
 0xe9f   :  { %v1085_v38 = vsel %vm1081_vm7, %v1076_v34, 0.0 }
 0xea0   :  { %v1099_v54 = vmul.f32 %v1098_v0, %v1085_v38  ;;  %v1114_v57 = vmul.f32 %v1113_v10, %v1085_v38  ;;  %v1129_v39 = vmul.f32 %v1128_v2, %v1085_v38  ;;  %v884_v0 = vadd.f32 %v883_v63, %v3119_v50 }
 0xea2   :  { %v1100_v10 = vadd.f32 %v1099_v54, %v3125_v48  ;;  %v1115_v2 = vadd.f32 %v1114_v57, %v3127_v58  ;;  %v1130_v38 = vadd.f32 %v1129_v39, %v3129_v22 }
 0xea6   :  { %v1200_v5 = vpop.permute.xlu2 %1199 }
 0xea7   :  { %v1209_v28 = vsel %vm1205_vm10, %v1200_v5, 0.0 }
 0xeae   :  { %v907_v15 = vpop.permute.xlu0 %906 }
 0xeaf   :  { %v916_v59 = vsel %vm912_vm5, 0.0, %v907_v15  ;;  %v969_v29 = vpop.permute.xlu1 %968 }
 0xeb0   :  { %v930_v20 = vmul.f32 %v929_v14, %v916_v59  ;;  %v945_v21 = vmul.f32 %v944_v49, %v916_v59  ;;  %v960_v62 = vmul.f32 %v959_v41, %v916_v59  ;;  %v978_v44 = vsel %vm974_vm9, 0.0, %v969_v29 }
 0xeb1   :  { %v1007_v26 = vmul.f32 %v1006_v43, %v978_v44  ;;  %v992_v47 = vmul.f32 %v991_v52, %v978_v44  ;;  %v1022_v34 = vmul.f32 %v1021_v53, %v978_v44  ;;  %v1223_v14 = vmul.f32 %v1222_v11, %v1209_v28 }
 0xeb2   :  { %v931_v6 = vadd.f32 %v930_v20, %v927_v9  ;;  %v946_v12 = vadd.f32 %v945_v21, %v942_v19  ;;  %v961_v42 = vadd.f32 %v960_v62, %v957_v23  ;;  %v1238_v41 = vmul.f32 %v1237_v37, %v1209_v28 }
 0xeb3   :  { %v1008_v49 = vadd.f32 %v1007_v26, %v1004_v36  ;;  %v1253_v52 = vmul.f32 %v1252_v40, %v1209_v28  ;;  %v993_v9 = vadd.f32 %v992_v47, %v3200_v30  ;;  %v1023_v19 = vadd.f32 %v1022_v34, %v1019_v60 }
 0xeb4   :  { %v1255_v32 = vadd.f32 %v931_v6, %v869_v18  ;;  %v1265_v50 = vadd.f32 %v946_v12, %v884_v0  ;;  %v1275_v43 = vadd.f32 %v961_v42, %v899_v46  ;;  %v1282_v62 = vstv %s3258_s3  ;;  %s3344_s3 = sld [smem:[#allocation7 + $0x66]] }
 0xeb5   :  { %v1266_v30 = vadd.f32 %v3203_v31, %v1008_v49  ;;  %v1276_v53 = vadd.f32 %v3206_v45, %v1023_v19  ;;  %v1262_v44 = vstv %s3264_s22  ;;  %v1334_v46 = vstv %s2186_s15  ;;  %s3348_s22 = sld [smem:[#allocation7 + $0x62]] }
 0xeb6   :  { %v1138_v23 = vpop.permute.xlu0 %1137  ;;  %s3362_s15 = sld [smem:[#allocation7 + $0x5f]] }
 0xeb7   :  { %v1147_v3 = vsel %vm1143_vm8, %v1138_v23, 0.0  ;;  %v1198_v48 = vpop.permute.xlu1 %1197  ;;  %v1268_v29 = vadd.f32 %v1266_v30, %v1265_v50  ;;  %v1325_v23 = vstv %s2183_s10  ;;  %s3368_s10 = sld [smem:[#allocation7 + $0x68]] }
 0xeb8   :  { %v1161_v58 = vmul.f32 %v1160_v56, %v1147_v3  ;;  %v1176_v22 = vmul.f32 %v1175_v24, %v1147_v3  ;;  %v1191_v11 = vmul.f32 %v1190_v1, %v1147_v3  ;;  %v1208_v36 = vsel %vm1205_vm10, %v1198_v48, 0.0 }
 0xeb9   :  { %v1219_v60 = vmul.f32 %v1218_v27, %v1208_v36  ;;  %v1234_v37 = vmul.f32 %v1233_v17, %v1208_v36  ;;  %v1249_v40 = vmul.f32 %v1248_v13, %v1208_v36  ;;  %v1256_v56 = vadd.f32 %v3194_v35, %v993_v9 }
 0xeba   :  { %v1162_v55 = vadd.f32 %v1161_v58, %v3215_v51  ;;  %v1177_v15 = vadd.f32 %v1176_v22, %v3219_v61  ;;  %v1192_v63 = vadd.f32 %v1191_v11, %v3221_v8  ;;  %v1278_v61 = vadd.f32 %v1276_v53, %v1275_v43 }
 0xebb   :  { %v1220_v24 = vadd.f32 %v1219_v60, %v3136_v25  ;;  %v1235_v1 = vadd.f32 %v1234_v37, %v3139_v33  ;;  %v1250_v31 = vadd.f32 %v1249_v40, %v3147_v7  ;;  %v1258_v35 = vadd.f32 %v1256_v56, %v1255_v32 }
 0xebc   :  { %v1257_v16 = vadd.f32 %v1162_v55, %v1100_v10  ;;  %v1267_v54 = vadd.f32 %v1177_v15, %v1115_v2  ;;  %v1277_v45 = vadd.f32 %v1192_v63, %v1130_v38  ;;  %v1272_v25 = vstv %s3261_s21  ;;  %s3346_s21 = sld [smem:[#allocation7 + $0x6f]] }
 0xebd   :  { %v1224_v5 = vadd.f32 %v1223_v14, %v1220_v24  ;;  %v1239_v51 = vadd.f32 %v1238_v41, %v1235_v1  ;;  %v1254_v59 = vadd.f32 %v1253_v52, %v1250_v31  ;;  %v1331_v13 = vstv %s2185_s12  ;;  %s3356_s12 = sld [smem:[#allocation7 + $0x74]] }
 0xebe   :  { %v1319_v3 = vstv %s2181_s0  ;;  %v1328_v58 = vstv %s2184_s24  ;;  %v1322_v36 = vstv %s2182_s28  ;;  %v1385_v53 = vstv %s3308_s18  ;;  %s3374_s0 = sld [smem:[#allocation7 + $0x71]] }
 0xebf   :  { %v1279_v8 = vadd.f32 %v1277_v45, %v1254_v59  ;;  %v1269_v20 = vadd.f32 %v1267_v54, %v1239_v51  ;;  %v1259_v21 = vadd.f32 %v1257_v16, %v1224_v5  ;;  %v1423_v55 = vstv %s3310_s26  ;;  %s3391_s24 = sld [smem:[#allocation7 + $0x77]] }
 0xec0   :  { %v1461_v15 = vstv %s3312_s27  ;;  %v1376_v63 = vstv %s3320_s9  ;;  %v1382_v56 = vstv %s3326_s14  ;;  %v1420_v24 = vstv %s3328_s6  ;;  %s3401_s28 = sld [smem:[#allocation7 + $0x7a]] }
 0xec1   :  { %v1280_v57 = vadd.f32 %v1279_v8, %v1278_v61  ;;  %v1270_v33 = vadd.f32 %v1269_v20, %v1268_v29  ;;  %v1260_v39 = vadd.f32 %v1259_v21, %v1258_v35  ;;  %v1414_v31 = vstv %s3322_s11  ;;  %s3404_s18 = sld [smem:[#allocation7 + $0x79]] }
 0xec2   :  { %v1458_v16 = vstv %s3330_s1  ;;  %v1367_v54 = vstv %s3314_s29  ;;  %v1405_v45 = vstv %s3316_s30  ;;  %v1452_v5 = vstv %s3324_s13  ;;  %s3407_s26 = sld [smem:[#allocation7 + $0x78]] }
 0xec3   :  { %v1283_v26 = vadd.f32 %v1282_v62, %v1280_v57  ;;  %v1273_v7 = vadd.f32 %v1272_v25, %v1270_v33  ;;  %v1263_v27 = vadd.f32 %v1262_v44, %v1260_v39  ;;  %v1443_v8 = vstv %s3318_s8  ;;  %s3419_s27 = sld [smem:[#allocation7 + $0x82]] }
 0xec4   :  { %s3421_s29 = sld [smem:[#allocation7 + $0x8b]] }
 0xec5   :  { %v1284_v28 = vmax.f32 %v1283_v26, 0.0  ;;  %v1274_v47 = vmax.f32 %v1273_v7, 0.0  ;;  %v1264_v34 = vmax.f32 %v1263_v27, 0.0  ;;  %v1388_v26 = vstv %s3332_s2  ;;  %s3423_s30 = sld [smem:[#allocation7 + $0x94]] }
 0xec6   :  { %v1426_v7 = vstv %s3334_s17  ;;  %s3425_s8 = sld [smem:[#allocation7 + $0x7c]] }
 0xec7   :  { %1292 = vrot.lane.b32.xlu2 %v1284_v28, %s3796_s25  ;;  %1290 = vrot.lane.b32.xlu1 %v1274_v47, %s3796_s25  ;;  %s3427_s9 = sld [smem:[#allocation7 + $0x85]] }
 0xec8   :  { %1288 = vrot.lane.b32.xlu0 %v1264_v34, %s3796_s25  ;;  %s3429_s11 = sld [smem:[#allocation7 + $0x8e]] }
 0xec9   :  { %s3431_s13 = sld [smem:[#allocation7 + $0x7f]] }
 0xeca   :  { %s3433_s14 = sld [smem:[#allocation7 + $0x88]] }
 0xecb   :  { %s3435_s6 = sld [smem:[#allocation7 + $0x91]] }
 0xecc   :  { %s3437_s1 = sld [smem:[#allocation7 + $0x81]] }
 0xecd   :  { %s3439_s2 = sld [smem:[#allocation7 + $0x8a]] }
 0xece   :  { %s3441_s17 = sld [smem:[#allocation7 + $0x93]] }
 0xecf   :  { %1307 = vrot.lane.b32.xlu2 %v1284_v28, %s3797_s4  ;;  %1305 = vrot.lane.b32.xlu1 %v1274_v47, %s3797_s4 }
 0xed0   :  { %1303 = vrot.lane.b32.xlu0 %v1264_v34, %s3797_s4  ;;  %s3350_s4 = sld [smem:[#allocation7 + $0x6b]] }
 0xf21   :  { %v1293_v17 = vpop.permute.xlu2 %1292 }
 0xf22   :  { %v1299_v6 = vsel %vm974_vm9, 0.0, %v1293_v17  ;;  %v1449_v17 = vstv %s3340_s20  ;;  %s3447_s20 = sld [smem:[#allocation7 + $0x7e]] }
 0xf23   :  { %v1302_v12 = vmax.f32 %v1299_v6, %v1284_v28  ;;  %v1373_v28 = vstv %s3336_s23  ;;  %v1364_v6 = vstv %s3342_s16  ;;  %s3443_s23 = sld [smem:[#allocation7 + $0x83]] }
 0xf24   :  { %s3449_s16 = sld [smem:[#allocation7 + $0x87]] }
 0xf29   :  { %v1308_v42 = vpop.permute.xlu2 %1307 }
 0xf2a   :  { %v1314_v18 = vsel %vm1081_vm7, %v1308_v42, 0.0 }
 0xf2b   :  { %v1317_v0 = vmax.f32 %v1302_v12, %v1314_v18 }
 0xf2d   :  { %v1332_v10 = vmul.f32 %v1331_v13, %v1317_v0  ;;  %v1402_v0 = vstv %s3344_s3  ;;  %s3451_s3 = sld [smem:[#allocation7 + $0x90]] }
 0xf2f   :  { %v3286_v2 = vadd.f32 %v1334_v46, %v1332_v10 }
 0xf31   :  { %1343 = vrot.lane.b32.xlu2 %v3286_v2, %s3798_s5  ;;  %v1386_v51 = vmul.f32 %v1385_v53, %v3286_v2  ;;  %v1424_v59 = vmul.f32 %v1423_v55, %v3286_v2  ;;  %v1462_v61 = vmul.f32 %v1461_v15, %v3286_v2 }
 0xf39   :  { %1355 = vrot.lane.b32.xlu2 %v3286_v2, %s3799_s7  ;;  %v1291_v38 = vpop.permute.xlu1 %1290 }
 0xf3a   :  { %v1289_v14 = vpop.permute.xlu0 %1288  ;;  %v1298_v49 = vsel %vm974_vm9, 0.0, %v1291_v38  ;;  %v1440_v38 = vstv %s3346_s21  ;;  %s3453_s21 = sld [smem:[#allocation7 + $0x7b]] }
 0xf3b   :  { %v1297_v41 = vsel %vm974_vm9, 0.0, %v1289_v14  ;;  %v1301_v52 = vmax.f32 %v1298_v49, %v1274_v47  ;;  %v1379_v14 = vstv %s3348_s22  ;;  %s3455_s22 = sld [smem:[#allocation7 + $0x84]] }
 0xf3c   :  { %v1300_v19 = vmax.f32 %v1297_v41, %v1264_v34  ;;  %v1411_v34 = vstv %s3338_s19  ;;  %v1417_v41 = vstv %s3350_s4  ;;  %s3445_s19 = sld [smem:[#allocation7 + $0x8c]] }
 0xf3d   :  { %s3457_s4 = sld [smem:[#allocation7 + $0x8d]] }
 0xf41   :  { %v1306_v9 = vpop.permute.xlu1 %1305 }
 0xf42   :  { %v1313_v32 = vsel %vm1081_vm7, %v1306_v9, 0.0  ;;  %v1304_v50 = vpop.permute.xlu0 %1303  ;;  %v1370_v9 = vstv %s3362_s15  ;;  %s3461_s15 = sld [smem:[#allocation7 + $0x89]] }
 0xf43   :  { %v1316_v43 = vmax.f32 %v1301_v52, %v1313_v32  ;;  %v1312_v48 = vsel %vm1081_vm7, %v1304_v50, 0.0  ;;  %v1455_v52 = vstv %s3356_s12  ;;  %v1408_v50 = vstv %s3368_s10  ;;  %s3459_s12 = sld [smem:[#allocation7 + $0x80]] }
 0xf44   :  { %v1315_v22 = vmax.f32 %v1300_v19, %v1312_v48  ;;  %s3463_s10 = sld [smem:[#allocation7 + $0x92]] }
 0xf45   :  { %v1326_v11 = vmul.f32 %v1325_v23, %v1316_v43  ;;  %v1446_v43 = vstv %s3374_s0  ;;  %s3469_s0 = sld [smem:[#allocation7 + $0x7d]] }
 0xf46   :  { %v1320_v30 = vmul.f32 %v1319_v3, %v1315_v22 }
 0xf47   :  { %v3296_v60 = vadd.f32 %v1328_v58, %v1326_v11 }
 0xf48   :  { %v3298_v37 = vadd.f32 %v1322_v36, %v1320_v30 }
 0xf49   :  { %1341 = vrot.lane.b32.xlu1 %v3296_v60, %s3798_s5  ;;  %v1377_v62 = vmul.f32 %v1376_v63, %v3296_v60  ;;  %v1415_v25 = vmul.f32 %v1414_v31, %v3296_v60  ;;  %v1453_v39 = vmul.f32 %v1452_v5, %v3296_v60 }
 0xf4a   :  { %1339 = vrot.lane.b32.xlu0 %v3298_v37, %s3798_s5  ;;  %v1368_v57 = vmul.f32 %v1367_v54, %v3298_v37  ;;  %v1406_v33 = vmul.f32 %v1405_v45, %v3298_v37  ;;  %v1444_v47 = vmul.f32 %v1443_v8, %v3298_v37 }
 0xf51   :  { %1353 = vrot.lane.b32.xlu1 %v3296_v60, %s3799_s7 }
 0xf52   :  { %1351 = vrot.lane.b32.xlu0 %v3298_v37, %s3799_s7 }
 0xf8b   :  { %v1344_v40 = vpop.permute.xlu2 %1343 }
 0xf8c   :  { %v1350_v1 = vsel %vm912_vm5, 0.0, %v1344_v40 }
 0xf8d   :  { %v1383_v20 = vmul.f32 %v1382_v56, %v1350_v1  ;;  %v1421_v35 = vmul.f32 %v1420_v24, %v1350_v1  ;;  %v1459_v44 = vmul.f32 %v1458_v16, %v1350_v1 }
 0xf8f   :  { %v1393_v42 = vadd.f32 %v1386_v51, %v1383_v20  ;;  %v1431_v13 = vadd.f32 %v1424_v59, %v1421_v35  ;;  %v1469_v46 = vadd.f32 %v1462_v61, %v1459_v44  ;;  %v1464_v59 = vstv %s3391_s24  ;;  %s3475_s24 = sld [smem:[#allocation7 + $0x86]] }
 0xf93   :  { %v1356_v27 = vpop.permute.xlu2 %1355 }
 0xf94   :  { %v1362_v10 = vsel %vm1143_vm8, %v1356_v27, 0.0  ;;  %v1475_v27 = vstv %s3401_s28  ;;  %s3481_s28 = sld [smem:[#allocation7 + $0x8f]] }
 0xf95   :  { %v1389_v44 = vmul.f32 %v1388_v26, %v1362_v10 }
 0xfbb   :  { %v1342_v29 = vpop.permute.xlu1 %1341 }
 0xfbc   :  { %v1340_v21 = vpop.permute.xlu0 %1339  ;;  %v1349_v18 = vsel %vm912_vm5, 0.0, %v1342_v29 }
 0xfbd   :  { %v1348_v12 = vsel %vm912_vm5, 0.0, %v1340_v21  ;;  %v1374_v19 = vmul.f32 %v1373_v28, %v1349_v18  ;;  %v1412_v3 = vmul.f32 %v1411_v34, %v1349_v18  ;;  %v1450_v48 = vmul.f32 %v1449_v17, %v1349_v18 }
 0xfbe   :  { %v1365_v49 = vmul.f32 %v1364_v6, %v1348_v12  ;;  %v1403_v23 = vmul.f32 %v1402_v0, %v1348_v12  ;;  %v1441_v58 = vmul.f32 %v1440_v38, %v1348_v12  ;;  %v1437_v28 = vstv %s3404_s18  ;;  %s3495_s18 = sld [smem:[#allocation7 + $0x95]] }
 0xfbf   :  { %v1605_v38 = vstv %s3423_s30  ;;  %s3536_s30 = sld [smem:[#allocation7 + $0xa0]] }
 0xfc0   :  { %v1390_v55 = vadd.f32 %v1368_v57, %v1365_v49  ;;  %v1428_v24 = vadd.f32 %v1406_v33, %v1403_v23  ;;  %v1466_v54 = vadd.f32 %v1444_v47, %v1441_v58  ;;  %v1427_v57 = vmul.f32 %v1426_v7, %v1362_v10 }
 0xfc1   :  { %v1465_v33 = vmul.f32 %v1464_v59, %v1362_v10  ;;  %v1399_v47 = vstv %s3407_s26  ;;  %v1529_v7 = vstv %s3419_s27  ;;  %v1567_v10 = vstv %s3421_s29  ;;  %s3503_s26 = sld [smem:[#allocation7 + $0x96]] }
 0xfc2   :  { %v1549_v49 = vstv %s3427_s9  ;;  %v1564_v23 = vstv %s3439_s2  ;;  %s3506_s27 = sld [smem:[#allocation7 + $0x97]] }
 0xfc3   :  { %v1354_v32 = vpop.permute.xlu1 %1353  ;;  %s3508_s29 = sld [smem:[#allocation7 + $0x98]] }
 0xfc4   :  { %v1361_v22 = vsel %vm1143_vm8, %v1354_v32, 0.0  ;;  %v1352_v11 = vpop.permute.xlu0 %1351  ;;  %v1602_v32 = vstv %s3441_s17  ;;  %s3540_s9 = sld [smem:[#allocation7 + $0xb2]] }
 0xfc5   :  { %v1380_v36 = vmul.f32 %v1379_v14, %v1361_v22  ;;  %v1418_v30 = vmul.f32 %v1417_v41, %v1361_v22  ;;  %v1456_v40 = vmul.f32 %v1455_v52, %v1361_v22  ;;  %v1360_v53 = vsel %vm1143_vm8, %v1352_v11, 0.0  ;;  %s3552_s2 = sld [smem:[#allocation7 + $0xaf]] }
 0xfc6   :  { %v1371_v15 = vmul.f32 %v1370_v9, %v1360_v53  ;;  %v1409_v63 = vmul.f32 %v1408_v50, %v1360_v53  ;;  %v1447_v56 = vmul.f32 %v1446_v43, %v1360_v53  ;;  %v1511_v14 = vstv %s3425_s8  ;;  %s3538_s8 = sld [smem:[#allocation7 + $0xa9]] }
 0xfc7   :  { %v1392_v1 = vadd.f32 %v1380_v36, %v1377_v62  ;;  %v1430_v31 = vadd.f32 %v1418_v30, %v1415_v25  ;;  %v1468_v16 = vadd.f32 %v1456_v40, %v1453_v39  ;;  %v1587_v41 = vstv %s3429_s11  ;;  %s3542_s11 = sld [smem:[#allocation7 + $0x9a]] }
 0xfc8   :  { %v1391_v45 = vadd.f32 %v1374_v19, %v1371_v15  ;;  %v1429_v5 = vadd.f32 %v1412_v3, %v1409_v63  ;;  %v1467_v51 = vadd.f32 %v1450_v48, %v1447_v56  ;;  %v1520_v52 = vstv %s3431_s13  ;;  %s3544_s13 = sld [smem:[#allocation7 + $0xa3]] }
 0xfc9   :  { %v1395_v61 = vadd.f32 %v1393_v42, %v1392_v1  ;;  %v1433_v29 = vadd.f32 %v1431_v13, %v1430_v31  ;;  %v1471_v8 = vadd.f32 %v1469_v46, %v1468_v16  ;;  %v1558_v9 = vstv %s3433_s14  ;;  %s3546_s14 = sld [smem:[#allocation7 + $0xac]] }
 0xfca   :  { %v1394_v20 = vadd.f32 %v1391_v45, %v1390_v55  ;;  %v1432_v35 = vadd.f32 %v1429_v5, %v1428_v24  ;;  %v1470_v21 = vadd.f32 %v1467_v51, %v1466_v54  ;;  %v1526_v19 = vstv %s3437_s1  ;;  %s3550_s1 = sld [smem:[#allocation7 + $0xa6]] }
 0xfcb   :  { %v1596_v50 = vstv %s3435_s6  ;;  %v1532_v55 = vstv %s3443_s23  ;;  %v1570_v15 = vstv %s3445_s19  ;;  %v1517_v31 = vstv %s3447_s20  ;;  %s3548_s6 = sld [smem:[#allocation7 + $0x9d]] }
 0xfcc   :  { %v1396_v62 = vadd.f32 %v1395_v61, %v1394_v20  ;;  %v1434_v25 = vadd.f32 %v1433_v29, %v1432_v35  ;;  %v1472_v39 = vadd.f32 %v1471_v8, %v1470_v21  ;;  %v1555_v16 = vstv %s3449_s16  ;;  %s3554_s17 = sld [smem:[#allocation7 + $0x9f]] }
 0xfcd   :  { %v1593_v45 = vstv %s3451_s3  ;;  %v1508_v5 = vstv %s3453_s21  ;;  %v1546_v29 = vstv %s3455_s22  ;;  %v1584_v8 = vstv %s3457_s4  ;;  %s3556_s23 = sld [smem:[#allocation7 + $0xa8]] }
 0xfce   :  { %v1397_v34 = vadd.f32 %v1396_v62, %v1389_v44  ;;  %v1435_v17 = vadd.f32 %v1434_v25, %v1427_v57  ;;  %v1473_v6 = vadd.f32 %v1472_v39, %v1465_v33  ;;  %v1523_v20 = vstv %s3459_s12  ;;  %s3558_s19 = sld [smem:[#allocation7 + $0xb1]] }
 0xfcf   :  { %v1561_v35 = vstv %s3461_s15  ;;  %v1599_v21 = vstv %s3463_s10  ;;  %v1514_v44 = vstv %s3469_s0  ;;  %v1552_v57 = vstv %s3475_s24  ;;  %s3560_s20 = sld [smem:[#allocation7 + $0xa1]] }
 0xfd0   :  { %v1476_v12 = vadd.f32 %v1475_v27, %v1473_v6  ;;  %v1438_v18 = vadd.f32 %v1437_v28, %v1435_v17  ;;  %v1400_v42 = vadd.f32 %v1399_v47, %v1397_v34  ;;  %v1590_v39 = vstv %s3481_s28  ;;  %s3562_s16 = sld [smem:[#allocation7 + $0xaa]] }
 0xfd1   :  { %s3564_s3 = sld [smem:[#allocation7 + $0x9c]] }
 0xfd2   :  { %v1479_v13 = vmax.f32 %v1476_v12, 0.0  ;;  %v1478_v0 = vmax.f32 %v1438_v18, 0.0  ;;  %v1477_v46 = vmax.f32 %v1400_v42, 0.0  ;;  %s3566_s21 = sld [smem:[#allocation7 + $0xa5]] }
 0xfd3   :  { %s3568_s22 = sld [smem:[#allocation7 + $0xae]] }
 0xfd4   :  { %1487 = vrot.lane.b32.xlu2 %v1479_v13, %s3798_s5  ;;  %1485 = vrot.lane.b32.xlu1 %v1478_v0, %s3798_s5  ;;  %v1530_v3 = vmul.f32 %v1529_v7, %v1479_v13  ;;  %v1568_v48 = vmul.f32 %v1567_v10, %v1479_v13  ;;  %v1606_v58 = vmul.f32 %v1605_v38, %v1479_v13  ;;  %s3570_s4 = sld [smem:[#allocation7 + $0x99]] }
 0xfd5   :  { %1483 = vrot.lane.b32.xlu0 %v1477_v46, %s3798_s5  ;;  %v1512_v36 = vmul.f32 %v1511_v14, %v1477_v46  ;;  %v1550_v30 = vmul.f32 %v1549_v49, %v1477_v46  ;;  %v1588_v40 = vmul.f32 %v1587_v41, %v1477_v46  ;;  %v1521_v53 = vmul.f32 %v1520_v52, %v1478_v0  ;;  %s3572_s12 = sld [smem:[#allocation7 + $0xa2]] }
 0xfd6   :  { %v1559_v63 = vmul.f32 %v1558_v9, %v1478_v0  ;;  %v1597_v56 = vmul.f32 %v1596_v50, %v1478_v0  ;;  %s3574_s15 = sld [smem:[#allocation7 + $0xab]] }
 0xfd7   :  { %s3576_s10 = sld [smem:[#allocation7 + $0x9e]] }
 0xfd8   :  { %s3578_s0 = sld [smem:[#allocation7 + $0xa7]] }
 0xfd9   :  { %s3580_s24 = sld [smem:[#allocation7 + $0xb0]] }
 0xfda   :  { %s3586_s28 = sld [smem:[#allocation7 + $0x9b]] }
 0xfdc   :  { %1499 = vrot.lane.b32.xlu2 %v1479_v13, %s3799_s7  ;;  %1497 = vrot.lane.b32.xlu1 %v1478_v0, %s3799_s7 }
 0xfdd   :  { %1495 = vrot.lane.b32.xlu0 %v1477_v46, %s3799_s7 }
0x102e   :  { %v1488_v26 = vpop.permute.xlu2 %1487 }
0x102f   :  { %v1494_v43 = vsel %vm912_vm5, 0.0, %v1488_v26 }
0x1030   :  { %v1527_v24 = vmul.f32 %v1526_v19, %v1494_v43  ;;  %v1565_v1 = vmul.f32 %v1564_v23, %v1494_v43  ;;  %v1603_v54 = vmul.f32 %v1602_v32, %v1494_v43 }
0x1032   :  { %v1537_v33 = vadd.f32 %v1530_v3, %v1527_v24  ;;  %v1575_v62 = vadd.f32 %v1568_v48, %v1565_v1  ;;  %v1613_v27 = vadd.f32 %v1606_v58, %v1603_v54  ;;  %v1608_v3 = vstv %s3495_s18  ;;  %s3592_s18 = sld [smem:[#allocation7 + $0xa4]] }
0x1033   :  { %v1619_v54 = vstv %s3508_s29  ;;  %s3629_s29 = sld [smem:[#allocation7 + $0xb6]] }
0x1036   :  { %v1500_v59 = vpop.permute.xlu2 %1499 }
0x1037   :  { %v1506_v28 = vsel %vm1143_vm8, %v1500_v59, 0.0 }
0x1038   :  { %v1533_v1 = vmul.f32 %v1532_v55, %v1506_v28 }
0x1046   :  { %v1486_v22 = vpop.permute.xlu1 %1485 }
0x1047   :  { %v1484_v11 = vpop.permute.xlu0 %1483  ;;  %v1493_v61 = vsel %vm912_vm5, 0.0, %v1486_v22 }
0x1048   :  { %v1492_v51 = vsel %vm912_vm5, 0.0, %v1484_v11  ;;  %v1518_v47 = vmul.f32 %v1517_v31, %v1493_v61  ;;  %v1556_v6 = vmul.f32 %v1555_v16, %v1493_v61  ;;  %v1594_v12 = vmul.f32 %v1593_v45, %v1493_v61 }
0x1049   :  { %v1509_v25 = vmul.f32 %v1508_v5, %v1492_v51  ;;  %v1547_v34 = vmul.f32 %v1546_v29, %v1492_v51  ;;  %v1585_v18 = vmul.f32 %v1584_v8, %v1492_v51  ;;  %v1571_v31 = vmul.f32 %v1570_v15, %v1506_v28 }
0x104a   :  { %v1581_v16 = vstv %s3506_s27  ;;  %s3621_s27 = sld [smem:[#allocation7 + $0xb3]] }
0x104b   :  { %v1534_v10 = vadd.f32 %v1512_v36, %v1509_v25  ;;  %v1572_v41 = vadd.f32 %v1550_v30, %v1547_v34  ;;  %v1610_v23 = vadd.f32 %v1588_v40, %v1585_v18  ;;  %v1609_v30 = vmul.f32 %v1608_v3, %v1506_v28 }
0x104c   :  { %v1543_v40 = vstv %s3503_s26  ;;  %v1667_v25 = vstv %s3548_s6  ;;  %v1711_v28 = vstv %s3556_s23  ;;  %v1743_v34 = vstv %s3552_s2  ;;  %s3598_s26 = sld [smem:[#allocation7 + $0xad]] }
0x104d   :  { %s3655_s6 = sld [smem:[#allocation7 + $0xc1]] }
0x104e   :  { %v1498_v17 = vpop.permute.xlu1 %1497  ;;  %s3659_s2 = sld [smem:[#allocation7 + $0xbb]] }
0x104f   :  { %v1505_v42 = vsel %vm1143_vm8, %v1498_v17, 0.0  ;;  %v1496_v13 = vpop.permute.xlu0 %1495  ;;  %s3663_s23 = sld [smem:[#allocation7 + $0xcd]] }
0x1050   :  { %v1524_v0 = vmul.f32 %v1523_v20, %v1505_v42  ;;  %v1562_v46 = vmul.f32 %v1561_v35, %v1505_v42  ;;  %v1600_v26 = vmul.f32 %v1599_v21, %v1505_v42  ;;  %v1504_v7 = vsel %vm1143_vm8, %v1496_v13, 0.0 }
0x1051   :  { %v1515_v38 = vmul.f32 %v1514_v44, %v1504_v7  ;;  %v1553_v14 = vmul.f32 %v1552_v57, %v1504_v7  ;;  %v1591_v49 = vmul.f32 %v1590_v39, %v1504_v7  ;;  %v1752_v44 = vstv %s3540_s9  ;;  %s3647_s9 = sld [smem:[#allocation7 + $0xbe]] }
0x1052   :  { %v1536_v52 = vadd.f32 %v1524_v0, %v1521_v53  ;;  %v1574_v9 = vadd.f32 %v1562_v46, %v1559_v63  ;;  %v1612_v19 = vadd.f32 %v1600_v26, %v1597_v56  ;;  %v1658_v57 = vstv %s3542_s11  ;;  %s3649_s11 = sld [smem:[#allocation7 + $0xc7]] }
0x1053   :  { %v1535_v32 = vadd.f32 %v1518_v47, %v1515_v38  ;;  %v1573_v50 = vadd.f32 %v1556_v6, %v1553_v14  ;;  %v1611_v43 = vadd.f32 %v1594_v12, %v1591_v49  ;;  %v1705_v39 = vstv %s3550_s1  ;;  %s3657_s1 = sld [smem:[#allocation7 + $0xca]] }
0x1054   :  { %v1539_v48 = vadd.f32 %v1537_v33, %v1536_v52  ;;  %v1577_v58 = vadd.f32 %v1575_v62, %v1574_v9  ;;  %v1615_v22 = vadd.f32 %v1613_v27, %v1612_v19  ;;  %v1696_v33 = vstv %s3544_s13  ;;  %s3651_s13 = sld [smem:[#allocation7 + $0xd0]] }
0x1055   :  { %v1538_v11 = vadd.f32 %v1535_v32, %v1534_v10  ;;  %v1576_v36 = vadd.f32 %v1573_v50, %v1572_v41  ;;  %v1614_v24 = vadd.f32 %v1611_v43, %v1610_v23  ;;  %v1734_v62 = vstv %s3546_s14  ;;  %s3653_s14 = sld [smem:[#allocation7 + $0xb8]] }
0x1056   :  { %v1673_v27 = vstv %s3554_s17  ;;  %v1749_v47 = vstv %s3558_s19  ;;  %v1679_v10 = vstv %s3560_s20  ;;  %v1717_v38 = vstv %s3562_s16  ;;  %s3661_s17 = sld [smem:[#allocation7 + $0xc4]] }
0x1057   :  { %v1540_v53 = vadd.f32 %v1539_v48, %v1538_v11  ;;  %v1578_v63 = vadd.f32 %v1577_v58, %v1576_v36  ;;  %v1616_v56 = vadd.f32 %v1615_v22, %v1614_v24  ;;  %v1664_v9 = vstv %s3564_s3  ;;  %s3667_s19 = sld [smem:[#allocation7 + $0xc6]] }
0x1058   :  { %v1702_v19 = vstv %s3566_s21  ;;  %v1740_v32 = vstv %s3568_s22  ;;  %v1655_v50 = vstv %s3570_s4  ;;  %v1693_v58 = vstv %s3572_s12  ;;  %s3669_s20 = sld [smem:[#allocation7 + $0xcf]] }
0x1059   :  { %v1541_v45 = vadd.f32 %v1540_v53, %v1533_v1  ;;  %v1579_v5 = vadd.f32 %v1578_v63, %v1571_v31  ;;  %v1617_v51 = vadd.f32 %v1616_v56, %v1609_v30  ;;  %v1731_v22 = vstv %s3574_s15  ;;  %s3671_s16 = sld [smem:[#allocation7 + $0xbf]] }
0x105a   :  { %v1670_v11 = vstv %s3576_s10  ;;  %v1708_v36 = vstv %s3578_s0  ;;  %v1746_v24 = vstv %s3580_s24  ;;  %v1661_v1 = vstv %s3586_s28  ;;  %s3673_s3 = sld [smem:[#allocation7 + $0xc8]] }
0x105b   :  { %v1544_v59 = vadd.f32 %v1543_v40, %v1541_v45  ;;  %v1582_v61 = vadd.f32 %v1581_v16, %v1579_v5  ;;  %v1620_v29 = vadd.f32 %v1619_v54, %v1617_v51  ;;  %v1699_v31 = vstv %s3592_s18  ;;  %s3675_s21 = sld [smem:[#allocation7 + $0xba]] }
0x105c   :  { %v1737_v56 = vstv %s3598_s26  ;;  %s3677_s22 = sld [smem:[#allocation7 + $0xc3]] }
0x105d   :  { %v1621_v8 = vadd.f32 %v1544_v59, %v3298_v37  ;;  %v1623_v20 = vadd.f32 %v1582_v61, %v3296_v60  ;;  %v1625_v55 = vadd.f32 %v1620_v29, %v3286_v2  ;;  %v1676_v60 = vstv %s3536_s30  ;;  %s3632_s30 = sld [smem:[#allocation7 + $0xb5]] }
0x105e   :  { %v1714_v37 = vstv %s3538_s8  ;;  %s3635_s8 = sld [smem:[#allocation7 + $0xb4]] }
0x105f   :  { %v3518_v15 = vmax.f32 %v1621_v8, 0.0  ;;  %v3520_v35 = vmax.f32 %v1623_v20, 0.0  ;;  %v3522_v21 = vmax.f32 %v1625_v55, 0.0  ;;  %s3679_s4 = sld [smem:[#allocation7 + $0xcc]] }
0x1060   :  { %s3681_s12 = sld [smem:[#allocation7 + $0xb7]] }
0x1061   :  { %1634 = vrot.lane.b32.xlu2 %v3522_v21, %s3798_s5  ;;  %1632 = vrot.lane.b32.xlu1 %v3520_v35, %s3798_s5  ;;  %v1677_v6 = vmul.f32 %v1676_v60, %v3522_v21  ;;  %v1715_v12 = vmul.f32 %v1714_v37, %v3522_v21  ;;  %v1753_v18 = vmul.f32 %v1752_v44, %v3522_v21  ;;  %s3683_s15 = sld [smem:[#allocation7 + $0xc0]] }
0x1062   :  { %1630 = vrot.lane.b32.xlu0 %v3518_v15, %s3798_s5  ;;  %v1659_v0 = vmul.f32 %v1658_v57, %v3518_v15  ;;  %v1697_v46 = vmul.f32 %v1696_v33, %v3518_v15  ;;  %v1735_v26 = vmul.f32 %v1734_v62, %v3518_v15  ;;  %v1668_v7 = vmul.f32 %v1667_v25, %v3520_v35  ;;  %s3685_s10 = sld [smem:[#allocation7 + $0xc9]] }
0x1063   :  { %v1706_v14 = vmul.f32 %v1705_v39, %v3520_v35  ;;  %v1744_v49 = vmul.f32 %v1743_v34, %v3520_v35  ;;  %s3687_s0 = sld [smem:[#allocation7 + $0xbc]] }
0x1064   :  { %s3689_s24 = sld [smem:[#allocation7 + $0xc5]] }
0x1065   :  { %s3691_s28 = sld [smem:[#allocation7 + $0xce]] }
0x1066   :  { %s3697_s18 = sld [smem:[#allocation7 + $0xb9]] }
0x1067   :  { %s3703_s26 = sld [smem:[#allocation7 + $0xc2]] }
0x1069   :  { %1646 = vrot.lane.b32.xlu2 %v3522_v21, %s3799_s7  ;;  %1644 = vrot.lane.b32.xlu1 %v3520_v35, %s3799_s7 }
0x106a   :  { %1642 = vrot.lane.b32.xlu0 %v3518_v15, %s3799_s7 }
0x10bb   :  { %v1635_v2 = vpop.permute.xlu2 %1634 }
0x10bc   :  { %v1641_v17 = vsel %vm912_vm5, 0.0, %v1635_v2 }
0x10bd   :  { %v1674_v41 = vmul.f32 %v1673_v27, %v1641_v17  ;;  %v1712_v52 = vmul.f32 %v1711_v28, %v1641_v17  ;;  %v1750_v23 = vmul.f32 %v1749_v47, %v1641_v17 }
0x10bf   :  { %v1684_v30 = vadd.f32 %v1677_v6, %v1674_v41  ;;  %v1722_v53 = vadd.f32 %v1715_v12, %v1712_v52  ;;  %v1760_v40 = vadd.f32 %v1753_v18, %v1750_v23  ;;  %v1755_v6 = vstv %s3621_s27  ;;  %s3709_s27 = sld [smem:[#allocation7 + $0xcb]] }
0x10c0   :  { %v1690_v23 = vstv %s3635_s8  ;;  %s3734_s8 = sld [smem:[#allocation7 + $0xd3]] }
0x10c3   :  { %v1647_v3 = vpop.permute.xlu2 %1646 }
0x10c4   :  { %v1653_v16 = vsel %vm1143_vm8, %v1647_v3, 0.0 }
0x10c5   :  { %v1680_v52 = vmul.f32 %v1679_v10, %v1653_v16 }
0x10d3   :  { %v1633_v42 = vpop.permute.xlu1 %1632 }
0x10d4   :  { %v1631_v13 = vpop.permute.xlu0 %1630  ;;  %v1640_v48 = vsel %vm912_vm5, 0.0, %v1633_v42 }
0x10d5   :  { %v1639_v43 = vsel %vm912_vm5, 0.0, %v1631_v13  ;;  %v1665_v54 = vmul.f32 %v1664_v9, %v1640_v48  ;;  %v1703_v51 = vmul.f32 %v1702_v19, %v1640_v48  ;;  %v1741_v59 = vmul.f32 %v1740_v32, %v1640_v48 }
0x10d6   :  { %v1656_v63 = vmul.f32 %v1655_v50, %v1639_v43  ;;  %v1694_v45 = vmul.f32 %v1693_v58, %v1639_v43  ;;  %v1732_v61 = vmul.f32 %v1731_v22, %v1639_v43  ;;  %v1718_v9 = vmul.f32 %v1717_v38, %v1653_v16 }
0x10d7   :  { %v1728_v19 = vstv %s3632_s30  ;;  %v1820_v38 = vstv %s3647_s9  ;;  %s3731_s30 = sld [smem:[#allocation7 + $0xd4]] }
0x10d8   :  { %v1681_v37 = vadd.f32 %v1659_v0, %v1656_v63  ;;  %v1719_v62 = vadd.f32 %v1697_v46, %v1694_v45  ;;  %v1757_v28 = vadd.f32 %v1735_v26, %v1732_v61  ;;  %v1756_v46 = vmul.f32 %v1755_v6, %v1653_v16  ;;  %s3737_s9 = sld [smem:[#allocation7 + $0xd2]] }
0x10d9   :  { %v1766_v26 = vstv %s3629_s29  ;;  %v1811_v63 = vstv %s3659_s2  ;;  %v1855_v16 = vstv %s3667_s19  ;;  %v1887_v45 = vstv %s3663_s23  ;;  %s3723_s29 = sld [smem:[#allocation7 + $0xd1]]  ;;  %s2471_s23 = smov [#allocation8]  }
0x10db   :  { %v1645_v5 = vpop.permute.xlu1 %1644 }
0x10dc   :  { %v1652_v29 = vsel %vm1143_vm8, %v1645_v5, 0.0  ;;  %v1643_v8 = vpop.permute.xlu0 %1642 }
0x10dd   :  { %v1671_v20 = vmul.f32 %v1670_v11, %v1652_v29  ;;  %v1709_v55 = vmul.f32 %v1708_v36, %v1652_v29  ;;  %v1747_v2 = vmul.f32 %v1746_v24, %v1652_v29  ;;  %v1651_v60 = vsel %vm1143_vm8, %v1643_v8, 0.0 }
0x10de   :  { %v1662_v44 = vmul.f32 %v1661_v1, %v1651_v60  ;;  %v1700_v57 = vmul.f32 %v1699_v31, %v1651_v60  ;;  %v1738_v33 = vmul.f32 %v1737_v56, %v1651_v60  ;;  %v1858_v24 = vstv %s3649_s11  ;;  %s2467_s11 = smov 117  }
0x10df   :  { %v1683_v25 = vadd.f32 %v1671_v20, %v1668_v7  ;;  %v1721_v39 = vadd.f32 %v1709_v55, %v1706_v14  ;;  %v1759_v27 = vadd.f32 %v1747_v2, %v1744_v49  ;;  %v1896_v1 = vstv %s3651_s13  ;;  %s2468_s13 = smov 114  }
0x10e0   :  { %v1682_v47 = vadd.f32 %v1665_v54, %v1662_v44  ;;  %v1720_v34 = vadd.f32 %v1703_v51, %v1700_v57  ;;  %v1758_v17 = vadd.f32 %v1741_v59, %v1738_v33  ;;  %v1802_v31 = vstv %s3653_s14  ;;  %s3800_s14 = smov 8  }
0x10e1   :  { %v1686_v12 = vadd.f32 %v1684_v30, %v1683_v25  ;;  %v1724_v18 = vadd.f32 %v1722_v53, %v1721_v39  ;;  %v1762_v42 = vadd.f32 %v1760_v40, %v1759_v27  ;;  %v1840_v30 = vstv %s3655_s6  ;;  %s2469_s6 = smov 5  }
0x10e2   :  { %v1685_v13 = vadd.f32 %v1682_v47, %v1681_v37  ;;  %v1723_v0 = vadd.f32 %v1720_v34, %v1719_v62  ;;  %v1761_v41 = vadd.f32 %v1758_v17, %v1757_v28  ;;  %v1878_v53 = vstv %s3657_s1  ;;  %s2470_s1 = smov 120  }
0x10e3   :  { %v1849_v56 = vstv %s3661_s17  ;;  %v1893_v54 = vstv %s3669_s20  ;;  %v1823_v37 = vstv %s3671_s16  ;;  %v1861_v44 = vstv %s3673_s3  ;;  %s3801_s17 = sld [smem:[#allocation18_spill]] }
0x10e4   :  { %v1687_v7 = vadd.f32 %v1686_v12, %v1685_v13  ;;  %v1725_v14 = vadd.f32 %v1724_v18, %v1723_v0  ;;  %v1763_v49 = vadd.f32 %v1762_v42, %v1761_v41  ;;  %v1808_v39 = vstv %s3675_s21  ;;  %s3802_s16 = sld [smem:[#allocation19_spill]]  ;;  %s3803_s21 = smov 16  }
0x10e5   :  { %v1846_v27 = vstv %s3677_s22  ;;  %v1884_v47 = vstv %s3679_s4  ;;  %v1799_v34 = vstv %s3681_s12  ;;  %v1837_v18 = vstv %s3683_s15 }
0x10e6   :  { %v1688_v32 = vadd.f32 %v1687_v7, %v1680_v52  ;;  %v1726_v50 = vadd.f32 %v1725_v14, %v1718_v9  ;;  %v1764_v43 = vadd.f32 %v1763_v49, %v1756_v46  ;;  %v1875_v42 = vstv %s3685_s10 }
0x10e7   :  { %v1814_v13 = vstv %s3687_s0  ;;  %v1852_v0 = vstv %s3689_s24  ;;  %v1890_v41 = vstv %s3691_s28  ;;  %v1805_v52 = vstv %s3697_s18 }
0x10e8   :  { %v1767_v3 = vadd.f32 %v1766_v26, %v1764_v43  ;;  %v1729_v48 = vadd.f32 %v1728_v19, %v1726_v50  ;;  %v1691_v58 = vadd.f32 %v1690_v23, %v1688_v32  ;;  %v1843_v9 = vstv %s3703_s26 }
0x10e9   :  { %v1881_v49 = vstv %s3709_s27 }
0x10ea   :  { %v1770_v22 = vmax.f32 %v1767_v3, 0.0  ;;  %v1769_v11 = vmax.f32 %v1729_v48, 0.0  ;;  %v1768_v36 = vmax.f32 %v1691_v58, 0.0  ;;  %s2054_s3 = sshll.u32 %s3802_s16, 4  ;;  %s2055_s3 = int_to_ptr.hbm [resolvable:$true] %s2054_s3 }
0x10ec   :  { %1778 = vrot.lane.b32.xlu2 %v1770_v22, %s3798_s5  ;;  %1776 = vrot.lane.b32.xlu1 %v1769_v11, %s3798_s5  ;;  %v1821_v51 = vmul.f32 %v1820_v38, %v1770_v22  ;;  %v1859_v59 = vmul.f32 %v1858_v24, %v1770_v22  ;;  %v1897_v61 = vmul.f32 %v1896_v1, %v1770_v22 }
0x10ed   :  { %1774 = vrot.lane.b32.xlu0 %v1768_v36, %s3798_s5  ;;  %v1803_v20 = vmul.f32 %v1802_v31, %v1768_v36  ;;  %v1841_v55 = vmul.f32 %v1840_v30, %v1768_v36  ;;  %v1879_v2 = vmul.f32 %v1878_v53, %v1768_v36  ;;  %v1812_v60 = vmul.f32 %v1811_v63, %v1769_v11 }
0x10ee   :  { %v1850_v57 = vmul.f32 %v1849_v56, %v1769_v11  ;;  %v1888_v33 = vmul.f32 %v1887_v45, %v1769_v11 }
0x10f4   :  { %1790 = vrot.lane.b32.xlu2 %v1770_v22, %s3799_s7  ;;  %1788 = vrot.lane.b32.xlu1 %v1769_v11, %s3799_s7 }
0x10f5   :  { %1786 = vrot.lane.b32.xlu0 %v1768_v36, %s3799_s7  ;;  %s3665_s7 = sld [smem:[#allocation7 + $0xbd]] }
0x10fb   :  { %v1817_v40 = vstv %s3665_s7  ;;  %s2052_s7 = sshll.u32 %s2471_s23, 4  ;;  %s2053_s7 = int_to_ptr.vmem [resolvable:$true] %s2052_s7 }
0x1146   :  { %v1779_v10 = vpop.permute.xlu2 %1778 }
0x1147   :  { %v1785_v5 = vsel %vm912_vm5, 0.0, %v1779_v10 }
0x1148   :  { %v1818_v62 = vmul.f32 %v1817_v40, %v1785_v5  ;;  %v1856_v25 = vmul.f32 %v1855_v16, %v1785_v5  ;;  %v1894_v28 = vmul.f32 %v1893_v54, %v1785_v5 }
0x114a   :  { %v1828_v46 = vadd.f32 %v1821_v51, %v1818_v62  ;;  %v1866_v7 = vadd.f32 %v1859_v59, %v1856_v25  ;;  %v1904_v26 = vadd.f32 %v1897_v61, %v1894_v28  ;;  %v1899_v51 = vstv %s3723_s29 }
0x114b   :  { %v1834_v28 = vstv %s3737_s9 }
0x114e   :  { %v1791_v6 = vpop.permute.xlu2 %1790 }
0x114f   :  { %v1797_v19 = vsel %vm1143_vm8, %v1791_v6, 0.0  ;;  %v1922_v6 = vand.u32 1, %v2532_v4 }
0x1150   :  { %v1824_v25 = vmul.f32 %v1823_v37, %v1797_v19 }
0x1151   :  { %vm1930_vm11 = vcmp.eq.s32.totalorder %v1922_v6, 0 }
0x115e   :  { %v1777_v29 = vpop.permute.xlu1 %1776 }
0x115f   :  { %v1775_v8 = vpop.permute.xlu0 %1774  ;;  %v1784_v12 = vsel %vm912_vm5, 0.0, %v1777_v29 }
0x1160   :  { %v1783_v17 = vsel %vm912_vm5, 0.0, %v1775_v8  ;;  %v1809_v23 = vmul.f32 %v1808_v39, %v1784_v12  ;;  %v1847_v43 = vmul.f32 %v1846_v27, %v1784_v12  ;;  %v1885_v3 = vmul.f32 %v1884_v47, %v1784_v12 }
0x1161   :  { %v1800_v14 = vmul.f32 %v1799_v34, %v1783_v17  ;;  %v1838_v32 = vmul.f32 %v1837_v18, %v1783_v17  ;;  %v1876_v48 = vmul.f32 %v1875_v42, %v1783_v17  ;;  %v1862_v39 = vmul.f32 %v1861_v44, %v1797_v19 }
0x1162   :  { %v1872_v27 = vstv %s3734_s8 }
0x1163   :  { %v1825_v24 = vadd.f32 %v1803_v20, %v1800_v14  ;;  %v1863_v53 = vadd.f32 %v1841_v55, %v1838_v32  ;;  %v1901_v16 = vadd.f32 %v1879_v2, %v1876_v48  ;;  %v1900_v55 = vmul.f32 %v1899_v51, %v1797_v19  ;;  %v1984_v32 = vld [vmem:[#allocation3 + $0x8] sm:$0x1] }
0x1164   :  { %v1910_v2 = vstv %s3731_s30  ;;  %2307 = vmatpush.msk.msrb.mxu0 %vm1993_vm12, %v1984_v32 }
0x1166   :  { %v1789_v50 = vpop.permute.xlu1 %1788 }
0x1167   :  { %v1796_v58 = vsel %vm1143_vm8, %v1789_v50, 0.0  ;;  %v1787_v22 = vpop.permute.xlu0 %1786  ;;  %v1983_v50 = vld [vmem:[#allocation3] sm:$0xff] }
0x1168   :  { %v1815_v11 = vmul.f32 %v1814_v13, %v1796_v58  ;;  %v1853_v36 = vmul.f32 %v1852_v0, %v1796_v58  ;;  %v1891_v10 = vmul.f32 %v1890_v41, %v1796_v58  ;;  %v1795_v38 = vsel %vm1143_vm8, %v1787_v22, 0.0  ;;  %2012 = vmatpush.msrb.mxu0 %v1983_v50 }
0x1169   :  { %v1806_v1 = vmul.f32 %v1805_v52, %v1795_v38  ;;  %v1844_v31 = vmul.f32 %v1843_v9, %v1795_v38  ;;  %v1882_v30 = vmul.f32 %v1881_v49, %v1795_v38  ;;  %vm2045_vm8 = vcmask 368640  }
0x116a   :  { %v1827_v63 = vadd.f32 %v1815_v11, %v1812_v60  ;;  %v1865_v56 = vadd.f32 %v1853_v36, %v1850_v57  ;;  %v1903_v40 = vadd.f32 %v1891_v10, %v1888_v33 }
0x116b   :  { %v1826_v54 = vadd.f32 %v1809_v23, %v1806_v1  ;;  %v1864_v45 = vadd.f32 %v1847_v43, %v1844_v31  ;;  %v1902_v5 = vadd.f32 %v1885_v3, %v1882_v30 }
0x116c   :  { %v1830_v59 = vadd.f32 %v1828_v46, %v1827_v63  ;;  %v1868_v61 = vadd.f32 %v1866_v7, %v1865_v56  ;;  %v1906_v29 = vadd.f32 %v1904_v26, %v1903_v40  ;;  %v2332_v56 = vld [vmem:[%s3801_s17] ss:$0 sm:$0xff] }
0x116d   :  { %v1829_v8 = vadd.f32 %v1826_v54, %v1825_v24  ;;  %v1867_v20 = vadd.f32 %v1864_v45, %v1863_v53  ;;  %v1905_v62 = vadd.f32 %v1902_v5, %v1901_v16 }
0x116f   :  { %v1831_v60 = vadd.f32 %v1830_v59, %v1829_v8  ;;  %v1869_v57 = vadd.f32 %v1868_v61, %v1867_v20  ;;  %v1907_v33 = vadd.f32 %v1906_v29, %v1905_v62 }
0x1171   :  { %v1908_v47 = vadd.f32 %v1907_v33, %v1900_v55  ;;  %v1870_v34 = vadd.f32 %v1869_v57, %v1862_v39  ;;  %v1832_v17 = vadd.f32 %v1831_v60, %v1824_v25 }
0x1173   :  { %v1911_v12 = vadd.f32 %v1910_v2, %v1908_v47  ;;  %v1873_v18 = vadd.f32 %v1872_v27, %v1870_v34  ;;  %v1835_v42 = vadd.f32 %v1834_v28, %v1832_v17 }
0x1175   :  { %v1916_v13 = vadd.f32 %v1911_v12, %v3522_v21  ;;  %v1914_v37 = vadd.f32 %v1873_v18, %v3520_v35  ;;  %v1912_v44 = vadd.f32 %v1835_v42, %v3518_v15 }
0x1177   :  { %v1917_v0 = vmax.f32 %v1916_v13, 0.0  ;;  %v1915_v41 = vmax.f32 %v1914_v37, 0.0  ;;  %v1913_v52 = vmax.f32 %v1912_v44, 0.0 }
0x1179   :  { %v1943_v9 = vsel %vm1930_vm11, %v1917_v0, 0.0  ;;  %v1938_v46 = vsel %vm1930_vm11, %v1915_v41, 0.0  ;;  %v1933_v7 = vsel %vm1930_vm11, %v1913_v52, 0.0 }
0x117a   :  { %v1944_v14 = vsel %vm270_vm4, %v1943_v9, 0.0  ;;  %v1939_v4 = vsel %vm270_vm4, %v1938_v46, 0.0  ;;  %v1934_v49 = vsel %vm270_vm4, %v1933_v7, 0.0 }
0x117b   :  { %1945 = vadd.xlane.f32.xlu2 %v1944_v14  ;;  %1940 = vadd.xlane.f32.xlu1 %v1939_v4 }
0x117c   :  { %1935 = vadd.xlane.f32.xlu0 %v1934_v49 }
0x11ee   :  { %v1941_v21 = vpop.xlane.xlu1 %1940  ;;  %v1946_v19 = vpop.xlane.xlu2 %1945 }
0x11ef   :  { %v1942_v35 = vsub.f32 %v1941_v21, %v1938_v46  ;;  %v1936_v26 = vpop.xlane.xlu0 %1935  ;;  %v1947_v23 = vsub.f32 %v1946_v19, %v1943_v9 }
0x11f0   :  { %v1937_v15 = vsub.f32 %v1936_v26, %v1933_v7 }
0x11f1   :  { %1956 = vrot.lane.b32.xlu1 %v1942_v35, %s2467_s11 }
0x11f2   :  { %1952 = vrot.lane.b32.xlu0 %v1937_v15, %s3798_s5  ;;  %1949 = vrot.lane.b32.xlu2 %v1937_v15, %s2468_s13 }
0x11f9   :  { %1966 = vrot.lane.b32.xlu1 %v1947_v23, %s3800_s14 }
0x11fa   :  { %1959 = vrot.lane.b32.xlu0 %v1942_v35, %s2469_s6  ;;  %1963 = vrot.lane.b32.xlu2 %v1947_v23, %s2470_s1 }
0x124c   :  { %v1950_v43 = vpop.permute.xlu2 %1949 }
0x124d   :  { %v1969_v48 = vsel %vm974_vm9, %v1950_v43, %v1936_v26 }
0x1254   :  { %v1964_v38 = vpop.permute.xlu2 %1963 }
0x1263   :  { %v1957_v58 = vpop.permute.xlu1 %1956 }
0x1264   :  { %v1953_v3 = vpop.permute.xlu0 %1952 }
0x1265   :  { %v1970_v22 = vsel %vm912_vm5, %v1969_v48, %v1953_v3 }
0x1266   :  { %v1971_v11 = vsel %vm850_vm6, %v1970_v22, %v1957_v58 }
0x1267   :  { %v1973_v10 = vsel %vm1972_vm13, %v1971_v11, %v1941_v21 }
0x126b   :  { %v1967_v31 = vpop.permute.xlu1 %1966 }
0x126c   :  { %v1960_v36 = vpop.permute.xlu0 %1959 }
0x126d   :  { %v1975_v24 = vsel %vm1974_vm14, %v1973_v10, %v1960_v36 }
0x126e   :  { %v1977_v1 = vsel %vm1976_vm15, %v1975_v24, %v1964_v38 }
0x126f   :  { %v1979_v30 = vsel %vm1978_vm0, %v1977_v1, %v1946_v19 }
0x1270   :  { %v1981_v53 = vsel %vm1980_vm1, %v1979_v30, %v1967_v31 }
0x1271   :  { %v1982_v63 = vmul.f32 0.125, %v1981_v53 }
0x1273   :  { %2308 = vmatmul.msk.f32.vlgmr.msrb.gmra.mxu0 %vm1989_vm2, %v1982_v63 }
0x12f0   :  { %v2014_v40 = vpop.f32.mrf.mxu0 }
0x12f1   :  { %v2015_v16 = vadd.f32 %v2332_v56, %v2014_v40 }
0x12f3   :  { %v2018_v54 = vsel %vm2017_vm3, %v2015_v16, -inf }
0x12f4   :  { %2019 = vmax.xlane.f32.xlu0 %v2018_v54 }
0x1367   :  { %v2020_v45 = vpop.xlane.xlu0 %2019 }
0x1368   :  { %v2021_v5 = vsub.f32 %v2015_v16, %v2020_v45 }
0x136a   :  { %v2022_v51 = vmul.f32 1.442695, %v2021_v5 }
0x136c   :  { %2381 = vpow2.f32 %v2022_v51 }
0x1372   :  { %v2382_v59 = vpop.eup %2381 }
0x1373   :  { %v2024_v61 = vsel %vm2017_vm3, %v2382_v59, 0.0 }
0x1374   :  { %2025 = vadd.xlane.f32.xlu2 %v2024_v61 }
0x13e7   :  { %v2026_v29 = vpop.xlane.xlu2 %2025 }
0x13e8   :  { %2383 = vrcp.f32 %v2026_v29  ;;  %v2038_v25 = vand.u32 2147483648, %v2026_v29  ;;  %v2036_v55 = vand.u32 2147483647, %v2026_v29  ;;  %vm2032_vm5 = vweird.f32 %v2026_v29 }
0x13ea   :  { %v2039_v57 = vor.u32 1.1754944e-38, %v2038_v25  ;;  %vm2037_vm7 = vcmp.eq.f32.partialorder %v2036_v55, 8.507059e+37 }
0x13ee   :  { %v2384_v8 = vpop.eup %2383 }
0x13ef   :  { %v2028_v20 = vmul.f32 %v2384_v8, %v2026_v29  ;;  %vm2033_vm4 = vweird.f32 %v2384_v8 }
0x13f0   :  { %vm2034_vm6 = vmor %vm2032_vm5, %vm2033_vm4 }
0x13f1   :  { %v2029_v62 = vsub.f32 1.0, %v2028_v20 }
0x13f3   :  { %v2030_v39 = vmul.f32 %v2384_v8, %v2029_v62 }
0x13f5   :  { %v2031_v60 = vadd.f32 %v2384_v8, %v2030_v39 }
0x13f7   :  { %v2035_v33 = vsel %vm2034_vm6, %v2384_v8, %v2031_v60 }
0x13f8   :  { %v2040_v2 = vsel %vm2037_vm7, %v2039_v57, %v2035_v33 }
0x13f9   :  { %v2041_v27 = vmul.f32 %v2382_v59, %v2040_v2 }
0x13fb   :  { %v2043_v28 = vrot.slane %v2041_v27, 1  ;;  %2046 = vst.msk [vmem:[#allocation8] sm:$0x1] %vm2045_vm8, %v2041_v27 }
0x13fd   :  { %2047 = vst.msk [vmem:[#allocation8 + $0x1] sm:$0x1] %vm2045_vm8, %v2043_v28 }
0x13fe   :  { %2060 = dma.vmem_to_hbm [thread:$0]  %s2053_s7, 32, %s2055_s3, [#allocation5], %s3803_s21, %s3803_s21, %s3796_s25  }
0x13ff   :  { %2449 = dma.done.wait [#allocation5], 32  }
0x1400   :  { %2450 = vsyncadd [#allocation5], 4294967264 }
0x1401   :  { %2065 = vsyncpa [#allocation4], 1 }
0x1402   :  { %2066 = vsyncpa [#allocation5], 1 }
0x1403   :  { %2067 = vsyncpa [#allocation6], 1 }

</bundles_post_ra>
